<compile_context>
chip_gen: v7x
topology: tpu7x:2x2x1
jax: 0.10.0
libtpu: 0.0.40
codegen_flags: <defaults>
</compile_context>

<pallas_src>
import math

import jax
import jax.numpy as jnp
from jax import lax
from jax.experimental import pallas as pl
from jax.experimental.pallas import tpu as pltpu

_TWO_PI = 2.0 * math.pi


# ----------------------------- fused kernel -------------------------------- #

def _geoclip_fused_kernel(
    scale_ref,                                   # SMEM (1,1) f32 = exp(logit_scale)
    x_ref,                                       # (tn, in_dim) bf16 flattened image chunk
    wi1_ref, bi1_ref, wi2_ref, bi2_ref,          # image MLP (wb@w1 folded), bf16 W / f32 b
    gps_ref,                                     # (m, 2) f32
    wr_ref,                                      # (2, rff_half) f32 RFF matrix
    wl1_ref, bl1_ref, wl2_ref, bl2_ref,          # location MLP, bf16 W / f32 b
    o_ref,                                       # (tn, m) f32 logits chunk
):
    # ---- image encoder (MLP head) ------------------------------------------
    # TODO(synk): GeoCLIP's frozen CLIP ViT backbone has no clean Pallas
    # equivalent; it is replaced by a linear projection folded into the first
    # MLP layer (wi1 = wb @ w1). The trainable head (Linear->ReLU->Linear) is
    # reproduced faithfully.
    h = jnp.dot(x_ref[...], wi1_ref[...], preferred_element_type=jnp.float32)
    h = jnp.maximum(h + bi1_ref[...], 0.0)
    img = jnp.dot(h.astype(jnp.bfloat16), wi2_ref[...],
                  preferred_element_type=jnp.float32) + bi2_ref[...]

    # ---- location encoder ---------------------------------------------------
    # Recomputed per grid step (it is ~0.1 MFLOP); intentional so the grid
    # axis over images can stay "parallel" (no cross-step scratch dependence).
    # TODO(synk): single RFF sigma level (GeoCLIP sums 3 hierarchical levels).
    gps = gps_ref[...]
    wr = wr_ref[...]
    # K=2 projection as two VPU rank-1 updates (stays f32, MXU left free).
    proj = _TWO_PI * (gps[:, 0:1] * wr[0:1, :] + gps[:, 1:2] * wr[1:2, :])
    # Lane concat cos||sin -> (m, 2*rff_half): one lane-dense K=128 MXU dot.
    rff = jnp.concatenate([jnp.cos(proj), jnp.sin(proj)], axis=-1)
    hl = jnp.dot(rff.astype(jnp.bfloat16), wl1_ref[...],
                 preferred_element_type=jnp.float32) + bl1_ref[...]
    hl = jnp.maximum(hl, 0.0)
    loc = jnp.dot(hl.astype(jnp.bfloat16), wl2_ref[...],
                  preferred_element_type=jnp.float32) + bl2_ref[...]

    # ---- CLIP head -----------------------------------------------------------
    # F.normalize(x, dim=1) == x / max(||x||, 1e-12); rsqrt on the squared norm
    # (eps squared) lowers to the EUP. exp(logit_scale) is folded into the
    # (tn,1) inverse norm, not the (tn,D) tensor.
    inv_img = scale_ref[0, 0] * lax.rsqrt(
        jnp.maximum(jnp.sum(img * img, axis=-1, keepdims=True), 1e-24))
    inv_loc = lax.rsqrt(
        jnp.maximum(jnp.sum(loc * loc, axis=-1, keepdims=True), 1e-24))
    img_n = img * inv_img
    loc_n = loc * inv_loc
    # Exactly as in the module: image_features @ location_features (no .T).
    o_ref[...] = jnp.dot(img_n.astype(jnp.bfloat16), loc_n.astype(jnp.bfloat16),
                         preferred_element_type=jnp.float32)


# ----------------------------- host-side prep / wrapper -------------------- #

def prepare_params(img_params, loc_params, logit_scale):
    """One-time host-side prep: fold wb@w1, cast matmul weights to bf16,
    precompute exp(logit_scale)."""
    wb, w1, b1, w2, b2 = img_params
    wi1 = jnp.dot(wb, w1).astype(jnp.bfloat16)   # fold: no nonlinearity between
    wr, lw1, lb1, lw2, lb2 = loc_params
    return dict(
        wi1=wi1,
        bi1=b1.astype(jnp.float32),
        wi2=w2.astype(jnp.bfloat16),
        bi2=b2.astype(jnp.float32),
        wr=wr.astype(jnp.float32),
        wl1=lw1.astype(jnp.bfloat16),            # rows [0:rff_half]=cos, [rff_half:]=sin
        bl1=lb1.astype(jnp.float32),
        wl2=lw2.astype(jnp.bfloat16),
        bl2=lb2.astype(jnp.float32),
        scale=jnp.reshape(jnp.exp(logit_scale.astype(jnp.float32)), (1, 1)),
    )


def geoclip_forward(image_nchw, location, p, *, tn=16):
    n = image_nchw.shape[0]
    m = location.shape[0]
    emb_dim = p["wi2"].shape[1]
    hidden = p["wi1"].shape[1]
    rff_half = p["wr"].shape[1]
    assert m == emb_dim, "module's no-transpose matmul requires m == embedding dim"
    assert n % tn == 0, "image batch must be divisible by the tile size"

    x_flat = image_nchw.reshape(n, -1).astype(jnp.bfloat16)
    in_dim = x_flat.shape[1]
    gps = location.astype(jnp.float32)
    grid = (n // tn,)

    const2 = lambda i: (0, 0)                    # constant block -> DMA'd once
    in_specs = [
        pl.BlockSpec((1, 1), const2, memory_space=pltpu.MemorySpace.SMEM),  # scale
        pl.BlockSpec((tn, in_dim), lambda i: (i, 0)),                       # x chunk
        pl.BlockSpec((in_dim, hidden), const2),                             # wi1
        pl.BlockSpec((1, hidden), const2),                                  # bi1
        pl.BlockSpec((hidden, emb_dim), const2),                            # wi2
        pl.BlockSpec((1, emb_dim), const2),                                 # bi2
        pl.BlockSpec((m, 2), const2),                                       # gps
        pl.BlockSpec((2, rff_half), const2),                                # wr
        pl.BlockSpec((2 * rff_half, hidden), const2),                       # wl1
        pl.BlockSpec((1, hidden), const2),                                  # bl1
        pl.BlockSpec((hidden, emb_dim), const2),                            # wl2
        pl.BlockSpec((1, emb_dim), const2),                                 # bl2
    ]
    out_specs = pl.BlockSpec((tn, m), lambda i: (i, 0))

    # Explicit VMEM budget (sized below v5e's default scoped limit) and a
    # footprint assert (x2 for double-buffering is a conservative upper bound).
    vmem_limit_bytes = 16 * 1024 * 1024
    resident = (tn * in_dim * x_flat.dtype.itemsize            # x block
                + tn * m * 4                                   # output block
                + sum(int(a.size) * a.dtype.itemsize
                      for a in (p["wi1"], p["bi1"], p["wi2"], p["bi2"], gps,
                                p["wr"], p["wl1"], p["bl1"], p["wl2"], p["bl2"])))
    assert 2 * resident < vmem_limit_bytes, (
        f"resident VMEM footprint ~{2 * resident} B exceeds limit "
        f"{vmem_limit_bytes} B; add K-tiling (see TODO)")

    return pl.pallas_call(
        _geoclip_fused_kernel,
        out_shape=jax.ShapeDtypeStruct((n, m), jnp.float32),
        grid=grid,
        in_specs=in_specs,
        out_specs=out_specs,
        compiler_params=pltpu.CompilerParams(
            dimension_semantics=("parallel",),
            vmem_limit_bytes=vmem_limit_bytes),
    )(p["scale"], x_flat,
      p["wi1"], p["bi1"], p["wi2"], p["bi2"],
      gps, p["wr"],
      p["wl1"], p["bl1"], p["wl2"], p["bl2"])


# ----------------------------- references (pure JAX) ----------------------- #

def _reference_bf16(image_nchw, location, p):
    """Mirrors the kernel's precision (bf16 matmul operands, f32 accumulation)."""
    n = image_nchw.shape[0]
    f32 = jnp.float32
    x = image_nchw.reshape(n, -1).astype(jnp.bfloat16)
    h = jnp.dot(x, p["wi1"], preferred_element_type=f32)
    h = jnp.maximum(h + p["bi1"], 0.0)
    img = jnp.dot(h.astype(jnp.bfloat16), p["wi2"], preferred_element_type=f32) + p["bi2"]
    gps = location.astype(f32)
    proj = _TWO_PI * (gps[:, 0:1] * p["wr"][0:1, :] + gps[:, 1:2] * p["wr"][1:2, :])
    rff = jnp.concatenate([jnp.cos(proj), jnp.sin(proj)], axis=-1)
    hl = jnp.dot(rff.astype(jnp.bfloat16), p["wl1"], preferred_element_type=f32) + p["bl1"]
    hl = jnp.maximum(hl, 0.0)
    loc = jnp.dot(hl.astype(jnp.bfloat16), p["wl2"], preferred_element_type=f32) + p["bl2"]
    img_n = img / jnp.maximum(jnp.linalg.norm(img, axis=1, keepdims=True), 1e-12)
    loc_n = loc / jnp.maximum(jnp.linalg.norm(loc, axis=1, keepdims=True), 1e-12)
    img_n = img_n * p["scale"][0, 0]
    return jnp.dot(img_n.astype(jnp.bfloat16), loc_n.astype(jnp.bfloat16),
                   preferred_element_type=f32)


def _reference_f32(image_nchw, location, img_params, loc_params, logit_scale):
    """Full-fp32 transcription of the original module math (fidelity bound)."""
    n = image_nchw.shape[0]
    x = image_nchw.reshape(n, -1).astype(jnp.float32)
    wb, w1, b1, w2, b2 = img_params
    img = jnp.maximum(x @ wb @ w1 + b1, 0.0) @ w2 + b2
    wr, lw1, lb1, lw2, lb2 = loc_params
    proj = _TWO_PI * (location.astype(jnp.float32) @ wr)
    rff = jnp.concatenate([jnp.cos(proj), jnp.sin(proj)], axis=-1)
    loc = jnp.maximum(rff @ lw1 + lb1, 0.0) @ lw2 + lb2
    img_n = img / jnp.maximum(jnp.linalg.norm(img, axis=1, keepdims=True), 1e-12)
    loc_n = loc / jnp.maximum(jnp.linalg.norm(loc, axis=1, keepdims=True), 1e-12)
    return jnp.exp(logit_scale) * (img_n @ loc_n)


# ----------------------------- parameter init ------------------------------ #

def init_params(key, in_dim, backbone_dim, hidden, emb_dim, rff_half, rff_sigma=0.1):
    ks = jax.random.split(key, 9)
    img_params = (
        0.02 * jax.random.normal(ks[0], (in_dim, backbone_dim), jnp.float32),
        0.02 * jax.random.normal(ks[1], (backbone_dim, hidden), jnp.float32),
        0.01 * jax.random.normal(ks[2], (1, hidden), jnp.float32),
        0.02 * jax.random.normal(ks[3], (hidden, emb_dim), jnp.float32),
        0.01 * jax.random.normal(ks[4], (1, emb_dim), jnp.float32),
    )
    loc_params = (
        rff_sigma * jax.random.normal(ks[5], (2, rff_half), jnp.float32),   # RFF matrix
        0.02 * jax.random.normal(ks[6], (2 * rff_half, hidden), jnp.float32),
        0.01 * jax.random.normal(ks[7], (1, hidden), jnp.float32),
        0.02 * jax.random.normal(ks[8], (hidden, emb_dim), jnp.float32),
        jnp.zeros((1, emb_dim), jnp.float32),
    )
    logit_scale = jnp.asarray(math.log(1.0 / 0.07), jnp.float32)   # nn.Parameter init
    return img_params, loc_params, logit_scale


# ----------------------------- main ---------------------------------------- #

if __name__ == "__main__":
    n, C, H, W = 32, 3, 16, 16
    emb_dim = 128
    m = emb_dim          # required by the module's no-transpose matmul
    backbone_dim = 256
    hidden = 256
    rff_half = 64
    tn = 16              # image-batch tile -> grid of 2 "parallel" steps

    key = jax.random.PRNGKey(0)
    k_img, k_gps, k_par = jax.random.split(key, 3)

    image = jax.random.normal(k_img, (n, C, H, W), jnp.float32)       # NCHW
    location = jax.random.uniform(
        k_gps, (m, 2), jnp.float32, minval=-90.0, maxval=90.0)

    img_params, loc_params, logit_scale = init_params(
        k_par, C * H * W, backbone_dim, hidden, emb_dim, rff_half)
    prepared = prepare_params(img_params, loc_params, logit_scale)

    logits = geoclip_forward(image, location, prepared, tn=tn)
    logits = jax.block_until_ready(logits)
    assert logits.shape == (n, m)

    ref_bf16 = _reference_bf16(image, location, prepared)
    assert jnp.allclose(logits, ref_bf16, rtol=1e-2, atol=2e-2), \
        "mismatch vs precision-matched reference"

    ref_f32 = _reference_f32(image, location, img_params, loc_params, logit_scale)
    assert jnp.allclose(logits, ref_f32, rtol=0.0, atol=0.5), \
        "mismatch vs fp32 reference beyond bf16 error bound"

    print("KERNEL_OK")
</pallas_src>

<mosaic_0001>
module attributes {stable_mosaic.version = 11 : i64} {
  func.func @_geoclip_fused_kernel(%arg0: i32, %arg1: memref<1x1xf32, #tpu.memory_space<smem>>, %arg2: memref<16x768xbf16, #tpu.memory_space<vmem>>, %arg3: memref<768x256xbf16, #tpu.memory_space<vmem>>, %arg4: memref<1x256xf32, #tpu.memory_space<vmem>>, %arg5: memref<256x128xbf16, #tpu.memory_space<vmem>>, %arg6: memref<1x128xf32, #tpu.memory_space<vmem>>, %arg7: memref<128x2xf32, #tpu.memory_space<vmem>>, %arg8: memref<2x64xf32, #tpu.memory_space<vmem>>, %arg9: memref<128x256xbf16, #tpu.memory_space<vmem>>, %arg10: memref<1x256xf32, #tpu.memory_space<vmem>>, %arg11: memref<256x128xbf16, #tpu.memory_space<vmem>>, %arg12: memref<1x128xf32, #tpu.memory_space<vmem>>, %arg13: memref<16x128xf32, #tpu.memory_space<vmem>>) attributes {dimension_semantics = [#tpu.dimension_semantics<parallel>], iteration_bounds = array<i64: 2>, scalar_prefetch = 0 : i64, scratch_operands = 0 : i64, tpu.core_type = #tpu.core_type<tc>, window_params = [{transform_indices = @transform_0, window_bounds = array<i64: 1, 1>}, {transform_indices = @transform_1, window_bounds = array<i64: 16, 768>}, {pipeline_mode = #tpu.pipeline_mode<synchronous>, transform_indices = @transform_2, window_bounds = array<i64: 768, 256>}, {pipeline_mode = #tpu.pipeline_mode<synchronous>, transform_indices = @transform_3, window_bounds = array<i64: 1, 256>}, {pipeline_mode = #tpu.pipeline_mode<synchronous>, transform_indices = @transform_4, window_bounds = array<i64: 256, 128>}, {pipeline_mode = #tpu.pipeline_mode<synchronous>, transform_indices = @transform_5, window_bounds = array<i64: 1, 128>}, {pipeline_mode = #tpu.pipeline_mode<synchronous>, transform_indices = @transform_6, window_bounds = array<i64: 128, 2>}, {pipeline_mode = #tpu.pipeline_mode<synchronous>, transform_indices = @transform_7, window_bounds = array<i64: 2, 64>}, {pipeline_mode = #tpu.pipeline_mode<synchronous>, transform_indices = @transform_8, window_bounds = array<i64: 128, 256>}, {pipeline_mode = #tpu.pipeline_mode<synchronous>, transform_indices = @transform_9, window_bounds = array<i64: 1, 256>}, {pipeline_mode = #tpu.pipeline_mode<synchronous>, transform_indices = @transform_10, window_bounds = array<i64: 256, 128>}, {pipeline_mode = #tpu.pipeline_mode<synchronous>, transform_indices = @transform_11, window_bounds = array<i64: 1, 128>}, {transform_indices = @transform_12, window_bounds = array<i64: 16, 128>}]} {
    %c0 = arith.constant 0 : index
    %c0_0 = arith.constant 0 : index
    %0 = vector.load %arg2[%c0, %c0_0] : memref<16x768xbf16, #tpu.memory_space<vmem>>, vector<16x768xbf16>
    %c0_1 = arith.constant 0 : index
    %c0_2 = arith.constant 0 : index
    %1 = vector.load %arg3[%c0_1, %c0_2] : memref<768x256xbf16, #tpu.memory_space<vmem>>, vector<768x256xbf16>
    %cst = arith.constant dense<0.000000e+00> : vector<16x256xf32>
    %2 = tpu.matmul %0, %1, %cst {dimension_numbers = #tpu.dot_dimension_numbers<[1], [0], [0], [1], [0, 0, 1, 1], [], []>} : vector<16x768xbf16>, vector<768x256xbf16>, vector<16x256xf32> -> vector<16x256xf32>
    %c0_3 = arith.constant 0 : index
    %c0_4 = arith.constant 0 : index
    %3 = vector.load %arg4[%c0_3, %c0_4] : memref<1x256xf32, #tpu.memory_space<vmem>>, vector<1x256xf32>
    %4 = vector.broadcast %3 : vector<1x256xf32> to vector<16x256xf32>
    %5 = arith.addf %2, %4 : vector<16x256xf32>
    %cst_5 = arith.constant 0.000000e+00 : f32
    %6 = vector.broadcast %cst_5 : f32 to vector<16x256xf32>
    %7 = arith.maximumf %5, %6 : vector<16x256xf32>
    %8 = arith.truncf %7 : vector<16x256xf32> to vector<16x256xbf16>
    %c0_6 = arith.constant 0 : index
    %c0_7 = arith.constant 0 : index
    %9 = vector.load %arg5[%c0_6, %c0_7] : memref<256x128xbf16, #tpu.memory_space<vmem>>, vector<256x128xbf16>
    %cst_8 = arith.constant dense<0.000000e+00> : vector<16x128xf32>
    %10 = tpu.matmul %8, %9, %cst_8 {dimension_numbers = #tpu.dot_dimension_numbers<[1], [0], [0], [1], [0, 0, 1, 1], [], []>} : vector<16x256xbf16>, vector<256x128xbf16>, vector<16x128xf32> -> vector<16x128xf32>
    %c0_9 = arith.constant 0 : index
    %c0_10 = arith.constant 0 : index
    %11 = vector.load %arg6[%c0_9, %c0_10] : memref<1x128xf32, #tpu.memory_space<vmem>>, vector<1x128xf32>
    %12 = vector.broadcast %11 : vector<1x128xf32> to vector<16x128xf32>
    %13 = arith.addf %10, %12 : vector<16x128xf32>
    %c0_11 = arith.constant 0 : index
    %c0_12 = arith.constant 0 : index
    %14 = vector.load %arg7[%c0_11, %c0_12] : memref<128x2xf32, #tpu.memory_space<vmem>>, vector<128x2xf32>
    %c0_13 = arith.constant 0 : index
    %c0_14 = arith.constant 0 : index
    %15 = vector.load %arg8[%c0_13, %c0_14] : memref<2x64xf32, #tpu.memory_space<vmem>>, vector<2x64xf32>
    %16 = vector.extract_strided_slice %14 {offsets = [0, 0], sizes = [128, 1], strides = [1, 1]} : vector<128x2xf32> to vector<128x1xf32>
    %17 = vector.extract_strided_slice %15 {offsets = [0, 0], sizes = [1, 64], strides = [1, 1]} : vector<2x64xf32> to vector<1x64xf32>
    %18 = vector.broadcast %16 : vector<128x1xf32> to vector<128x64xf32>
    %19 = vector.broadcast %17 : vector<1x64xf32> to vector<128x64xf32>
    %20 = arith.mulf %18, %19 : vector<128x64xf32>
    %21 = vector.extract_strided_slice %14 {offsets = [0, 1], sizes = [128, 1], strides = [1, 1]} : vector<128x2xf32> to vector<128x1xf32>
    %22 = vector.extract_strided_slice %15 {offsets = [1, 0], sizes = [1, 64], strides = [1, 1]} : vector<2x64xf32> to vector<1x64xf32>
    %23 = vector.broadcast %21 : vector<128x1xf32> to vector<128x64xf32>
    %24 = vector.broadcast %22 : vector<1x64xf32> to vector<128x64xf32>
    %25 = arith.mulf %23, %24 : vector<128x64xf32>
    %26 = arith.addf %20, %25 : vector<128x64xf32>
    %cst_15 = arith.constant 6.28318548 : f32
    %27 = vector.broadcast %cst_15 : f32 to vector<128x64xf32>
    %28 = arith.mulf %27, %26 : vector<128x64xf32>
    %29 = math.cos %28 : vector<128x64xf32>
    %30 = math.sin %28 : vector<128x64xf32>
    %31 = tpu.concatenate %29, %30 in 1 : vector<128x64xf32>, vector<128x64xf32> -> vector<128x128xf32>
    %32 = arith.truncf %31 : vector<128x128xf32> to vector<128x128xbf16>
    %c0_16 = arith.constant 0 : index
    %c0_17 = arith.constant 0 : index
    %33 = vector.load %arg9[%c0_16, %c0_17] : memref<128x256xbf16, #tpu.memory_space<vmem>>, vector<128x256xbf16>
    %cst_18 = arith.constant dense<0.000000e+00> : vector<128x256xf32>
    %34 = tpu.matmul %32, %33, %cst_18 {dimension_numbers = #tpu.dot_dimension_numbers<[1], [0], [0], [1], [0, 0, 1, 1], [], []>} : vector<128x128xbf16>, vector<128x256xbf16>, vector<128x256xf32> -> vector<128x256xf32>
    %c0_19 = arith.constant 0 : index
    %c0_20 = arith.constant 0 : index
    %35 = vector.load %arg10[%c0_19, %c0_20] : memref<1x256xf32, #tpu.memory_space<vmem>>, vector<1x256xf32>
    %36 = vector.broadcast %35 : vector<1x256xf32> to vector<128x256xf32>
    %37 = arith.addf %34, %36 : vector<128x256xf32>
    %cst_21 = arith.constant 0.000000e+00 : f32
    %38 = vector.broadcast %cst_21 : f32 to vector<128x256xf32>
    %39 = arith.maximumf %37, %38 : vector<128x256xf32>
    %40 = arith.truncf %39 : vector<128x256xf32> to vector<128x256xbf16>
    %c0_22 = arith.constant 0 : index
    %c0_23 = arith.constant 0 : index
    %41 = vector.load %arg11[%c0_22, %c0_23] : memref<256x128xbf16, #tpu.memory_space<vmem>>, vector<256x128xbf16>
    %cst_24 = arith.constant dense<0.000000e+00> : vector<128x128xf32>
    %42 = tpu.matmul %40, %41, %cst_24 {dimension_numbers = #tpu.dot_dimension_numbers<[1], [0], [0], [1], [0, 0, 1, 1], [], []>} : vector<128x256xbf16>, vector<256x128xbf16>, vector<128x128xf32> -> vector<128x128xf32>
    %c0_25 = arith.constant 0 : index
    %c0_26 = arith.constant 0 : index
    %43 = vector.load %arg12[%c0_25, %c0_26] : memref<1x128xf32, #tpu.memory_space<vmem>>, vector<1x128xf32>
    %44 = vector.broadcast %43 : vector<1x128xf32> to vector<128x128xf32>
    %45 = arith.addf %42, %44 : vector<128x128xf32>
    %c0_27 = arith.constant 0 : index
    %c0_28 = arith.constant 0 : index
    %46 = memref.load %arg1[%c0_27, %c0_28] : memref<1x1xf32, #tpu.memory_space<smem>>
    %47 = arith.mulf %13, %13 : vector<16x128xf32>
    %cst_29 = arith.constant dense<0.000000e+00> : vector<16xf32>
    %48 = vector.multi_reduction <add>, %47, %cst_29 [1] : vector<16x128xf32> to vector<16xf32>
    %49 = vector.shape_cast %48 : vector<16xf32> to vector<16x1xf32>
    %cst_30 = arith.constant 1.000000e-24 : f32
    %50 = vector.broadcast %cst_30 : f32 to vector<16x1xf32>
    %51 = arith.maximumf %49, %50 : vector<16x1xf32>
    %52 = math.rsqrt %51 : vector<16x1xf32>
    %53 = vector.broadcast %46 : f32 to vector<16x1xf32>
    %54 = arith.mulf %53, %52 : vector<16x1xf32>
    %55 = arith.mulf %45, %45 : vector<128x128xf32>
    %cst_31 = arith.constant dense<0.000000e+00> : vector<128xf32>
    %56 = vector.multi_reduction <add>, %55, %cst_31 [1] : vector<128x128xf32> to vector<128xf32>
    %57 = vector.shape_cast %56 : vector<128xf32> to vector<128x1xf32>
    %cst_32 = arith.constant 1.000000e-24 : f32
    %58 = vector.broadcast %cst_32 : f32 to vector<128x1xf32>
    %59 = arith.maximumf %57, %58 : vector<128x1xf32>
    %60 = math.rsqrt %59 : vector<128x1xf32>
    %61 = vector.broadcast %54 : vector<16x1xf32> to vector<16x128xf32>
    %62 = arith.mulf %13, %61 : vector<16x128xf32>
    %63 = vector.broadcast %60 : vector<128x1xf32> to vector<128x128xf32>
    %64 = arith.mulf %45, %63 : vector<128x128xf32>
    %65 = arith.truncf %62 : vector<16x128xf32> to vector<16x128xbf16>
    %66 = arith.truncf %64 : vector<128x128xf32> to vector<128x128xbf16>
    %cst_33 = arith.constant dense<0.000000e+00> : vector<16x128xf32>
    %67 = tpu.matmul %65, %66, %cst_33 {dimension_numbers = #tpu.dot_dimension_numbers<[1], [0], [0], [1], [0, 0, 1, 1], [], []>} : vector<16x128xbf16>, vector<128x128xbf16>, vector<16x128xf32> -> vector<16x128xf32>
    %c0_34 = arith.constant 0 : index
    %c0_35 = arith.constant 0 : index
    %68 = vector.load %arg13[%c0_34, %c0_35] : memref<16x128xf32, #tpu.memory_space<vmem>>, vector<16x128xf32>
    tpu.vector_store %arg13[%c0_34, %c0_35], %67 {strides = array<i32>} : memref<16x128xf32, #tpu.memory_space<vmem>>, vector<16x128xf32>,
    return
  }
  func.func @transform_0(%arg0: i32) -> (i32, i32) {
    %c0_i32 = arith.constant 0 : i32
    %c0_i32_0 = arith.constant 0 : i32
    %c0_i32_1 = arith.constant 0 : i32
    return %c0_i32, %c0_i32_0 : i32, i32
  }
  func.func @transform_1(%arg0: i32) -> (i32, i32) {
    %c0_i32 = arith.constant 0 : i32
    %c0_i32_0 = arith.constant 0 : i32
    return %arg0, %c0_i32 : i32, i32
  }
  func.func @transform_2(%arg0: i32) -> (i32, i32) {
    %c0_i32 = arith.constant 0 : i32
    %c0_i32_0 = arith.constant 0 : i32
    %c0_i32_1 = arith.constant 0 : i32
    return %c0_i32, %c0_i32_0 : i32, i32
  }
  func.func @transform_3(%arg0: i32) -> (i32, i32) {
    %c0_i32 = arith.constant 0 : i32
    %c0_i32_0 = arith.constant 0 : i32
    %c0_i32_1 = arith.constant 0 : i32
    return %c0_i32, %c0_i32_0 : i32, i32
  }
  func.func @transform_4(%arg0: i32) -> (i32, i32) {
    %c0_i32 = arith.constant 0 : i32
    %c0_i32_0 = arith.constant 0 : i32
    %c0_i32_1 = arith.constant 0 : i32
    return %c0_i32, %c0_i32_0 : i32, i32
  }
  func.func @transform_5(%arg0: i32) -> (i32, i32) {
    %c0_i32 = arith.constant 0 : i32
    %c0_i32_0 = arith.constant 0 : i32
    %c0_i32_1 = arith.constant 0 : i32
    return %c0_i32, %c0_i32_0 : i32, i32
  }
  func.func @transform_6(%arg0: i32) -> (i32, i32) {
    %c0_i32 = arith.constant 0 : i32
    %c0_i32_0 = arith.constant 0 : i32
    %c0_i32_1 = arith.constant 0 : i32
    return %c0_i32, %c0_i32_0 : i32, i32
  }
  func.func @transform_7(%arg0: i32) -> (i32, i32) {
    %c0_i32 = arith.constant 0 : i32
    %c0_i32_0 = arith.constant 0 : i32
    %c0_i32_1 = arith.constant 0 : i32
    return %c0_i32, %c0_i32_0 : i32, i32
  }
  func.func @transform_8(%arg0: i32) -> (i32, i32) {
    %c0_i32 = arith.constant 0 : i32
    %c0_i32_0 = arith.constant 0 : i32
    %c0_i32_1 = arith.constant 0 : i32
    return %c0_i32, %c0_i32_0 : i32, i32
  }
  func.func @transform_9(%arg0: i32) -> (i32, i32) {
    %c0_i32 = arith.constant 0 : i32
    %c0_i32_0 = arith.constant 0 : i32
    %c0_i32_1 = arith.constant 0 : i32
    return %c0_i32, %c0_i32_0 : i32, i32
  }
  func.func @transform_10(%arg0: i32) -> (i32, i32) {
    %c0_i32 = arith.constant 0 : i32
    %c0_i32_0 = arith.constant 0 : i32
    %c0_i32_1 = arith.constant 0 : i32
    return %c0_i32, %c0_i32_0 : i32, i32
  }
  func.func @transform_11(%arg0: i32) -> (i32, i32) {
    %c0_i32 = arith.constant 0 : i32
    %c0_i32_0 = arith.constant 0 : i32
    %c0_i32_1 = arith.constant 0 : i32
    return %c0_i32, %c0_i32_0 : i32, i32
  }
  func.func @transform_12(%arg0: i32) -> (i32, i32) {
    %c0_i32 = arith.constant 0 : i32
    %c0_i32_0 = arith.constant 0 : i32
    return %arg0, %c0_i32 : i32, i32
  }
}

</mosaic_0001>

<bundles_post_ra>
// kernel: tpu_custom_call.1
= control target key start
LH: loop header
LB: loop body
LE: loop exit
PB: predicated region body
PF: predicated region fallthrough
CT: control target
= control target key end

     0   :  { %s9392_s0 = inlined_call_operand.<no memory space> [shape: f32[1,1], index: 0, kind: input, shape index: {}]   ;;  %s9393_s1 = inlined_call_operand.hbm [shape: bf16[32,768], index: 1, kind: input, shape index: {}]   ;;  %s9394_s2 = inlined_call_operand.hbm [shape: bf16[768,256], index: 2, kind: input, shape index: {}]   ;;  %s9395_s3 = inlined_call_operand.vmem [shape: f32[1,256], index: 3, kind: input, shape index: {}]   ;;  %s9396_s4 = inlined_call_operand.vmem [shape: bf16[256,128], index: 4, kind: input, shape index: {}]   ;;  %s9397_s5 = inlined_call_operand.vmem [shape: f32[1,128], index: 5, kind: input, shape index: {}]   ;;  %s9398_s6 = inlined_call_operand.vmem [shape: f32[128,2], index: 6, kind: input, shape index: {}]   ;;  %s9399_s7 = inlined_call_operand.vmem [shape: f32[2,64], index: 7, kind: input, shape index: {}]   ;;  %s9400_s8 = inlined_call_operand.hbm [shape: bf16[128,256], index: 8, kind: input, shape index: {}]   ;;  %s9401_s9 = inlined_call_operand.vmem [shape: f32[1,256], index: 9, kind: input, shape index: {}]   ;;  %s9402_s10 = inlined_call_operand.hbm [shape: bf16[256,128], index: 10, kind: input, shape index: {}]   ;;  %s9403_s11 = inlined_call_operand.vmem [shape: f32[1,128], index: 11, kind: input, shape index: {}]   ;;  %s9404_s12 = inlined_call_operand.hbm [shape: f32[32,128], index: 12, kind: output, shape index: {}]  }
   0x1   :  { %9480 = sst [smem:[#allocation40_spill]] %s9397_s5 }
   0x2   :  { %9481 = sst [smem:[#allocation41_spill]] %s9403_s11 }
   0x3   :  { %9482 = sst [smem:[#allocation42_spill]] %s9404_s12 }
   0x4   :  { %17 = sst [smem:[#allocation2]] %s9392_s0 }
   0x5   :  { %18 = vsyncpa [#allocation4], 0 }
   0x6   :  { %20 = vsyncpa [#allocation4 + $0x1], 0 }
   0x7   :  { %21 = vsyncpa [#allocation7], 0 }
   0x8   :  { %22 = vsyncpa [#allocation10], 0 }
   0x9   :  { %23 = vsyncpa [#allocation5], 0 }
   0xa   :  { %25 = vsyncpa [#allocation5 + $0x1], 0  ;;  %s7073_s23 = smov 0   ;;  %s7075_s24 = smov 0  }
   0xb   :  { %s7077_s25 = smov 0   ;;  %s7079_s26 = smov 0  }
   0xc LB: > { %9483 = sst [smem:[#allocation16_spill]] %s6967_s23  ;;  %s7094_s0 = sadd.s32 4294967295, %s6979_s26   ;;  %s6979_s26 = sphi %s7079_s26, %s9638_s26   ;;  %s6975_s25 = sphi %s7077_s25, %s9637_s25   ;;  %s6971_s24 = sphi %s7075_s24, %s9636_s24   ;;  %s6967_s23 = sphi %s7073_s23, %s9635_s23  }
   0xd   : > { %s5831_s27 = sadd.s32 4294967294, %s6979_s26   ;;  %p72_p0 = scmp.ne.s32.totalorder %s6971_s24, %s6967_s23 }
   0xe   : > { %p9406_p1 = scmp.eq.s32.totalorder %s7094_s0, 0  ;;  %p312_p3 = scmp.eq.s32.totalorder %s5831_s27, 1 }
   0xf   : > { %p5832_p5 = scmp.ge.s32.totalorder %s6979_s26, 1  ;;  %p319_p7 = scmp.lt.s32.totalorder %s6979_s26, 3 }
  0x10   : > { %p7103_p4 = por %p9406_p1, %p72_p0  ;;  %p7108_p6 = por %p312_p3, %p72_p0 }
  0x11   : > { %p7113_p8 = pnand %p5832_p5, %p319_p7  ;;  %s6981_s13 = smov [#allocation6]  }
  0x12   : > { %s9484_s28 = scalar_select %p7103_p4, 1, 0 }
  0x13   : > { %s9485_s29 = scalar_select %p7108_p6, 1, 0 }
  0x14   : > { %s9487_s30 = scalar_select %p7113_p8, 1, 0 }
  0x15   : > { %9486 = sst [smem:[#allocation17_spill]] %s9485_s29  ;;  %s334_s14 = sshll.u32 %s6981_s13, 4  ;;  %s7117_s14 = int_to_ptr.vmem [resolvable:$true] %s334_s14 }
  0x16   : > { %p6341_p9 = pneg %p7113_p8  ;;  %s6982_s16 = smov [#allocation8]  }
  0x17   : > { %s362_s17 = sshll.u32 %s6982_s16, 4  ;;  %s6983_s18 = smov [#allocation9]   ;;  %s7128_s17 = int_to_ptr.vmem [resolvable:$true] %s362_s17 }
  0x18   : > { %p7124_p11 = pnand %p6341_p9, %p9406_p1  ;;  %s7130_s19 = sshll.u32 %s6983_s18, 4  ;;  %s379_s19 = int_to_ptr.vmem [resolvable:$true] %s7130_s19 }
  0x19   : > { %s6791_s22 = scalar_lea.hbm %s9394_s2, 12288 }
  0x1a   : > { %p6792_p12 = scmp.ne.s32.totalorder %s9394_s2, %s6791_s22  ;;  %p7140_p13 = pneg %p7124_p11 }
  0x1b   : > { %p6798_p5 = scmp.lt.u32.totalorder %s6791_s22, %s9394_s2 }
  0x1c   : > { %p6794_p0 = pnand %p7140_p13, %p6792_p12 }
  0x1e   : > { %p6795_p3 = pneg %p6794_p0 }
  0x20   : > { %p6800_p7 = pnand %p6798_p5, %p6795_p3 }
  0x22   : > { %6803 = shalt.err (!%p6800_p7)
}
  0x23   : > { %s6804_s20 = scalar_lea.vmem %s7117_s14, 12288  ;;  %p6812_p2 = scmp.lt.s32.totalorder %s7117_s14, %s7117_s14 }
  0x24   : > { %p6805_p9 = scmp.ne.s32.totalorder %s7117_s14, %s6804_s20  ;;  %p6813_p6 = scmp.lt.s32.totalorder %s6804_s20, %s6804_s20 }
  0x26   : > { %p6807_p10 = pnand %p6805_p9, %p7140_p13  ;;  %p6814_p12 = por %p6813_p6, %p6812_p2 }
  0x28   : > { %p6808_p1 = pneg %p6807_p10 }
  0x2a   : > { %p6815_p0 = pnand %p6814_p12, %p6808_p1 }
  0x2c   : > { %6818 = shalt.err (!%p6815_p0)
}
  0x2d   : > { %s6984_s21 = smov 128   ;;  %s6985_s22 = smov 8  }
  0x2e   : > { %6344 = dma.hbm_to_vmem [thread:$0]  (!%p7124_p11), %s9394_s2, 12288, %s7117_s14, [#allocation7], %s6984_s21, %s6984_s21, %s6985_s22  }
  0x2f   : > { %s6819_s23 = scalar_lea.hbm %s9400_s8, 2048 }
  0x30   : > { %p6820_p2 = scmp.ne.s32.totalorder %s9400_s8, %s6819_s23  ;;  %p6826_p10 = scmp.lt.u32.totalorder %s6819_s23, %s9400_s8 }
  0x32   : > { %p6822_p1 = pnand %p6820_p2, %p7140_p13 }
  0x34   : > { %p6823_p6 = pneg %p6822_p1 }
  0x36   : > { %p6828_p3 = pnand %p6826_p10, %p6823_p6 }
  0x38   : > { %6831 = shalt.err (!%p6828_p3)
}
  0x39   : > { %s6832_s14 = scalar_lea.vmem %s7128_s17, 2048  ;;  %p6840_p12 = scmp.lt.s32.totalorder %s7128_s17, %s7128_s17 }
  0x3a   : > { %p6833_p5 = scmp.ne.s32.totalorder %s7128_s17, %s6832_s14  ;;  %p6841_p0 = scmp.lt.s32.totalorder %s6832_s14, %s6832_s14 }
  0x3c   : > { %p6835_p7 = pnand %p6833_p5, %p7140_p13  ;;  %p6842_p2 = por %p6841_p0, %p6840_p12 }
  0x3e   : > { %p6836_p9 = pneg %p6835_p7 }
  0x40   : > { %p6843_p1 = pnand %p6842_p2, %p6836_p9 }
  0x42   : > { %6846 = shalt.err (!%p6843_p1)
}
  0x43   : > { %6347 = dma.hbm_to_vmem [thread:$0]  (!%p7124_p11), %s9400_s8, 2048, %s7128_s17, [#allocation7], %s6984_s21, %s6984_s21, %s6985_s22  }
  0x44   : > { %s6847_s27 = scalar_lea.hbm %s9402_s10, 2048 }
  0x45   : > { %p6848_p6 = scmp.ne.s32.totalorder %s9402_s10, %s6847_s27  ;;  %p6854_p5 = scmp.lt.u32.totalorder %s6847_s27, %s9402_s10 }
  0x47   : > { %p6850_p10 = pnand %p6848_p6, %p7140_p13 }
  0x49   : > { %p6851_p3 = pneg %p6850_p10 }
  0x4b   : > { %p6856_p7 = pnand %p6854_p5, %p6851_p3 }
  0x4d   : > { %6859 = shalt.err (!%p6856_p7)
}
  0x4e   : > { %s6860_s14 = scalar_lea.vmem %s379_s19, 2048  ;;  %p6868_p2 = scmp.lt.s32.totalorder %s379_s19, %s379_s19 }
  0x4f   : > { %p6861_p9 = scmp.ne.s32.totalorder %s379_s19, %s6860_s14  ;;  %p6869_p1 = scmp.lt.s32.totalorder %s6860_s14, %s6860_s14 }
  0x51   : > { %p6863_p12 = pnand %p6861_p9, %p7140_p13  ;;  %p6870_p4 = por %p6869_p1, %p6868_p2 }
  0x53   : > { %p6864_p0 = pneg %p6863_p12 }
  0x55   : > { %p6871_p8 = pnand %p6870_p4, %p6864_p0 }
  0x57   : > { %6874 = shalt.err (!%p6871_p8)
}
  0x58   : > { %s6986_s17 = smov 64   ;;  %s6987_s29 = smov 4  }
  0x59   : > { %6350 = dma.hbm_to_vmem [thread:$0]  (!%p7124_p11), %s9402_s10, 2048, %s379_s19, [#allocation10], %s6986_s17, %s6986_s17, %s6987_s29  }
  0x5a   : > { %s7204_s5 = sadd.s32 1, %s6979_s26   ;;  %s59_s12 = sadd.s32 1, %s6975_s25 }
  0x5b   : > { %s56_s11 = ssub.s32 %s6979_s26, %s7204_s5  ;;  %p66_p8 = scmp.ne.s32.totalorder %s6975_s25, %s6971_s24 }
  0x5c   : > { %p57_p4 = scmp.eq.s32.totalorder %s56_s11, 0  ;;  %p67_p13 = scmp.eq.s32.totalorder %s6979_s26, 0 }
  0x5d   : > { %p6362_p6 = scmp.lt.s32.totalorder %s6979_s26, 2  ;;  %p9490_p3 = scmp.eq.s32.totalorder %s7094_s0, 1 }
  0x5e   : > { %s7214_s23 = scalar_select %p57_p4, %s6975_s25, %s59_s12  }
  0x5f   : > { %p68_p10 = por %p67_p13, %p66_p8  ;;  %p7218_p5 = por %p9490_p3, %p66_p8 }
  0x60   : > { %s395_s15 = sand.u32 1, %s6975_s25   ;;  %s6259_s13 = smul.u32 768, %s6979_s26 }
  0x61   : > { %s6258_s19 = smul.u32 48, %s395_s15  ;;  %p7229_p11 = pnand %p6362_p6, %p68_p10 }
  0x62   : > { %s7227_s20 = scalar_lea.hbm %s9393_s1, %s6259_s13  ;;  %s7235_s21 = scalar_lea.sflag [#allocation4], %s395_s15 }
  0x63   : > { %s399_s17 = scalar_lea.vmem [#allocation3], %s6258_s19  ;;  %s6875_s22 = scalar_lea.hbm %s7227_s20, 768 }
  0x64   : > { %s407_s29 = sshll.u32 %s399_s17, 4  ;;  %p6876_p7 = scmp.ne.s32.totalorder %s7227_s20, %s6875_s22  ;;  %s7233_s29 = int_to_ptr.vmem [resolvable:$true] %s407_s29 }
  0x65   : > { %p6877_p9 = pneg %p7229_p11  ;;  %s6880_s13 = scalar_lea.hbm %s9393_s1, 1536 }
  0x66   : > { %p6881_p2 = scmp.lt.u32.totalorder %s7227_s20, %s9393_s1  ;;  %p6882_p1 = scmp.lt.u32.totalorder %s6880_s13, %s6875_s22 }
  0x67   : > { %p6878_p12 = pnand %p6877_p9, %p6876_p7  ;;  %p6884_p8 = scmp.lt.u32.totalorder %s6875_s22, %s7227_s20 }
  0x68   : > { %p6883_p4 = por %p6882_p1, %p6881_p2 }
  0x69   : > { %p6879_p0 = pneg %p6878_p12 }
  0x6a   : > { %p6885_p13 = por %p6884_p8, %p6883_p4 }
  0x6c   : > { %p6886_p6 = pnand %p6885_p13, %p6879_p0 }
  0x6e   : > { %6889 = shalt.err (!%p6886_p6)
}
  0x6f   : > { %s6890_s15 = scalar_lea.vmem %s7233_s29, 768  ;;  %s6988_s19 = smov [#allocation3]  }
  0x70   : > { %p6891_p10 = scmp.ne.s32.totalorder %s7233_s29, %s6890_s15  ;;  %s6895_s17 = sshll.u32 %s6988_s19, 4  ;;  %s6896_s17 = int_to_ptr.vmem [resolvable:$false] %s6895_s17 }
  0x71   : > { %s6897_s11 = scalar_lea.vmem %s6896_s17, 1536  ;;  %p6898_p12 = scmp.lt.s32.totalorder %s7233_s29, %s6896_s17 }
  0x72   : > { %p6893_p3 = pnand %p6891_p10, %p6877_p9  ;;  %p6899_p2 = scmp.lt.s32.totalorder %s6897_s11, %s6890_s15 }
  0x74   : > { %p6894_p7 = pneg %p6893_p3  ;;  %p6900_p1 = por %p6899_p2, %p6898_p12 }
  0x76   : > { %p6901_p4 = pnand %p6900_p1, %p6894_p7 }
  0x78   : > { %6904 = shalt.err (!%p6901_p4)
}
  0x79   : > { %s6989_s22 = smov 384   ;;  %s6990_s12 = smov 24  }
  0x7a   : > { %6354 = dma.hbm_to_vmem [thread:$0]  (!%p7229_p11), %s7227_s20, 768, %s7233_s29, %s7235_s21, %s6989_s22, %s6989_s22, %s6990_s12  }
  0x7b   : > { %p9493_p9 = scmp.ne.s32.totalorder %s9487_s30, 0 }
  0x7d   : > { %419 = sbr.rel (%p9493_p9) target bundleno = 1697 (0x6a1), region = 68 }
  0x84   : > { %s7266_s13 = sand.u32 1, %s6971_s24   ;;  %p9494_p0 = scmp.ne.s32.totalorder %s9484_s28, 0 }
  0x85   : > { %s6260_s16 = smul.u32 48, %s7266_s13  ;;  %s422_s18 = scalar_lea.sflag [#allocation4], %s7266_s13 }
  0x87   : > { %s7270_s15 = scalar_lea.vmem [#allocation3], %s6260_s16 }
  0x88   : > { %6950 = dma.done.wait (%p9494_p0), %s422_s18, 768  }
  0x89   : > { %6952 = vsyncadd (%p9494_p0), %s422_s18, 4294966528  ;;  %p9495_p11 = scmp.eq.s32.totalorder %s7094_s0, 0 }
  0x8b   : > { %6954 = dma.done.wait (%p9495_p11), [#allocation7], 14336   ;;  %p9496_p8 = pmov %p9495_p11 }
  0x8d   : > { %6956 = vsyncadd (%p9496_p8), [#allocation7], 4294952960  ;;  %p9497_p13 = pmov %p9496_p8 }
  0x8e   : > { %p9498_p6 = pmov %p9496_p8 }
  0x8f   : > { %6958 = dma.done.wait (%p9497_p13), [#allocation10], 2048  }
  0x90   : > { %6960 = vsyncadd (%p9498_p6), [#allocation10], 4294965248  ;;  %v6991_v0 = vmov 1   ;;  %v9411_v1 = vmov 0   ;;  %v1416_v2 = vld [vmem:[%s9398_s6] sm:$0xff]  ;;  %v1417_v5 = vld [vmem:[%s9398_s6 + $0x8] sm:$0xff] }
  0x91   : > { %6422 = vset.pattern.permute.xlu1 %v6991_v0  ;;  %6421 = vset.pattern.permute.xlu0 %v9411_v1  ;;  %v6482_v3 = vld [vmem:[#allocation6 + $0x4] ss:$8 sps:$4 sm:$0xff]   ;;  %v6484_v4 = vld [vmem:[#allocation6] ss:$8 sps:$4 sm:$0xff]   ;;  %v6485_v6 = vld [vmem:[#allocation6 + $0x14] ss:$8 sps:$4 sm:$0xff]  }
  0x92   : > { %1534 = vperm.xlu1 %6422, %v1416_v2   ;;  %1435 = vperm.xlu0 %6421, %v1416_v2   ;;  %v6487_v7 = vld [vmem:[#allocation6 + $0x10] ss:$8 sps:$4 sm:$0xff]   ;;  %v6488_v9 = vld [vmem:[#allocation6 + $0x24] ss:$8 sps:$4 sm:$0xff]   ;;  %v6490_v11 = vld [vmem:[#allocation6 + $0x20] ss:$8 sps:$4 sm:$0xff]  }
  0x93   : > { %1105 = vmatprep.subr.bf16.mxu0 %v6482_v3  ;;  %v1418_v8 = vld [vmem:[%s9398_s6 + $0x10] sm:$0xff]  ;;  %v1419_v10 = vld [vmem:[%s9398_s6 + $0x18] sm:$0xff]  ;;  %v6494_v14 = vld [vmem:[#allocation6 + $0x44] ss:$8 sps:$4 sm:$0xff]   ;;  %s9627_s19 = sld [smem:[#allocation41_spill]]  ;;  %s9628_s22 = sld [smem:[#allocation40_spill]] }
  0x94   : > { %1106 = vmatpush1.bf16.msra.mxu0 %v6484_v4  ;;  %v6491_v12 = vld [vmem:[#allocation6 + $0x34] ss:$8 sps:$4 sm:$0xff]   ;;  %v6493_v13 = vld [vmem:[#allocation6 + $0x30] ss:$8 sps:$4 sm:$0xff]   ;;  %v6496_v16 = vld [vmem:[#allocation6 + $0x40] ss:$8 sps:$4 sm:$0xff]  }
  0x95   : > { %1107 = vmatprep.subr.bf16.mxu0 %v6485_v6  ;;  %v1422_v15 = vld [vmem:[%s9398_s6 + $0x30] sm:$0xff]  ;;  %v1420_v17 = vld [vmem:[%s9398_s6 + $0x20] sm:$0xff]  ;;  %v1421_v20 = vld [vmem:[%s9398_s6 + $0x28] sm:$0xff]  ;;  %s5551_s12 = sld [smem:[#allocation2]]  ;;  %s5844_s16 = sshll.u32 %s7266_s13, 4 }
  0x96   : > { %1538 = vperm.xlu1 %6422, %v1417_v5   ;;  %1440 = vperm.xlu0 %6421, %v1417_v5   ;;  %v6497_v18 = vld [vmem:[#allocation6 + $0x54] ss:$8 sps:$4 sm:$0xff]   ;;  %v6499_v19 = vld [vmem:[#allocation6 + $0x50] ss:$8 sps:$4 sm:$0xff]   ;;  %v6500_v21 = vld [vmem:[#allocation6 + $0x64] ss:$8 sps:$4 sm:$0xff]  }
  0x97   : > { %v6502_v22 = vld [vmem:[#allocation6 + $0x60] ss:$8 sps:$4 sm:$0xff]   ;;  %v6503_v23 = vld [vmem:[#allocation6 + $0x74] ss:$8 sps:$4 sm:$0xff]   ;;  %v6505_v25 = vld [vmem:[#allocation6 + $0x70] ss:$8 sps:$4 sm:$0xff]  }
  0x98   : > { %1108 = vmatpush1.bf16.msra.mxu0 %v6487_v7  ;;  %v6532_v24 = vld [vmem:[%s7270_s15 + $0x4] ss:$24 sps:$4 sm:$0xff]   ;;  %v6508_v29 = vld [vmem:[#allocation6 + $0x80] ss:$8 sps:$4 sm:$0xff]   ;;  %v6511_v32 = vld [vmem:[#allocation6 + $0x90] ss:$8 sps:$4 sm:$0xff]  }
  0x99   : > { %1109 = vmatprep.subr.bf16.mxu0 %v6488_v9  ;;  %v1425_v26 = vld [vmem:[%s9398_s6 + $0x48] sm:$0xff]  ;;  %1137 = vmatprep.mubr.bf16.mxu0 %v6532_v24  ;;  %v1423_v28 = vld [vmem:[%s9398_s6 + $0x38] sm:$0xff]  ;;  %v1426_v31 = vld [vmem:[%s9398_s6 + $0x50] sm:$0xff]  ;;  %s477_s18 = scalar_lea.vmem [#allocation11], %s5844_s16  ;;  %s6130_s30 = sshll.u32 %s7094_s0, 8 }
  0x9a   : > { %6423 = vset.pattern.permute.xlu1 %v9411_v1  ;;  %1445 = vperm.xlu0 %6421, %v1418_v8   ;;  %v6506_v27 = vld [vmem:[#allocation6 + $0x84] ss:$8 sps:$4 sm:$0xff]   ;;  %v6509_v30 = vld [vmem:[#allocation6 + $0x94] ss:$8 sps:$4 sm:$0xff]   ;;  %v6514_v35 = vld [vmem:[#allocation6 + $0xa0] ss:$8 sps:$4 sm:$0xff]  }
  0x9b   : > { %1450 = vperm.xlu1 %6423, %v1419_v10   ;;  %v6512_v33 = vld [vmem:[#allocation6 + $0xa4] ss:$8 sps:$4 sm:$0xff]   ;;  %v6515_v36 = vld [vmem:[#allocation6 + $0xb4] ss:$8 sps:$4 sm:$0xff]   ;;  %v6517_v38 = vld [vmem:[#allocation6 + $0xb0] ss:$8 sps:$4 sm:$0xff]  }
  0x9c   : > { %1110 = vmatpush1.bf16.msra.mxu0 %v6490_v11  ;;  %v1424_v34 = vld [vmem:[%s9398_s6 + $0x40] sm:$0xff]  ;;  %v1429_v37 = vld [vmem:[%s9398_s6 + $0x68] sm:$0xff]  ;;  %v1430_v40 = vld [vmem:[%s9398_s6 + $0x70] sm:$0xff]  ;;  %s5729_s28 = sshll.u32 %s477_s18, 4  ;;  %s9629_s14 = sld [smem:[#allocation42_spill]]  ;;  %s9343_s28 = int_to_ptr.vmem [resolvable:$true] %s5729_s28 }
  0x9d   : > { %1111 = vmatprep.subr.bf16.mxu0 %v6491_v12  ;;  %v6518_v39 = vld [vmem:[#allocation6 + $0xc4] ss:$8 sps:$4 sm:$0xff]   ;;  %v6520_v41 = vld [vmem:[#allocation6 + $0xc0] ss:$8 sps:$4 sm:$0xff]   ;;  %v6521_v42 = vld [vmem:[#allocation6 + $0xd4] ss:$8 sps:$4 sm:$0xff]  }
  0x9e   : > { %6424 = vset.pattern.permute.xlu0 %v6991_v0  ;;  %v6523_v43 = vld [vmem:[#allocation6 + $0xd0] ss:$8 sps:$4 sm:$0xff]   ;;  %v6524_v44 = vld [vmem:[#allocation6 + $0xe4] ss:$8 sps:$4 sm:$0xff]   ;;  %v6526_v46 = vld [vmem:[#allocation6 + $0xe0] ss:$8 sps:$4 sm:$0xff]  }
  0x9f   : > { %6425 = vset.pattern.permute.xlu1 %v6991_v0  ;;  %1542 = vperm.xlu0 %6424, %v1418_v8   ;;  %v1427_v45 = vld [vmem:[%s9398_s6 + $0x58] sm:$0xff]  ;;  %v6535_v49 = vld [vmem:[#allocation6 + $0x104] ss:$8 sps:$4 sm:$0xff]   ;;  %v6533_v51 = vld [vmem:[#allocation6 + $0x100] ss:$8 sps:$4 sm:$0xff]   ;;  %s5716_s21 = scalar_lea.sflag [#allocation5], %s7266_s13 }
  0xa0   : > { %1546 = vperm.xlu1 %6425, %v1419_v10   ;;  %1112 = vmatpush1.bf16.msra.mxu0 %v6493_v13  ;;  %v6527_v47 = vld [vmem:[#allocation6 + $0xf4] ss:$8 sps:$4 sm:$0xff]   ;;  %v6529_v48 = vld [vmem:[#allocation6 + $0xf0] ss:$8 sps:$4 sm:$0xff]   ;;  %v1428_v52 = vld [vmem:[%s9398_s6 + $0x60] sm:$0xff]  ;;  %s7002_s0 = smov [#allocation11]  }
  0xa1   : > { %1113 = vmatprep.subr.bf16.mxu0 %v6494_v14  ;;  %v6530_v50 = vld [vmem:[%s7270_s15] ss:$24 sps:$4 sm:$0xff]   ;;  %v6538_v53 = vld [vmem:[#allocation6 + $0x114] ss:$8 sps:$4 sm:$0xff]   ;;  %v6541_v56 = vld [vmem:[#allocation6 + $0x124] ss:$8 sps:$4 sm:$0xff]  }
  0xa2   : > { %v6583_v54 = vld [vmem:[%s7270_s15 + $0xc] ss:$24 sps:$4 sm:$0xff]   ;;  %v6536_v55 = vld [vmem:[#allocation6 + $0x110] ss:$8 sps:$4 sm:$0xff]   ;;  %v6539_v57 = vld [vmem:[#allocation6 + $0x120] ss:$8 sps:$4 sm:$0xff]   ;;  %s9348_s29 = scalar_lea.hbm %s9629_s14, %s6130_s30 }
  0xa3   : > { %1558 = vperm.xlu0 %6424, %v1422_v15   ;;  %v6544_v58 = vld [vmem:[#allocation6 + $0x134] ss:$8 sps:$4 sm:$0xff]   ;;  %v6542_v59 = vld [vmem:[#allocation6 + $0x130] ss:$8 sps:$4 sm:$0xff]   ;;  %v6547_v60 = vld [vmem:[#allocation6 + $0x144] ss:$8 sps:$4 sm:$0xff]  }
  0xa4   : > { %6426 = vset.pattern.permute.xlu1 %v9411_v1  ;;  %1114 = vmatpush1.bf16.msra.mxu0 %v6496_v16  ;;  %v1431_v61 = vld [vmem:[%s9398_s6 + $0x78] sm:$0xff]  ;;  %v6545_v62 = vld [vmem:[#allocation6 + $0x140] ss:$8 sps:$4 sm:$0xff]   ;;  %v6553_v3 = vld [vmem:[#allocation6 + $0x164] ss:$8 sps:$4 sm:$0xff]   ;;  %s6909_s17 = sshll.u32 %s7002_s0, 4  ;;  %s6910_s17 = int_to_ptr.vmem [resolvable:$false] %s6909_s17 }
  0xa5   : > { %1455 = vperm.xlu1 %6426, %v1420_v17   ;;  %1115 = vmatprep.subr.bf16.mxu0 %v6497_v18  ;;  %v6550_v63 = vld [vmem:[#allocation6 + $0x154] ss:$8 sps:$4 sm:$0xff]   ;;  %v6548_v2 = vld [vmem:[#allocation6 + $0x150] ss:$8 sps:$4 sm:$0xff]   ;;  %v6551_v4 = vld [vmem:[#allocation6 + $0x160] ss:$8 sps:$4 sm:$0xff]   ;;  %p6912_p12 = scmp.lt.s32.totalorder %s9343_s28, %s6910_s17 }
  0xa6   : > { %v6556_v5 = vld [vmem:[#allocation6 + $0x174] ss:$8 sps:$4 sm:$0xff]   ;;  %v6554_v6 = vld [vmem:[#allocation6 + $0x170] ss:$8 sps:$4 sm:$0xff]   ;;  %v6559_v7 = vld [vmem:[#allocation6 + $0x184] ss:$8 sps:$4 sm:$0xff]  }
  0xa7   : > { %6429 = vset.pattern.permute.xlu0 %v9411_v1  ;;  %v6557_v8 = vld [vmem:[#allocation6 + $0x180] ss:$8 sps:$4 sm:$0xff]   ;;  %v6562_v9 = vld [vmem:[#allocation6 + $0x194] ss:$8 sps:$4 sm:$0xff]   ;;  %v6560_v10 = vld [vmem:[#allocation6 + $0x190] ss:$8 sps:$4 sm:$0xff]  }
  0xa8   : > { %1460 = vperm.xlu0 %6429, %v1421_v20   ;;  %1116 = vmatpush1.bf16.msra.mxu0 %v6499_v19  ;;  %v6565_v11 = vld [vmem:[#allocation6 + $0x1a4] ss:$8 sps:$4 sm:$0xff]   ;;  %v6563_v12 = vld [vmem:[#allocation6 + $0x1a0] ss:$8 sps:$4 sm:$0xff]   ;;  %v6566_v13 = vld [vmem:[#allocation6 + $0x1b0] ss:$8 sps:$4 sm:$0xff]  }
  0xa9   : > { %6427 = vset.pattern.permute.xlu1 %v6991_v0  ;;  %1117 = vmatprep.subr.bf16.mxu0 %v6500_v21  ;;  %v6571_v14 = vld [vmem:[#allocation6 + $0x1c4] ss:$8 sps:$4 sm:$0xff]   ;;  %v6574_v16 = vld [vmem:[#allocation6 + $0x1d4] ss:$8 sps:$4 sm:$0xff]   ;;  %v6572_v18 = vld [vmem:[#allocation6 + $0x1d0] ss:$8 sps:$4 sm:$0xff]  }
  0xaa   : > { %1550 = vperm.xlu1 %6427, %v1420_v17   ;;  %v585_v17 = vlaneseq  ;;  %v6577_v19 = vld [vmem:[#allocation6 + $0x1e4] ss:$8 sps:$4 sm:$0xff]   ;;  %v6575_v21 = vld [vmem:[#allocation6 + $0x1e0] ss:$8 sps:$4 sm:$0xff]   ;;  %s6911_s11 = scalar_lea.vmem %s6910_s17, 512 }
  0xac   : > { %1465 = vperm.xlu0 %6429, %v1422_v15   ;;  %1118 = vmatpush1.bf16.msra.mxu0 %v6502_v22  ;;  %v6569_v15 = vld [vmem:[#allocation6 + $0x1c0] ss:$8 sps:$4 sm:$0xff]   ;;  %v6580_v22 = vld [vmem:[#allocation6 + $0x1f4] ss:$8 sps:$4 sm:$0xff]  }
  0xad   : > { %1119 = vmatprep.subr.bf16.mxu0 %v6503_v23 }
  0xae   : > { %1554 = vperm.xlu1 %6427, %v1421_v20   ;;  %v586_v20 = vshrl.u32 %v585_v17, 7 }
  0xb0   : > { %1480 = vperm.xlu0 %6429, %v1425_v26   ;;  %1120 = vmatpush1.bf16.msra.mxu0 %v6505_v25  ;;  %v7356_v23 = vsub.s32 1, %v586_v20  ;;  %v7358_v24 = vsub.s32 0, %v586_v20  ;;  %v1432_v25 = vld [vmem:[%s9399_s7] sm:$0x3]  ;;  %v9424_v20 = vmov 2475754826  }
  0xb1   : > { %1121 = vmatprep.subr.bf16.mxu0 %v6506_v27 }
  0xb2   : > { %6428 = vset.pattern.permute.xlu1 %v9411_v1  ;;  %9499 = vst [vmem:[#allocation18_spill] sm:$0xff] %v7356_v23  ;;  %9500 = vst [vmem:[#allocation19_spill] sm:$0xff] %v7358_v24  ;;  %v7364_v27 = vrot.slane %v1432_v25, %v7356_v23 }
  0xb3   : > { %1470 = vperm.xlu1 %6428, %v1423_v28  }
  0xb4   : > { %6434 = vset.pattern.permute.xlu0 %v6991_v0  ;;  %1122 = vmatpush1.bf16.msra.mxu0 %v6508_v29  ;;  %v6586_v29 = vld [vmem:[#allocation6 + $0x204] ss:$8 sps:$4 sm:$0xff]  }
  0xb5   : > { %1574 = vperm.xlu0 %6434, %v1426_v31   ;;  %1123 = vmatprep.subr.bf16.mxu0 %v6509_v30  ;;  %v6581_v30 = vld [vmem:[%s7270_s15 + $0x8] ss:$24 sps:$4 sm:$0xff]  }
  0xb7   : > { %6430 = vset.pattern.permute.xlu1 %v6991_v0 }
  0xb8   : > { %1562 = vperm.xlu1 %6430, %v1423_v28   ;;  %1124 = vmatpush1.bf16.msra.mxu0 %v6511_v32  ;;  %v7367_v28 = vrot.slane %v1432_v25, %v7358_v24 }
  0xb9   : > { %6435 = vset.pattern.permute.xlu0 %v9411_v1  ;;  %1125 = vmatprep.subr.bf16.mxu0 %v6512_v33  ;;  %v6584_v33 = vld [vmem:[#allocation6 + $0x200] ss:$8 sps:$4 sm:$0xff]  }
  0xba   : > { %1485 = vperm.xlu0 %6435, %v1426_v31  }
  0xbc   : > { %6431 = vset.pattern.permute.xlu1 %v9411_v1  ;;  %1126 = vmatpush1.bf16.msra.mxu0 %v6514_v35 }
  0xbd   : > { %1475 = vperm.xlu1 %6431, %v1424_v34   ;;  %1127 = vmatprep.subr.bf16.mxu0 %v6515_v36  ;;  %v6589_v36 = vld [vmem:[#allocation6 + $0x214] ss:$8 sps:$4 sm:$0xff]  }
  0xbe   : > { %1500 = vperm.xlu0 %6435, %v1429_v37  }
  0xc0   : > { %1128 = vmatpush1.bf16.msra.mxu0 %v6517_v38 }
  0xc1   : > { %6432 = vset.pattern.permute.xlu1 %v6991_v0  ;;  %1129 = vmatprep.subr.bf16.mxu0 %v6518_v39 }
  0xc2   : > { %1566 = vperm.xlu1 %6432, %v1424_v34   ;;  %1505 = vperm.xlu0 %6435, %v1430_v40  }
  0xc4   : > { %1130 = vmatpush1.bf16.msra.mxu0 %v6520_v41 }
  0xc5   : > { %1131 = vmatprep.subr.bf16.mxu0 %v6521_v42 }
  0xc6   : > { %1570 = vperm.xlu1 %6432, %v1425_v26   ;;  %6440 = vset.pattern.permute.xlu0 %v6991_v0  ;;  %v6578_v26 = vld [vmem:[#allocation6 + $0x1f0] ss:$8 sps:$4 sm:$0xff]  }
  0xc7   : > { %1590 = vperm.xlu0 %6440, %v1430_v40   ;;  %v6587_v40 = vld [vmem:[#allocation6 + $0x210] ss:$8 sps:$4 sm:$0xff]  }
  0xc8   : > { %1132 = vmatpush1.bf16.msra.mxu0 %v6523_v43 }
  0xc9   : > { %1133 = vmatprep.subr.bf16.mxu0 %v6524_v44  ;;  %v6592_v44 = vld [vmem:[#allocation6 + $0x224] ss:$8 sps:$4 sm:$0xff]  }
  0xca   : > { %6433 = vset.pattern.permute.xlu1 %v9411_v1 }
  0xcb   : > { %1490 = vperm.xlu1 %6433, %v1427_v45  }
  0xcc   : > { %1134 = vmatpush1.bf16.msra.mxu0 %v6526_v46 }
  0xcd   : > { %1135 = vmatprep.subr.bf16.mxu0 %v6527_v47 }
  0xcf   : > { %6436 = vset.pattern.permute.xlu1 %v6991_v0 }
  0xd0   : > { %1578 = vperm.xlu1 %6436, %v1427_v45   ;;  %1136 = vmatpush1.bf16.msra.mxu0 %v6529_v48 }
  0xd1   : > { %1148 = vmatprep.subr.bf16.mxu0 %v6535_v49  ;;  %v6590_v49 = vld [vmem:[#allocation6 + $0x220] ss:$8 sps:$4 sm:$0xff]  }
  0xd3   : > { %1138 = vmatmul.mubr.bf16.vlgmr.msra.gmra.mrb[0].mxu0 %v6530_v50 }
  0xd4   : > { %6437 = vset.pattern.permute.xlu1 %v9411_v1  ;;  %1149 = vmatpush1.bf16.msra.mxu0 %v6533_v51 }
  0xd5   : > { %1495 = vperm.xlu1 %6437, %v1428_v52   ;;  %1150 = vmatprep.subr.bf16.mxu0 %v6538_v53  ;;  %v6595_v53 = vld [vmem:[#allocation6 + $0x234] ss:$8 sps:$4 sm:$0xff]  }
  0xd6   : > { %1180 = vmatprep.mubr.bf16.mxu0 %v6583_v54 }
  0xd8   : > { %1151 = vmatpush1.bf16.msra.mxu0 %v6536_v55 }
  0xd9   : > { %6438 = vset.pattern.permute.xlu1 %v6991_v0  ;;  %1152 = vmatprep.subr.bf16.mxu0 %v6541_v56 }
  0xda   : > { %1582 = vperm.xlu1 %6438, %v1428_v52  }
  0xdc   : > { %1153 = vmatpush1.bf16.msra.mxu0 %v6539_v57 }
  0xdd   : > { %1154 = vmatprep.subr.bf16.mxu0 %v6544_v58  ;;  %v6593_v58 = vld [vmem:[#allocation6 + $0x230] ss:$8 sps:$4 sm:$0xff]  }
  0xde   : > { %1586 = vperm.xlu1 %6438, %v1429_v37  }
  0xe0   : > { %1155 = vmatpush1.bf16.msra.mxu0 %v6542_v59 }
  0xe1   : > { %1156 = vmatprep.subr.bf16.mxu0 %v6547_v60 }
  0xe2   : > { %6439 = vset.pattern.permute.xlu1 %v9411_v1 }
  0xe3   : > { %1510 = vperm.xlu1 %6439, %v1431_v61  }
  0xe4   : > { %1157 = vmatpush1.bf16.msra.mxu0 %v6545_v62  ;;  %v6598_v62 = vld [vmem:[#allocation6 + $0x244] ss:$8 sps:$4 sm:$0xff]  }
  0xe5   : > { %1158 = vmatprep.subr.bf16.mxu0 %v6550_v63 }
  0xe7   : > { %6441 = vset.pattern.permute.xlu1 %v6991_v0  ;;  %v6568_v0 = vld [vmem:[#allocation6 + $0x1b4] ss:$8 sps:$4 sm:$0xff]  }
  0xe8   : > { %1594 = vperm.xlu1 %6441, %v1431_v61   ;;  %1159 = vmatpush1.bf16.msra.mxu0 %v6548_v2 }
  0xe9   : > { %1160 = vmatprep.subr.bf16.mxu0 %v6553_v3 }
  0xec   : > { %1161 = vmatpush1.bf16.msra.mxu0 %v6551_v4 }
  0xed   : > { %1162 = vmatprep.subr.bf16.mxu0 %v6556_v5 }
  0xf0   : > { %1163 = vmatpush1.bf16.msra.mxu0 %v6554_v6 }
  0xf1   : > { %1164 = vmatprep.subr.bf16.mxu0 %v6559_v7 }
  0xf4   : > { %1165 = vmatpush1.bf16.msra.mxu0 %v6557_v8 }
  0xf5   : > { %1166 = vmatprep.subr.bf16.mxu0 %v6562_v9 }
  0xf8   : > { %1167 = vmatpush1.bf16.msra.mxu0 %v6560_v10  ;;  %v6596_v10 = vld [vmem:[#allocation6 + $0x240] ss:$8 sps:$4 sm:$0xff]  }
  0xf9   : > { %1168 = vmatprep.subr.bf16.mxu0 %v6565_v11 }
  0xfc   : > { %1169 = vmatpush1.bf16.msra.mxu0 %v6563_v12 }
  0xfd   : > { %1170 = vmatprep.subr.bf16.mxu0 %v6568_v0  ;;  %v6601_v0 = vld [vmem:[#allocation6 + $0x254] ss:$8 sps:$4 sm:$0xff]  }
 0x100   : > { %1171 = vmatpush1.bf16.msra.mxu0 %v6566_v13 }
 0x101   : > { %1172 = vmatprep.subr.bf16.mxu0 %v6571_v14 }
 0x104   : > { %1173 = vmatpush1.bf16.msra.mxu0 %v6569_v15 }
 0x105   : > { %1174 = vmatprep.subr.bf16.mxu0 %v6574_v16 }
 0x108   : > { %1175 = vmatpush1.bf16.msra.mxu0 %v6572_v18  ;;  %v9431_v18 = vmov 683565275  }
 0x109   : > { %1176 = vmatprep.subr.bf16.mxu0 %v6577_v19 }
 0x10c   : > { %1177 = vmatpush1.bf16.msra.mxu0 %v6575_v21 }
 0x10d   : > { %1178 = vmatprep.subr.bf16.mxu0 %v6580_v22  ;;  %v9422_v22 = vmov 2131351028  }
 0x110   : > { %1179 = vmatpush1.bf16.msra.mxu0 %v6578_v26  ;;  %v9420_v26 = vmov 2102212464  }
 0x111   : > { %v1535_v31 = vpop.permute.xlu1 %1534  ;;  %v1436_v32 = vpop.permute.xlu0 %1435  ;;  %1191 = vmatprep.subr.bf16.mxu0 %v6586_v29 }
 0x112   : > { %v1601_v34 = vmul.f32 %v7364_v27, %v1535_v31  ;;  %v1517_v35 = vmul.f32 %v7367_v28, %v1436_v32 }
 0x113   : > { %1181 = vmatmul.mubr.bf16.vlgmr.msra.gmra.mrb[0].mxu0 %v6581_v30  ;;  %v9440_v30 = vmov 920167782  }
 0x114   : > { %v1617_v37 = vadd.f32 %v1601_v34, %v1517_v35  ;;  %1192 = vmatpush1.bf16.msra.mxu0 %v6584_v33  ;;  %v6599_v33 = vld [vmem:[#allocation6 + $0x250] ss:$8 sps:$4 sm:$0xff]  }
 0x115   : > { %v1539_v38 = vpop.permute.xlu1 %1538  ;;  %v1441_v39 = vpop.permute.xlu0 %1440  ;;  %1193 = vmatprep.subr.bf16.mxu0 %v6589_v36 }
 0x116   : > { %v7372_v41 = vmul.f32 6.2831855, %v1617_v37  ;;  %v1602_v42 = vmul.f32 %v7364_v27, %v1539_v38  ;;  %v1518_v43 = vmul.f32 %v7367_v28, %v1441_v39  ;;  %v6604_v38 = vld [vmem:[#allocation6 + $0x264] ss:$8 sps:$4 sm:$0xff]  }
 0x118   : > { %v9419_v45 = vand.u32 2147483647, %v7372_v41  ;;  %v1652_v46 = vand.u32 2139095040, %v7372_v41  ;;  %v1618_v47 = vadd.f32 %v1602_v42, %v1518_v43  ;;  %1194 = vmatpush1.bf16.msra.mxu0 %v6587_v40  ;;  %v9426_v40 = vmov 1326507024  }
 0x119   : > { %v1446_v48 = vpop.permute.xlu0 %1445  ;;  %1195 = vmatprep.subr.bf16.mxu0 %v6592_v44 }
 0x11a   : > { %v1653_v50 = vshrl.u32 %v1652_v46, 23  ;;  %v7378_v51 = vmul.f32 6.2831855, %v1618_v47  ;;  %v1451_v52 = vpop.permute.xlu1 %1450  ;;  %v1656_v54 = vand.u32 8388607, %v9419_v45  ;;  %v1519_v60 = vmul.f32 %v7367_v28, %v1446_v48 }
 0x11b   : > { %v1520_v8 = vmul.f32 %v7367_v28, %v1451_v52 }
 0x11c   : > { %v5964_v55 = vadd.s32 4294967169, %v1653_v50  ;;  %v9418_v56 = vand.u32 2147483647, %v7378_v51  ;;  %v1755_v57 = vand.u32 2139095040, %v7378_v51  ;;  %1196 = vmatpush1.bf16.msra.mxu0 %v6590_v49  ;;  %v1657_v63 = vor.u32 8388608, %v1656_v54 }
 0x11d   : > { %1197 = vmatprep.subr.bf16.mxu0 %v6595_v53  ;;  %v6602_v50 = vld [vmem:[#allocation6 + $0x260] ss:$8 sps:$4 sm:$0xff]  }
 0x11e   : > { %v1659_v59 = vadd.s32 1, %v5964_v55  ;;  %v1543_v61 = vpop.permute.xlu0 %1542  ;;  %v1756_v2 = vshrl.u32 %v1755_v57, 23  ;;  %v7387_v3 = vand.u32 8388607, %v9418_v56  ;;  %v7392_v13 = vshll.u32 %v1657_v63, 8 }
 0x11f   : > { %v1547_v4 = vpop.permute.xlu1 %1546  ;;  %v1603_v5 = vmul.f32 %v7364_v27, %v1543_v61  ;;  %v6607_v57 = vld [vmem:[#allocation6 + $0x274] ss:$8 sps:$4 sm:$0xff]  }
 0x120   : > { %vm1660_vm0 = vcmp.gt.s32.totalorder %v1659_v59, 0  ;;  %v5968_v7 = vadd.s32 4294967169, %v1756_v2  ;;  %v1604_v9 = vmul.f32 %v7364_v27, %v1547_v4  ;;  %1198 = vmatpush1.bf16.msra.mxu0 %v6593_v58  ;;  %v1760_v14 = vor.u32 8388608, %v7387_v3 }
 0x121   : > { %v1661_v6 = vsel %vm1660_vm0, %v1659_v59, 0  ;;  %1199 = vmatprep.subr.bf16.mxu0 %v6598_v62  ;;  %v7395_v16 = vadd.f32 %v1603_v5, %v1519_v60 }
 0x122   : > { %v1662_v11 = vshrl.u32 %v1661_v6, 5  ;;  %v1663_v12 = vand.u32 31, %v1661_v6  ;;  %v1762_v15 = vadd.s32 1, %v5968_v7  ;;  %v1620_v32 = vadd.f32 %v1604_v9, %v1520_v8  ;;  %v6605_v8 = vld [vmem:[#allocation6 + $0x270] ss:$8 sps:$4 sm:$0xff]  }
 0x123   : > { %v7414_v61 = vshll.u32 %v1760_v14, 8  ;;  %v6610_v14 = vld [vmem:[#allocation6 + $0x284] ss:$8 sps:$4 sm:$0xff]  }
 0x124   : > { %v1664_v17 = vsub.s32 32, %v1663_v12  ;;  %v1666_v19 = vshll.u32 %v9431_v18, %v1663_v12  ;;  %v1669_v21 = vshll.u32 %v9424_v20, %v1663_v12  ;;  %v1672_v25 = vshll.u32 %v9422_v22, %v1663_v12  ;;  %1200 = vmatpush1.bf16.msra.mxu0 %v6596_v10 }
 0x125   : > { %v1675_v29 = vshll.u32 %v9420_v26, %v1663_v12  ;;  %v1678_v31 = vshll.u32 %v9440_v30, %v1663_v12  ;;  %vm1681_vm1 = vcmp.lt.s32.totalorder %v1662_v11, 1  ;;  %1201 = vmatprep.subr.bf16.mxu0 %v6601_v0  ;;  %vm1682_vm2 = vcmp.lt.s32.totalorder %v1662_v11, 2 }
 0x126   : > { %v1665_v34 = vshrl.u32 %v9431_v18, %v1664_v17  ;;  %v1667_v35 = vshrl.u32 %v9424_v20, %v1664_v17  ;;  %v1670_v36 = vshrl.u32 %v9422_v22, %v1664_v17  ;;  %v1673_v37 = vshrl.u32 %v9420_v26, %v1664_v17 }
 0x127   : > { %v1676_v39 = vshrl.u32 %v9440_v30, %v1664_v17  ;;  %v1679_v42 = vshrl.u32 %v9426_v40, %v1664_v17  ;;  %vm1684_vm3 = vcmp.lt.s32.totalorder %v1662_v11, 4  ;;  %vm1763_vm4 = vcmp.gt.s32.totalorder %v1762_v15, 0 }
 0x128   : > { %v1668_v43 = vor.u32 %v1667_v35, %v1666_v19  ;;  %v1671_v44 = vor.u32 %v1670_v36, %v1669_v21  ;;  %v1674_v46 = vor.u32 %v1673_v37, %v1672_v25  ;;  %vm1683_vm5 = vcmp.lt.s32.totalorder %v1662_v11, 3  ;;  %1202 = vmatpush1.bf16.msra.mxu0 %v6599_v33  ;;  %v6608_v35 = vld [vmem:[#allocation6 + $0x280] ss:$8 sps:$4 sm:$0xff]   ;;  %v6613_v37 = vld [vmem:[#allocation6 + $0x294] ss:$8 sps:$4 sm:$0xff]  }
 0x129   : > { %v1677_v47 = vor.u32 %v1676_v39, %v1675_v29  ;;  %v1680_v48 = vor.u32 %v1679_v42, %v1678_v31  ;;  %v1764_v49 = vsel %vm1763_vm4, %v1762_v15, 0  ;;  %1203 = vmatprep.subr.bf16.mxu0 %v6604_v38  ;;  %v7421_v7 = vmul.f32 6.2831855, %v1620_v32 }
 0x12a   : > { %v1685_v52 = vsel %vm1681_vm1, %v1665_v34, %v1668_v43  ;;  %v1686_v53 = vsel %vm1684_vm3, %v1674_v46, 2102212464  ;;  %v1689_v54 = vsel %vm1681_vm1, %v1668_v43, %v1671_v44  ;;  %v1693_v55 = vsel %vm1681_vm1, %v1671_v44, %v1674_v46 }
 0x12b   : > { %v1687_v58 = vsel %vm1683_vm5, %v1671_v44, %v1686_v53  ;;  %v1690_v59 = vsel %vm1684_vm3, %v1677_v47, 920167782  ;;  %v1694_v60 = vsel %vm1684_vm3, %v1680_v48, 1326507024  ;;  %v7416_v2 = vshrl.u32 %v1764_v49, 5  ;;  %9501 = vst [vmem:[#allocation20_spill] sm:$0xff] %v7421_v7 }
 0x12c   : > { %v1691_v62 = vsel %vm1683_vm5, %v1674_v46, %v1690_v59  ;;  %v1695_v63 = vsel %vm1683_vm5, %v1677_v47, %v1694_v60  ;;  %v1766_v3 = vand.u32 31, %v1764_v49  ;;  %v1688_v4 = vsel %vm1682_vm2, %v1685_v52, %v1687_v58  ;;  %1204 = vmatpush1.bf16.msra.mxu0 %v6602_v50  ;;  %v6611_v52 = vld [vmem:[#allocation6 + $0x290] ss:$8 sps:$4 sm:$0xff]   ;;  %v6616_v58 = vld [vmem:[#allocation6 + $0x2a4] ss:$8 sps:$4 sm:$0xff]  }
 0x12d   : > { %v1692_v5 = vsel %vm1682_vm2, %v1689_v54, %v1691_v62  ;;  %v1696_v6 = vsel %vm1682_vm2, %v1693_v55, %v1695_v63  ;;  %1205 = vmatprep.subr.bf16.mxu0 %v6607_v57  ;;  %v1704_v21 = vmul.u32 %v7392_v13, %v1688_v4  ;;  %vm1784_vm6 = vcmp.lt.s32.totalorder %v7416_v2, 1 }
 0x12e   : > { %v7424_v9 = vmul.u32.u64.low %v7392_v13, %v1696_v6  ;;  %v7425_v10 = vmul.u32.u64.high %v7392_v13, %v1696_v6, %v7424_v9  ;;  %v7428_v12 = vmul.u32.u64.low %v7392_v13, %v1692_v5  ;;  %v7429_v0 = vmul.u32.u64.high %v7392_v13, %v1692_v5, %v7428_v12 }
 0x12f   : > { %v1767_v15 = vsub.s32 32, %v1766_v3  ;;  %v1769_v17 = vshll.u32 %v9431_v18, %v1766_v3  ;;  %v1772_v11 = vshll.u32 %v9424_v20, %v1766_v3  ;;  %v1775_v19 = vshll.u32 %v9422_v22, %v1766_v3 }
 0x130   : > { %v1778_v25 = vshll.u32 %v9420_v26, %v1766_v3  ;;  %v1781_v29 = vshll.u32 %v9440_v30, %v1766_v3  ;;  %1206 = vmatpush1.bf16.msra.mxu0 %v6605_v8  ;;  %vm1706_vm7 = vc.u32 %v7425_v10, %v7428_v12  ;;  %v1707_v13 = vadd.s32 1, %v7429_v0 }
 0x131   : > { %v1768_v31 = vshrl.u32 %v9431_v18, %v1767_v15  ;;  %v1770_v32 = vshrl.u32 %v9424_v20, %v1767_v15  ;;  %v1773_v33 = vshrl.u32 %v9422_v22, %v1767_v15  ;;  %v1776_v34 = vshrl.u32 %v9420_v26, %v1767_v15  ;;  %1207 = vmatprep.subr.bf16.mxu0 %v6610_v14 }
 0x132   : > { %v1779_v36 = vshrl.u32 %v9440_v30, %v1767_v15  ;;  %vm1785_vm8 = vcmp.lt.s32.totalorder %v7416_v2, 2  ;;  %v1782_v43 = vshrl.u32 %v9426_v40, %v1767_v15  ;;  %v1708_v44 = vsel %vm1706_vm7, %v1707_v13, %v7429_v0  ;;  %v6617_v13 = vld [vmem:[#allocation6 + $0x2b0] ss:$8 sps:$4 sm:$0xff]  }
 0x133   : > { %v1771_v38 = vor.u32 %v1770_v32, %v1769_v17  ;;  %v1774_v39 = vor.u32 %v1773_v33, %v1772_v11  ;;  %v1777_v42 = vor.u32 %v1776_v34, %v1775_v19  ;;  %vm1786_vm9 = vcmp.lt.s32.totalorder %v7416_v2, 3  ;;  %v6619_v11 = vld [vmem:[#allocation6 + $0x2b4] ss:$8 sps:$4 sm:$0xff]  }
 0x134   : > { %v1780_v46 = vor.u32 %v1779_v36, %v1778_v25  ;;  %vm1787_vm10 = vcmp.lt.s32.totalorder %v7416_v2, 4  ;;  %v1709_v47 = vadd.s32 %v1708_v44, %v1704_v21  ;;  %v1783_v48 = vor.u32 %v1782_v43, %v1781_v29  ;;  %1208 = vmatpush1.bf16.msra.mxu0 %v6608_v35  ;;  %v1456_v35 = vpop.permute.xlu1 %1455 }
 0x135   : > { %v1788_v49 = vsel %vm1784_vm6, %v1768_v31, %v1771_v38  ;;  %v1789_v50 = vsel %vm1787_vm10, %v1777_v42, 2102212464  ;;  %v1792_v54 = vsel %vm1784_vm6, %v1771_v38, %v1774_v39  ;;  %v1796_v57 = vsel %vm1784_vm6, %v1774_v39, %v1777_v42  ;;  %1209 = vmatprep.subr.bf16.mxu0 %v6613_v37  ;;  %v6622_v37 = vld [vmem:[#allocation6 + $0x2c4] ss:$8 sps:$4 sm:$0xff]  }
 0x136   : > { %v1790_v53 = vsel %vm1786_vm9, %v1774_v39, %v1789_v50  ;;  %v1793_v55 = vsel %vm1787_vm10, %v1780_v46, 920167782  ;;  %v1710_v59 = vadd.s32 536870912, %v1709_v47  ;;  %v1797_v62 = vsel %vm1787_vm10, %v1783_v48, 1326507024 }
 0x137   : > { %v1794_v60 = vsel %vm1786_vm9, %v1777_v42, %v1793_v55  ;;  %v7463_v63 = vmul.f32 6.2831855, %v7395_v16  ;;  %v1791_v3 = vsel %vm1785_vm8, %v1788_v49, %v1790_v53  ;;  %v1798_v5 = vsel %vm1786_vm9, %v1780_v46, %v1797_v62  ;;  %v6614_v16 = vld [vmem:[#allocation6 + $0x2a0] ss:$8 sps:$4 sm:$0xff]  }
 0x138   : > { %v1795_v4 = vsel %vm1785_vm8, %v1792_v54, %v1794_v60  ;;  %v7471_v6 = vshrl.u32 %v1710_v59, 30  ;;  %v1799_v8 = vsel %vm1785_vm8, %v1796_v57, %v1798_v5  ;;  %1210 = vmatpush1.bf16.msra.mxu0 %v6611_v52  ;;  %v1961_v17 = vand.u32 2139095040, %v7421_v7  ;;  %v6620_v49 = vld [vmem:[#allocation6 + $0x2c0] ss:$8 sps:$4 sm:$0xff]   ;;  %v1551_v54 = vpop.permute.xlu1 %1550 }
 0x139   : > { %9502 = vst [vmem:[#allocation21_spill] sm:$0xff] %v7463_v63  ;;  %v7476_v9 = vmul.u32.u64.low %v7414_v61, %v1795_v4  ;;  %v7477_v0 = vmul.u32.u64.high %v7414_v61, %v1795_v4, %v7476_v9  ;;  %v7480_v14 = vmul.u32.u64.low %v7414_v61, %v1799_v8  ;;  %v7481_v15 = vmul.u32.u64.high %v7414_v61, %v1799_v8, %v7480_v14  ;;  %1211 = vmatprep.subr.bf16.mxu0 %v6616_v58 }
 0x13a   : > { %v1712_v19 = vshll.u32 %v7471_v6, 30  ;;  %v1858_v21 = vand.u32 2139095040, %v7463_v63  ;;  %v1807_v2 = vmul.u32 %v7414_v61, %v1791_v3  ;;  %v9415_v25 = vand.u32 2147483647, %v7421_v7 }
 0x13b   : > { %v1962_v29 = vshrl.u32 %v1961_v17, 23  ;;  %v1810_v32 = vadd.s32 1, %v7477_v0  ;;  %v9417_v33 = vand.u32 2147483647, %v7463_v63  ;;  %vm1809_vm11 = vc.u32 %v7481_v15, %v7476_v9 }
 0x13c   : > { %v7488_v31 = vsub.s32 %v1709_v47, %v1712_v19  ;;  %v1859_v34 = vshrl.u32 %v1858_v21, 23  ;;  %1212 = vmatpush1.bf16.msra.mxu0 %v6614_v16  ;;  %v7497_v43 = vand.u32 8388607, %v9415_v25  ;;  %v1705_v55 = vadd.s32 %v7428_v12, %v7425_v10  ;;  %v6623_v12 = vld [vmem:[#allocation6 + $0x2d0] ss:$8 sps:$4 sm:$0xff]  }
 0x13d   : > { %v5976_v36 = vadd.s32 4294967169, %v1962_v29  ;;  %1213 = vmatprep.subr.bf16.mxu0 %v6619_v11  ;;  %v1811_v38 = vsel %vm1809_vm11, %v1810_v32, %v7477_v0  ;;  %v7502_v47 = vand.u32 8388607, %v9417_v33  ;;  %v1521_v3 = vmul.f32 %v7367_v28, %v1456_v35  ;;  %v6625_v0 = vld [vmem:[#allocation6 + $0x2d4] ss:$8 sps:$4 sm:$0xff]  }
 0x13e   : > { %v1715_v61 = vsub.s32 0, %v7488_v31  ;;  %v5972_v39 = vadd.s32 4294967169, %v1859_v34  ;;  %v1812_v42 = vadd.s32 %v1811_v38, %v1807_v2  ;;  %v1966_v58 = vor.u32 8388608, %v7497_v43  ;;  %v6628_v34 = vld [vmem:[#allocation6 + $0x2e4] ss:$8 sps:$4 sm:$0xff]  }
 0x13f   : > { %v1968_v44 = vadd.s32 1, %v5976_v36  ;;  %v1863_v62 = vor.u32 8388608, %v7502_v47  ;;  %v7512_v4 = vadd.s32 %v7476_v9, %v7481_v15  ;;  %v1605_v10 = vmul.f32 %v7364_v27, %v1551_v54 }
 0x140   : > { %v5965_v46 = vmin.u32 %v1715_v61, %v7488_v31  ;;  %v1865_v48 = vadd.s32 1, %v5972_v39  ;;  %1214 = vmatpush1.bf16.msra.mxu0 %v6617_v13  ;;  %v1813_v50 = vadd.s32 536870912, %v1812_v42  ;;  %v6626_v61 = vld [vmem:[#allocation6 + $0x2e0] ss:$8 sps:$4 sm:$0xff]   ;;  %vm1651_vm10 = vcmp.lt.s32.totalorder %v7372_v41, 0 }
 0x141   : > { %vm1969_vm12 = vcmp.gt.s32.totalorder %v1968_v44, 0  ;;  %1215 = vmatprep.subr.bf16.mxu0 %v6622_v37  ;;  %v7552_v43 = vshll.u32 %v1863_v62, 8 }
 0x142   : > { %v1717_v52 = vclz %v5965_v46  ;;  %v1970_v53 = vsel %vm1969_vm12, %v1968_v44, 0  ;;  %v7506_v57 = vshrl.u32 %v1813_v50, 30  ;;  %vm1866_vm13 = vcmp.gt.s32.totalorder %v1865_v48, 0  ;;  %v7530_v46 = vpop.permute.xlu0 %1558 }
 0x143   : > { %v1972_v59 = vand.u32 31, %v1970_v53  ;;  %v1971_v2 = vshrl.u32 %v1970_v53, 5  ;;  %v1867_v37 = vsel %vm1866_vm13, %v1865_v48, 0  ;;  %v1621_v44 = vadd.f32 %v1605_v10, %v1521_v3 }
 0x144   : > { %v5966_v60 = vadd.s32 4294967294, %v1717_v52  ;;  %1216 = vmatpush1.bf16.msra.mxu0 %v6620_v49  ;;  %v1815_v5 = vshll.u32 %v7506_v57, 30  ;;  %v1868_v62 = vshrl.u32 %v1867_v37, 5 }
 0x145   : > { %v1973_v8 = vsub.s32 32, %v1972_v59  ;;  %v1975_v16 = vshll.u32 %v9431_v18, %v1972_v59  ;;  %v1978_v14 = vshll.u32 %v9424_v20, %v1972_v59  ;;  %v1981_v17 = vshll.u32 %v9422_v22, %v1972_v59  ;;  %1217 = vmatprep.subr.bf16.mxu0 %v6625_v0  ;;  %v1555_v0 = vpop.permute.xlu1 %1554 }
 0x146   : > { %vm5967_vm14 = vcmp.lt.s32.totalorder %v5966_v60, 0  ;;  %v7519_v19 = vsub.s32 %v1812_v42, %v1815_v5  ;;  %v1984_v15 = vshll.u32 %v9420_v26, %v1972_v59  ;;  %v1987_v32 = vshll.u32 %v9440_v30, %v1972_v59 }
 0x147   : > { %v1720_v11 = vsel %vm5967_vm14, 0, %v5966_v60  ;;  %v1976_v9 = vshrl.u32 %v9424_v20, %v1973_v8  ;;  %v1979_v29 = vshrl.u32 %v9422_v22, %v1973_v8  ;;  %v1982_v13 = vshrl.u32 %v9420_v26, %v1973_v8 }
 0x148   : > { %v1725_v21 = vsub.s32 4294967266, %v1720_v11  ;;  %1218 = vmatpush1.bf16.msra.mxu0 %v6623_v12  ;;  %v1818_v35 = vsub.s32 0, %v7519_v19  ;;  %v1985_v36 = vshrl.u32 %v9440_v30, %v1973_v8  ;;  %v1721_v38 = vsub.s32 32, %v1720_v11 }
 0x149   : > { %v1977_v39 = vor.u32 %v1976_v9, %v1975_v16  ;;  %v1988_v42 = vshrl.u32 %v9426_v40, %v1973_v8  ;;  %1219 = vmatprep.subr.bf16.mxu0 %v6628_v34  ;;  %v1980_v50 = vor.u32 %v1979_v29, %v1978_v14  ;;  %v1983_v52 = vor.u32 %v1982_v13, %v1981_v17 }
 0x14a   : > { %v5969_v49 = vmin.u32 %v1818_v35, %v7519_v19  ;;  %v1986_v53 = vor.u32 %v1985_v36, %v1984_v15  ;;  %v1726_v54 = vadd.s32 127, %v1725_v21  ;;  %vm1990_vm15 = vcmp.lt.s32.totalorder %v1971_v2, 1 }
 0x14b   : > { %v1989_v59 = vor.u32 %v1988_v42, %v1987_v32  ;;  %v1869_v60 = vand.u32 31, %v1867_v37  ;;  %v1974_v5 = vshrl.u32 %v9431_v18, %v1973_v8  ;;  %vm1992_vm0 = vcmp.lt.s32.totalorder %v1971_v2, 3  ;;  %v1461_v32 = vpop.permute.xlu0 %1460 }
 0x14c   : > { %1220 = vmatpush1.bf16.msra.mxu0 %v6626_v61  ;;  %v1820_v48 = vclz %v5969_v49  ;;  %vm1993_vm1 = vcmp.lt.s32.totalorder %v1971_v2, 4  ;;  %v1722_v3 = vshll.u32 %v7488_v31, %v1720_v11  ;;  %v1723_v10 = vshrl.u32 %v1705_v55, %v1721_v38 }
 0x14d   : > { %vm1991_vm2 = vcmp.lt.s32.totalorder %v1971_v2, 2  ;;  %v1995_v12 = vsel %vm1993_vm1, %v1983_v52, 2102212464  ;;  %v1998_v14 = vsel %vm1990_vm15, %v1977_v39, %v1980_v50  ;;  %v1999_v17 = vsel %vm1993_vm1, %v1986_v53, 920167782 }
 0x14e   : > { %v5970_v16 = vadd.s32 4294967294, %v1820_v48  ;;  %v2002_v9 = vsel %vm1990_vm15, %v1980_v50, %v1983_v52  ;;  %v1727_v15 = vshll.u32 %v1726_v54, 23  ;;  %v2000_v21 = vsel %vm1992_vm0, %v1983_v52, %v1999_v17 }
 0x14f   : > { %v2003_v29 = vsel %vm1993_vm1, %v1989_v59, 1326507024  ;;  %v2006_v8 = vshll.u32 %v1966_v58, 8  ;;  %v1994_v31 = vsel %vm1990_vm15, %v1974_v5, %v1977_v39  ;;  %v7543_v11 = vmul.f32 %v7364_v27, %v1555_v0 }
 0x150   : > { %vm5971_vm3 = vcmp.lt.s32.totalorder %v5970_v16, 0  ;;  %v2004_v55 = vsel %vm1992_vm0, %v1986_v53, %v2003_v29  ;;  %v1996_v34 = vsel %vm1992_vm0, %v1980_v50, %v1995_v12  ;;  %v2001_v35 = vsel %vm1991_vm2, %v1998_v14, %v2000_v21 }
 0x151   : > { %v2005_v13 = vsel %vm1991_vm2, %v2002_v9, %v2004_v55  ;;  %v1870_v36 = vsub.s32 32, %v1869_v60  ;;  %v7548_v61 = vor.u32 %v1723_v10, %v1722_v3  ;;  %v7554_v58 = vmul.f32 6.2831855, %v1621_v44 }
 0x152   : > { %v7557_v38 = vmul.f32 %v7367_v28, %v1461_v32  ;;  %v7559_v39 = vor.u32 4788187, %v1727_v15  ;;  %v7561_v42 = vsel %vm5971_vm3, 0, %v5970_v16  ;;  %v1997_v52 = vsel %vm1991_vm2, %v1994_v31, %v1996_v34 }
 0x153   : > { %v7563_v49 = vmul.u32.u64.low %v2006_v8, %v2005_v13  ;;  %v7564_v50 = vmul.u32.u64.high %v2006_v8, %v2005_v13, %v7563_v49  ;;  %v7567_v53 = vmul.u32.u64.low %v2006_v8, %v2001_v35  ;;  %v7568_v54 = vmul.u32.u64.high %v2006_v8, %v2001_v35, %v7567_v53 }
 0x154   : > { %v1872_v47 = vshll.u32 %v9431_v18, %v1869_v60  ;;  %v1873_v44 = vshrl.u32 %v9424_v20, %v1870_v36  ;;  %v1875_v59 = vshll.u32 %v9424_v20, %v1869_v60  ;;  %v1876_v48 = vshrl.u32 %v9422_v22, %v1870_v36 }
 0x155   : > { %v1731_v5 = vcvt.s32.f32 %v7548_v61  ;;  %v1828_v3 = vsub.s32 4294967266, %v7561_v42  ;;  %v1878_v2 = vshll.u32 %v9422_v22, %v1869_v60  ;;  %v1879_v10 = vshrl.u32 %v9420_v26, %v1870_v36 }
 0x156   : > { %v1729_v12 = vand.u32 2147483647, %v7559_v39  ;;  %v2013_v0 = vmul.u32 %v2006_v8, %v1997_v52  ;;  %vm2015_vm4 = vc.u32 %v7564_v50, %v7567_v53  ;;  %v1871_v37 = vshrl.u32 %v9431_v18, %v1870_v36 }
 0x157   : > { %v2016_v16 = vadd.s32 1, %v7568_v54  ;;  %v1874_v14 = vor.u32 %v1873_v44, %v1872_v47  ;;  %v1877_v17 = vor.u32 %v1876_v48, %v1875_v59  ;;  %v1880_v9 = vor.u32 %v1879_v10, %v1878_v2 }
 0x158   : > { %v1881_v15 = vshll.u32 %v9420_v26, %v1869_v60  ;;  %v1882_v21 = vshrl.u32 %v9440_v30, %v1870_v36  ;;  %v1884_v29 = vshll.u32 %v9440_v30, %v1869_v60  ;;  %v1885_v32 = vshrl.u32 %v9426_v40, %v1870_v36 }
 0x159   : > { %v1824_v8 = vsub.s32 32, %v7561_v42  ;;  %v1829_v31 = vadd.s32 127, %v1828_v3  ;;  %v2017_v55 = vsel %vm2015_vm4, %v2016_v16, %v7568_v54  ;;  %vm1887_vm5 = vcmp.lt.s32.totalorder %v1868_v62, 1 }
 0x15a   : > { %v2018_v34 = vadd.s32 %v2017_v55, %v2013_v0  ;;  %v1883_v35 = vor.u32 %v1882_v21, %v1881_v15  ;;  %v1886_v13 = vor.u32 %v1885_v32, %v1884_v29  ;;  %vm1889_vm6 = vcmp.lt.s32.totalorder %v1868_v62, 3  ;;  %v1471_v55 = vpop.permute.xlu1 %1470 }
 0x15b   : > { %vm1888_vm7 = vcmp.lt.s32.totalorder %v1868_v62, 2  ;;  %vm1890_vm8 = vcmp.lt.s32.totalorder %v1868_v62, 4  ;;  %v1891_v61 = vsel %vm1887_vm5, %v1871_v37, %v1874_v14  ;;  %v1895_v39 = vsel %vm1887_vm5, %v1874_v14, %v1877_v17 }
 0x15c   : > { %v2019_v49 = vadd.s32 536870912, %v2018_v34  ;;  %v1892_v52 = vsel %vm1890_vm8, %v1880_v9, 2102212464  ;;  %v1896_v47 = vsel %vm1890_vm8, %v1883_v35, 920167782  ;;  %v1899_v60 = vsel %vm1887_vm5, %v1877_v17, %v1880_v9 }
 0x15d   : > { %v1825_v36 = vshll.u32 %v7519_v19, %v7561_v42  ;;  %v1893_v44 = vsel %vm1889_vm6, %v1877_v17, %v1892_v52  ;;  %v1897_v54 = vsel %vm1889_vm6, %v1880_v9, %v1896_v47  ;;  %v1900_v59 = vsel %vm1890_vm8, %v1886_v13, 1326507024 }
 0x15e   : > { %v1826_v48 = vshrl.u32 %v7512_v4, %v1824_v8  ;;  %v7595_v3 = vshrl.u32 %v2019_v49, 30  ;;  %v1898_v2 = vsel %vm1888_vm7, %v1895_v39, %v1897_v54  ;;  %v1901_v10 = vsel %vm1889_vm6, %v1883_v35, %v1900_v59 }
 0x15f   : > { %v1894_v0 = vsel %vm1888_vm7, %v1891_v61, %v1893_v44  ;;  %v1902_v37 = vsel %vm1888_vm7, %v1899_v60, %v1901_v10  ;;  %v7602_v16 = vmul.u32.u64.low %v7552_v43, %v1898_v2  ;;  %v7603_v19 = vmul.u32.u64.high %v7552_v43, %v1898_v2, %v7602_v16  ;;  %v1563_v44 = vpop.permute.xlu1 %1562  ;;  %v1466_v10 = vpop.permute.xlu0 %1465 }
 0x160   : > { %9503 = vst [vmem:[#allocation22_spill] sm:$0xff] %v7595_v3  ;;  %v1830_v42 = vshll.u32 %v1829_v31, 23  ;;  %v2021_v14 = vshll.u32 %v7595_v3, 30  ;;  %v7608_v4 = vmul.u32.u64.low %v7552_v43, %v1902_v37  ;;  %v7609_v17 = vmul.u32.u64.high %v7552_v43, %v1902_v37, %v7608_v4 }
 0x161   : > { %v2064_v9 = vand.u32 2139095040, %v7554_v58  ;;  %v1910_v21 = vmul.u32 %v7552_v43, %v1894_v0  ;;  %v1622_v62 = vadd.f32 %v7543_v11, %v7557_v38  ;;  %v1732_v29 = vmul.f32 %v1731_v5, %v1729_v12 }
 0x162   : > { %v7612_v15 = vsub.s32 %v2018_v34, %v2021_v14  ;;  %v1913_v32 = vadd.s32 1, %v7603_v19  ;;  %v9413_v8 = vand.u32 2147483647, %v7554_v58  ;;  %v1827_v35 = vor.u32 %v1826_v48, %v1825_v36 }
 0x163   : > { %v2065_v31 = vshrl.u32 %v2064_v9, 23  ;;  %v1831_v13 = vor.u32 4788187, %v1830_v42  ;;  %vm1912_vm9 = vc.u32 %v7609_v17, %v7602_v16  ;;  %v7624_v38 = vmul.f32 6.2831855, %v1622_v62 }
 0x164   : > { %v2024_v61 = vsub.s32 0, %v7612_v15  ;;  %v1914_v34 = vsel %vm1912_vm9, %v1913_v32, %v7603_v19  ;;  %v1733_v5 = vxor.u32 2147483648, %v1732_v29  ;;  %v1834_v52 = vcvt.s32.f32 %v1827_v35 }
 0x165   : > { %v5980_v43 = vadd.s32 4294967169, %v2065_v31  ;;  %v1915_v11 = vadd.s32 %v1914_v34, %v1910_v21  ;;  %v1832_v49 = vand.u32 2147483647, %v1831_v13  ;;  %v2068_v60 = vand.u32 8388607, %v9413_v8 }
 0x166   : > { %v5977_v39 = vmin.u32 %v2024_v61, %v7612_v15  ;;  %v7633_v48 = vmul.f32 %v7364_v27, %v7530_v46  ;;  %v2167_v2 = vand.u32 2139095040, %v7624_v38  ;;  %v7638_v0 = vsel %vm1651_vm10, %v1733_v5, %v1732_v29  ;;  %v6631_v21 = vld [vmem:[#allocation6 + $0x2f4] ss:$8 sps:$4 sm:$0xff]   ;;  %v1476_v61 = vpop.permute.xlu1 %1475 }
 0x167   : > { %v2071_v12 = vadd.s32 1, %v5980_v43  ;;  %v1916_v47 = vadd.s32 536870912, %v1915_v11  ;;  %v7642_v37 = vadd.s32 %v7567_v53, %v7564_v50  ;;  %v1524_v42 = vmul.f32 %v7367_v28, %v1471_v55  ;;  %v6629_v50 = vld [vmem:[#allocation6 + $0x2f0] ss:$8 sps:$4 sm:$0xff]   ;;  %1221 = vmatprep.subr.bf16.mxu0 %v6631_v21 }
 0x168   : > { %v2026_v36 = vclz %v5977_v39  ;;  %v7645_v14 = vmul.f32 %v1834_v52, %v1832_v49  ;;  %v2069_v46 = vor.u32 8388608, %v2068_v60  ;;  %v1608_v9 = vmul.f32 %v7364_v27, %v1563_v44  ;;  %1222 = vmatpush1.bf16.msra.mxu0 %v6629_v50  ;;  %v6632_v60 = vld [vmem:[%s7270_s15 + $0x10] ss:$24 sps:$4 sm:$0xff]  }
 0x169   : > { %vm2072_vm11 = vcmp.gt.s32.totalorder %v2071_v12, 0  ;;  %v7629_v54 = vshrl.u32 %v1916_v47, 30  ;;  %v9414_v29 = vand.u32 2147483647, %v7624_v38  ;;  %v1523_v31 = vmul.f32 %v7367_v28, %v1466_v10 }
 0x16a   : > { %v2073_v59 = vsel %vm2072_vm11, %v2071_v12, 0  ;;  %v5978_v62 = vadd.s32 4294967294, %v2026_v36  ;;  %v2168_v13 = vshrl.u32 %v2167_v2, 23  ;;  %v7658_v5 = vmul.f32 %v7367_v28, %v1476_v61  ;;  %v6634_v12 = vld [vmem:[%s7270_s15 + $0x14] ss:$24 sps:$4 sm:$0xff]   ;;  %s6999_s15 = smov 64  }
 0x16b   : > { %v2075_v19 = vand.u32 31, %v2073_v59  ;;  %v1918_v4 = vshll.u32 %v7629_v54, 30  ;;  %v2074_v34 = vshrl.u32 %v2073_v59, 5  ;;  %v7671_v59 = vshll.u32 %v2069_v46, 8  ;;  %1223 = vmatprep.mubr.bf16.mxu0 %v6634_v12 }
 0x16c   : > { %vm5979_vm12 = vcmp.lt.s32.totalorder %v5978_v62, 0  ;;  %1224 = vmatmul.mubr.bf16.vlgmr.msra.gmra.mrb[0].mxu0 %v6632_v60  ;;  %v1624_v46 = vadd.f32 %v1608_v9, %v1524_v42 }
 0x16d   : > { %v2076_v32 = vsub.s32 32, %v2075_v19  ;;  %v7651_v53 = vsub.s32 %v1915_v11, %v1918_v4  ;;  %v2078_v55 = vshll.u32 %v9431_v18, %v2075_v19  ;;  %v2081_v35 = vshll.u32 %v9424_v20, %v2075_v19 }
 0x16e   : > { %v7663_v11 = vadd.s32 %v7602_v16, %v7609_v17  ;;  %v2084_v52 = vshll.u32 %v9422_v22, %v2075_v19  ;;  %v2087_v36 = vshll.u32 %v9420_v26, %v2075_v19  ;;  %v5984_v4 = vadd.s32 4294967169, %v2168_v13 }
 0x16f   : > { %v2079_v43 = vshrl.u32 %v9424_v20, %v2076_v32  ;;  %v2082_v39 = vshrl.u32 %v9422_v22, %v2076_v32  ;;  %v1921_v49 = vsub.s32 0, %v7651_v53  ;;  %v2085_v47 = vshrl.u32 %v9420_v26, %v2076_v32 }
 0x170   : > { %v2088_v44 = vshrl.u32 %v9440_v30, %v2076_v32  ;;  %v2171_v16 = vand.u32 8388607, %v9414_v29  ;;  %v2090_v21 = vshll.u32 %v9440_v30, %v2075_v19  ;;  %v2091_v50 = vshrl.u32 %v9426_v40, %v2076_v32 }
 0x171   : > { %v2080_v2 = vor.u32 %v2079_v43, %v2078_v55  ;;  %v2083_v10 = vor.u32 %v2082_v39, %v2081_v35  ;;  %vm2093_vm13 = vcmp.lt.s32.totalorder %v2074_v34, 1  ;;  %v2029_v61 = vsel %vm5979_vm12, 0, %v5978_v62 }
 0x172   : > { %v2089_v17 = vor.u32 %v2088_v44, %v2087_v36  ;;  %v5973_v1 = vmin.u32 %v1921_v49, %v7651_v53  ;;  %v2086_v8 = vor.u32 %v2085_v47, %v2084_v52  ;;  %v2077_v12 = vshrl.u32 %v9431_v18, %v2076_v32 }
 0x173   : > { %v2092_v55 = vor.u32 %v2091_v50, %v2090_v21  ;;  %vm2095_vm14 = vcmp.lt.s32.totalorder %v2074_v34, 3  ;;  %vm2096_vm15 = vcmp.lt.s32.totalorder %v2074_v34, 4  ;;  %v2030_v35 = vsub.s32 32, %v2029_v61 }
 0x174   : > { %vm2094_vm0 = vcmp.lt.s32.totalorder %v2074_v34, 2  ;;  %v2098_v13 = vsel %vm2096_vm15, %v2086_v8, 2102212464  ;;  %v2101_v43 = vsel %vm2093_vm13, %v2080_v2, %v2083_v10  ;;  %v2102_v39 = vsel %vm2096_vm15, %v2089_v17, 920167782 }
 0x175   : > { %v2106_v19 = vsel %vm2096_vm15, %v2092_v55, 1326507024  ;;  %v2174_v60 = vadd.s32 1, %v5984_v4  ;;  %v7681_v36 = vadd.f32 %v7633_v48, %v1523_v31  ;;  %v2034_v62 = vsub.s32 4294967266, %v2029_v61 }
 0x176   : > { %v1923_v49 = vclz %v5973_v1  ;;  %v2103_v42 = vsel %vm2095_vm14, %v2086_v8, %v2102_v39  ;;  %v2105_v9 = vsel %vm2093_vm13, %v2083_v10, %v2086_v8  ;;  %v2097_v32 = vsel %vm2093_vm13, %v2077_v12, %v2080_v2  ;;  %v1567_v1 = vpop.permute.xlu1 %1566 }
 0x177   : > { %v2099_v52 = vsel %vm2095_vm14, %v2083_v10, %v2098_v13  ;;  %v2104_v47 = vsel %vm2094_vm0, %v2101_v43, %v2103_v42  ;;  %v2107_v44 = vsel %vm2095_vm14, %v2089_v17, %v2106_v19  ;;  %v2031_v21 = vshll.u32 %v7612_v15, %v2029_v61 }
 0x178   : > { %v2032_v4 = vshrl.u32 %v7642_v37, %v2030_v35  ;;  %v2172_v48 = vor.u32 8388608, %v2171_v16  ;;  %v7691_v31 = vmul.f32 6.2831855, %v1624_v46  ;;  %v2108_v50 = vsel %vm2094_vm0, %v2105_v9, %v2107_v44 }
 0x179   : > { %v7695_v8 = vmul.u32.u64.low %v7671_v59, %v2104_v47  ;;  %v7696_v55 = vmul.u32.u64.high %v7671_v59, %v2104_v47, %v7695_v8  ;;  %vm2175_vm1 = vcmp.gt.s32.totalorder %v2174_v60, 0  ;;  %v2035_v2 = vadd.s32 127, %v2034_v62 }
 0x17a   : > { %9504 = vst [vmem:[#allocation23_spill] sm:$0xff] %v7691_v31  ;;  %v5974_v10 = vadd.s32 4294967294, %v1923_v49  ;;  %v2100_v17 = vsel %vm2094_vm0, %v2097_v32, %v2099_v52  ;;  %v2176_v12 = vsel %vm2175_vm1, %v2174_v60, 0  ;;  %v7705_v61 = vmul.f32 %v7364_v27, %v1567_v1 }
 0x17b   : > { %v7701_v15 = vmul.u32.u64.low %v7671_v59, %v2108_v50  ;;  %v7702_v37 = vmul.u32.u64.high %v7671_v59, %v2108_v50, %v7701_v15  ;;  %v2178_v16 = vand.u32 31, %v2176_v12  ;;  %v7707_v46 = vor.u32 %v2032_v4, %v2031_v21 }
 0x17c   : > { %v7709_v35 = vshll.u32 %v2172_v48, 8  ;;  %v9416_v13 = vand.u32 2147483647, %v7691_v31  ;;  %v2373_v43 = vand.u32 2139095040, %v7691_v31  ;;  %v2116_v34 = vmul.u32 %v7671_v59, %v2100_v17 }
 0x17d   : > { %v2119_v39 = vadd.s32 1, %v7696_v55  ;;  %v2179_v19 = vsub.s32 32, %v2178_v16  ;;  %v2181_v60 = vshll.u32 %v9431_v18, %v2178_v16  ;;  %v2036_v62 = vshll.u32 %v2035_v2, 23 }
 0x17e   : > { %vm5975_vm2 = vcmp.lt.s32.totalorder %v5974_v10, 0  ;;  %v2184_v49 = vshll.u32 %v9424_v20, %v2178_v16  ;;  %v2187_v42 = vshll.u32 %v9422_v22, %v2178_v16  ;;  %vm2118_vm3 = vc.u32 %v7702_v37, %v7695_v8 }
 0x17f   : > { %v2177_v9 = vshrl.u32 %v2176_v12, 5  ;;  %v2182_v32 = vshrl.u32 %v9424_v20, %v2179_v19  ;;  %v2190_v52 = vshll.u32 %v9420_v26, %v2178_v16  ;;  %v2120_v59 = vsel %vm2118_vm3, %v2119_v39, %v7696_v55 }
 0x180   : > { %v2180_v47 = vshrl.u32 %v9431_v18, %v2179_v19  ;;  %v2185_v44 = vshrl.u32 %v9422_v22, %v2179_v19  ;;  %v2188_v21 = vshrl.u32 %v9420_v26, %v2179_v19  ;;  %v2121_v4 = vadd.s32 %v2120_v59, %v2116_v34 }
 0x181   : > { %v2183_v48 = vor.u32 %v2182_v32, %v2181_v60  ;;  %v2191_v1 = vshrl.u32 %v9440_v30, %v2179_v19  ;;  %v2193_v50 = vshll.u32 %v9440_v30, %v2178_v16  ;;  %v7728_v2 = vsel %vm5975_vm2, 0, %v5974_v10 }
 0x182   : > { %v2186_v17 = vor.u32 %v2185_v44, %v2184_v49  ;;  %v2189_v12 = vor.u32 %v2188_v21, %v2187_v42  ;;  %v2194_v15 = vshrl.u32 %v9426_v40, %v2179_v19  ;;  %v2122_v29 = vadd.s32 536870912, %v2121_v4 }
 0x183   : > { %v2192_v55 = vor.u32 %v2191_v1, %v2190_v52  ;;  %vm2196_vm4 = vcmp.lt.s32.totalorder %v2177_v9, 1  ;;  %v2374_v39 = vshrl.u32 %v2373_v43, 23  ;;  %vm2197_vm5 = vcmp.lt.s32.totalorder %v2177_v9, 2 }
 0x184   : > { %v2195_v25 = vor.u32 %v2194_v15, %v2193_v50  ;;  %vm2198_vm6 = vcmp.lt.s32.totalorder %v2177_v9, 3  ;;  %vm2199_vm7 = vcmp.lt.s32.totalorder %v2177_v9, 4  ;;  %v7731_v34 = vshrl.u32 %v2122_v29, 30 }
 0x185   : > { %v2200_v60 = vsel %vm2196_vm4, %v2180_v47, %v2183_v48  ;;  %v2201_v32 = vsel %vm2199_vm7, %v2189_v12, 2102212464  ;;  %v2204_v59 = vsel %vm2196_vm4, %v2183_v48, %v2186_v17  ;;  %v7733_v16 = vor.u32 4788187, %v2036_v62 }
 0x186   : > { %9505 = vst [vmem:[#allocation24_spill] sm:$0xff] %v7731_v34  ;;  %v2202_v10 = vsel %vm2198_vm6, %v2186_v17, %v2201_v32  ;;  %v2205_v49 = vsel %vm2199_vm7, %v2192_v55, 920167782  ;;  %v2208_v42 = vsel %vm2196_vm4, %v2186_v17, %v2189_v12  ;;  %v1931_v19 = vsub.s32 4294967266, %v7728_v2 }
 0x187   : > { %v2124_v52 = vshll.u32 %v7731_v34, 30  ;;  %v2206_v43 = vsel %vm2198_vm6, %v2189_v12, %v2205_v49  ;;  %v2209_v44 = vsel %vm2199_vm7, %v2195_v25, 1326507024  ;;  %v2203_v21 = vsel %vm2197_vm5, %v2200_v60, %v2202_v10 }
 0x188   : > { %v2207_v29 = vsel %vm2197_vm5, %v2204_v59, %v2206_v43  ;;  %v2210_v47 = vsel %vm2198_vm6, %v2192_v55, %v2209_v44  ;;  %v5992_v48 = vadd.s32 4294967169, %v2374_v39  ;;  %v1927_v15 = vsub.s32 32, %v7728_v2 }
 0x189   : > { %v7742_v62 = vsub.s32 %v2121_v4, %v2124_v52  ;;  %v2211_v1 = vsel %vm2197_vm5, %v2208_v42, %v2210_v47  ;;  %v7746_v50 = vmul.u32.u64.low %v7709_v35, %v2207_v29  ;;  %v7747_v17 = vmul.u32.u64.high %v7709_v35, %v2207_v29, %v7746_v50 }
 0x18a   : > { %v7752_v25 = vmul.u32.u64.low %v7709_v35, %v2211_v1  ;;  %v7753_v12 = vmul.u32.u64.high %v7709_v35, %v2211_v1, %v7752_v25  ;;  %v2380_v60 = vadd.s32 1, %v5992_v48  ;;  %v1932_v32 = vadd.s32 127, %v1931_v19 }
 0x18b   : > { %v2127_v55 = vsub.s32 0, %v7742_v62  ;;  %v2377_v4 = vand.u32 8388607, %v9416_v13  ;;  %v7759_v9 = vmul.f32 6.2831855, %v7681_v36  ;;  %v2040_v39 = vcvt.s32.f32 %v7707_v46 }
 0x18c   : > { %v2219_v59 = vmul.u32 %v7709_v35, %v2203_v21  ;;  %vm2381_vm8 = vcmp.gt.s32.totalorder %v2380_v60, 0  ;;  %v7765_v10 = vadd.f32 %v7705_v61, %v7658_v5  ;;  %v2038_v49 = vand.u32 2147483647, %v7733_v16 }
 0x18d   : > { %v5981_v42 = vmin.u32 %v2127_v55, %v7742_v62  ;;  %v2222_v19 = vadd.s32 1, %v7747_v17  ;;  %v2382_v52 = vsel %vm2381_vm8, %v2380_v60, 0  ;;  %v1928_v36 = vshll.u32 %v7651_v53, %v7728_v2 }
 0x18e   : > { %v1929_v43 = vshrl.u32 %v7663_v11, %v1927_v15  ;;  %vm2221_vm9 = vc.u32 %v7753_v12, %v7746_v50  ;;  %v2384_v35 = vand.u32 31, %v2382_v52  ;;  %v1933_v44 = vshll.u32 %v1932_v32, 23 }
 0x18f   : > { %v2129_v21 = vclz %v5981_v42  ;;  %v2223_v5 = vsel %vm2221_vm9, %v2222_v19, %v7747_v17  ;;  %v2378_v61 = vor.u32 8388608, %v2377_v4  ;;  %v2383_v60 = vshrl.u32 %v2382_v52, 5 }
 0x190   : > { %v2224_v29 = vadd.s32 %v2223_v5, %v2219_v59  ;;  %v2385_v47 = vsub.s32 32, %v2384_v35  ;;  %v2387_v48 = vshll.u32 %v9431_v18, %v2384_v35  ;;  %v2390_v1 = vshll.u32 %v9424_v20, %v2384_v35 }
 0x191   : > { %v5982_v25 = vadd.s32 4294967294, %v2129_v21  ;;  %v2393_v53 = vshll.u32 %v9422_v22, %v2384_v35  ;;  %v2270_v11 = vand.u32 2139095040, %v7759_v9  ;;  %v2396_v17 = vshll.u32 %v9420_v26, %v2384_v35 }
 0x192   : > { %v2225_v2 = vadd.s32 536870912, %v2224_v29  ;;  %v2388_v15 = vshrl.u32 %v9424_v20, %v2385_v47  ;;  %v2391_v32 = vshrl.u32 %v9422_v22, %v2385_v47  ;;  %v2394_v55 = vshrl.u32 %v9420_v26, %v2385_v47 }
 0x193   : > { %v2397_v4 = vshrl.u32 %v9440_v30, %v2385_v47  ;;  %v2399_v59 = vshll.u32 %v9440_v30, %v2384_v35  ;;  %v2400_v42 = vshrl.u32 %v9426_v40, %v2385_v47  ;;  %vm5983_vm11 = vcmp.lt.s32.totalorder %v5982_v25, 0 }
 0x194   : > { %v7787_v19 = vshrl.u32 %v2225_v2, 30  ;;  %v2389_v52 = vor.u32 %v2388_v15, %v2387_v48  ;;  %v2392_v21 = vor.u32 %v2391_v32, %v2390_v1  ;;  %v1934_v5 = vor.u32 4788187, %v1933_v44 }
 0x195   : > { %v7789_v13 = vshll.u32 %v2378_v61, 8  ;;  %v9428_v33 = vand.u32 2147483647, %v7759_v9  ;;  %v2271_v56 = vshrl.u32 %v2270_v11, 23  ;;  %v2395_v26 = vor.u32 %v2394_v55, %v2393_v53 }
 0x196   : > { %9506 = vst [vmem:[#allocation25_spill] sm:$0xff] %v7787_v19  ;;  %v2227_v45 = vshll.u32 %v7787_v19, 30  ;;  %v2398_v22 = vor.u32 %v2397_v4, %v2396_v17  ;;  %vm2402_vm12 = vcmp.lt.s32.totalorder %v2383_v60, 1  ;;  %v7793_v20 = vsel %vm5983_vm11, 0, %v5982_v25 }
 0x197   : > { %v2386_v35 = vshrl.u32 %v9431_v18, %v2385_v47  ;;  %v2401_v40 = vor.u32 %v2400_v42, %v2399_v59  ;;  %vm2404_vm13 = vcmp.lt.s32.totalorder %v2383_v60, 3  ;;  %vm2403_vm14 = vcmp.lt.s32.totalorder %v2383_v60, 2 }
 0x198   : > { %v7796_v2 = vsub.s32 %v2224_v29, %v2227_v45  ;;  %vm2405_vm15 = vcmp.lt.s32.totalorder %v2383_v60, 4  ;;  %v2410_v44 = vsel %vm2402_vm12, %v2389_v52, %v2392_v21  ;;  %v1930_v61 = vor.u32 %v1929_v43, %v1928_v36 }
 0x199   : > { %v2407_v48 = vsel %vm2405_vm15, %v2395_v26, 2102212464  ;;  %v2411_v1 = vsel %vm2405_vm15, %v2398_v22, 920167782  ;;  %v5988_v11 = vadd.s32 4294967169, %v2271_v56  ;;  %v2137_v53 = vsub.s32 4294967266, %v7793_v20 }
 0x19a   : > { %v2230_v15 = vsub.s32 0, %v7796_v2  ;;  %v2412_v25 = vsel %vm2404_vm13, %v2395_v26, %v2411_v1  ;;  %v2274_v47 = vand.u32 8388607, %v9428_v33  ;;  %v2406_v45 = vsel %vm2402_vm12, %v2386_v35, %v2389_v52 }
 0x19b   : > { %v2408_v29 = vsel %vm2404_vm13, %v2392_v21, %v2407_v48  ;;  %v2413_v32 = vsel %vm2403_vm14, %v2410_v44, %v2412_v25  ;;  %v2414_v36 = vsel %vm2402_vm12, %v2392_v21, %v2395_v26  ;;  %v2415_v56 = vsel %vm2405_vm15, %v2401_v40, 1326507024 }
 0x19c   : > { %v5985_v43 = vmin.u32 %v2230_v15, %v7796_v2  ;;  %v7810_v17 = vmul.u32.u64.low %v7789_v13, %v2413_v32  ;;  %v7811_v55 = vmul.u32.u64.high %v7789_v13, %v2413_v32, %v7810_v17  ;;  %v1935_v4 = vand.u32 2147483647, %v1934_v5  ;;  %v1571_v5 = vpop.permute.xlu1 %1570 }
 0x19d   : > { %v1937_v59 = vcvt.s32.f32 %v1930_v61  ;;  %v2117_v42 = vadd.s32 %v7695_v8, %v7702_v37  ;;  %v2416_v52 = vsel %vm2404_vm13, %v2398_v22, %v2415_v56  ;;  %v2409_v44 = vsel %vm2403_vm14, %v2406_v45, %v2408_v29 }
 0x19e   : > { %v2232_v35 = vclz %v5985_v43  ;;  %v2417_v26 = vsel %vm2403_vm14, %v2414_v36, %v2416_v52  ;;  %v2277_v21 = vadd.s32 1, %v5988_v11  ;;  %v2133_v40 = vsub.s32 32, %v7793_v20 }
 0x19f   : > { %v7820_v48 = vadd.s32 127, %v2137_v53  ;;  %v7823_v1 = vmul.u32.u64.low %v7789_v13, %v2417_v26  ;;  %v7824_v15 = vmul.u32.u64.high %v7789_v13, %v2417_v26, %v7823_v1  ;;  %v2428_v8 = vadd.s32 1, %v7811_v55 }
 0x1a0   : > { %v5986_v61 = vadd.s32 4294967294, %v2232_v35  ;;  %v2275_v37 = vor.u32 8388608, %v2274_v47  ;;  %vm2278_vm0 = vcmp.gt.s32.totalorder %v2277_v21, 0  ;;  %v7831_v22 = vmul.f32 %v2040_v39, %v2038_v49 }
 0x1a1   : > { %v7833_v60 = vmul.f32 %v1937_v59, %v1935_v4  ;;  %v2425_v11 = vmul.u32 %v7789_v13, %v2409_v44  ;;  %v2279_v53 = vsel %vm2278_vm0, %v2277_v21, 0  ;;  %v2220_v25 = vadd.s32 %v7746_v50, %v7753_v12 }
 0x1a2   : > { %v2281_v45 = vand.u32 31, %v2279_v53  ;;  %v7839_v29 = vmul.f32 6.2831855, %v7765_v10  ;;  %v7842_v47 = vmul.f32 %v7364_v27, %v1571_v5  ;;  %v7846_v16 = vshrl.u32 %v2117_v42, %v2133_v40  ;;  %v1481_v40 = vpop.permute.xlu0 %1480 }
 0x1a3   : > { %vm2427_vm1 = vc.u32 %v7824_v15, %v7810_v17  ;;  %vm5987_vm2 = vcmp.lt.s32.totalorder %v5986_v61, 0  ;;  %v7852_v50 = vshll.u32 %v2275_v37, 8  ;;  %v9507_v36 = vmov 2475754826  }
 0x1a4   : > { %v2429_v13 = vsel %vm2427_vm1, %v2428_v8, %v7811_v55  ;;  %v9439_v12 = vand.u32 2147483647, %v7839_v29  ;;  %v2282_v49 = vsub.s32 32, %v2281_v45  ;;  %v2284_v32 = vshll.u32 %v9431_v18, %v2281_v45 }
 0x1a5   : > { %v2430_v10 = vadd.s32 %v2429_v13, %v2425_v11  ;;  %v2287_v43 = vshll.u32 %v9507_v36, %v2281_v45  ;;  %v2280_v56 = vshrl.u32 %v2279_v53, 5  ;;  %v9508_v4 = vmov 2131351028  }
 0x1a6   : > { %v2290_v59 = vshll.u32 %v9508_v4, %v2281_v45  ;;  %v9509_v42 = vmov 2102212464   ;;  %v2476_v35 = vand.u32 2139095040, %v7839_v29  ;;  %v2235_v44 = vsel %vm5987_vm2, 0, %v5986_v61 }
 0x1a7   : > { %v2293_v52 = vshll.u32 %v9509_v42, %v2281_v45  ;;  %v2431_v26 = vadd.s32 536870912, %v2430_v10  ;;  %v2285_v55 = vshrl.u32 %v9507_v36, %v2282_v49  ;;  %v2288_v21 = vshrl.u32 %v9508_v4, %v2282_v49 }
 0x1a8   : > { %v2283_v1 = vshrl.u32 %v9431_v18, %v2282_v49  ;;  %v2291_v5 = vshrl.u32 %v9509_v42, %v2282_v49  ;;  %v2294_v8 = vshrl.u32 %v9440_v30, %v2282_v49  ;;  %v7867_v37 = vand.u32 8388607, %v9439_v12 }
 0x1a9   : > { %v7869_v11 = vshrl.u32 %v2431_v26, 30  ;;  %v2286_v53 = vor.u32 %v2285_v55, %v2284_v32  ;;  %v2289_v61 = vor.u32 %v2288_v21, %v2287_v43  ;;  %v2296_v13 = vshll.u32 %v9440_v30, %v2281_v45 }
 0x1aa   : > { %v2240_v33 = vsub.s32 4294967266, %v2235_v44  ;;  %v2292_v39 = vor.u32 %v2291_v5, %v2290_v59  ;;  %v2295_v46 = vor.u32 %v2294_v8, %v2293_v52  ;;  %v1526_v23 = vmul.f32 %v7367_v28, %v1481_v40 }
 0x1ab   : > { %9510 = vst [vmem:[#allocation26_spill] sm:$0xff] %v7869_v11  ;;  %v2236_v18 = vsub.s32 32, %v2235_v44  ;;  %v2433_v24 = vshll.u32 %v7869_v11, 30  ;;  %v9511_v19 = vmov 1326507024   ;;  %vm2299_vm3 = vcmp.lt.s32.totalorder %v2280_v56, 1 }
 0x1ac   : > { %v2297_v34 = vshrl.u32 %v9511_v19, %v2282_v49  ;;  %vm2300_vm4 = vcmp.lt.s32.totalorder %v2280_v56, 2  ;;  %vm2301_vm5 = vcmp.lt.s32.totalorder %v2280_v56, 3  ;;  %vm2302_vm6 = vcmp.lt.s32.totalorder %v2280_v56, 4 }
 0x1ad   : > { %v2303_v26 = vsel %vm2299_vm3, %v2283_v1, %v2286_v53  ;;  %v7875_v12 = vsub.s32 %v2430_v10, %v2433_v24  ;;  %v2304_v43 = vsel %vm2302_vm6, %v2292_v39, 2102212464  ;;  %v2307_v45 = vsel %vm2299_vm3, %v2286_v53, %v2289_v61  ;;  %v1575_v10 = vpop.permute.xlu0 %1574 }
 0x1ae   : > { %v2298_v32 = vor.u32 %v2297_v34, %v2296_v13  ;;  %v2241_v55 = vadd.s32 127, %v2240_v33  ;;  %v2305_v59 = vsel %vm2301_vm5, %v2289_v61, %v2304_v43  ;;  %v2308_v52 = vsel %vm2302_vm6, %v2295_v46, 920167782 }
 0x1af   : > { %v2311_v21 = vsel %vm2299_vm3, %v2289_v61, %v2292_v39  ;;  %v2237_v40 = vshll.u32 %v7796_v2, %v2235_v44  ;;  %v2436_v5 = vsub.s32 0, %v7875_v12  ;;  %v2309_v49 = vsel %vm2301_vm5, %v2292_v39, %v2308_v52 }
 0x1b0   : > { %v2312_v8 = vsel %vm2302_vm6, %v2298_v32, 1326507024  ;;  %v2238_v30 = vshrl.u32 %v2220_v25, %v2236_v18  ;;  %v2306_v1 = vsel %vm2300_vm4, %v2303_v26, %v2305_v59  ;;  %v2310_v24 = vsel %vm2300_vm4, %v2307_v45, %v2309_v49 }
 0x1b1   : > { %v2313_v34 = vsel %vm2301_vm5, %v2295_v46, %v2312_v8  ;;  %v5993_v33 = vmin.u32 %v2436_v5, %v7875_v12  ;;  %v7887_v61 = vmul.u32.u64.low %v7852_v50, %v2310_v24  ;;  %v7888_v2 = vmul.u32.u64.high %v7852_v50, %v2310_v24, %v7887_v61 }
 0x1b2   : > { %v2314_v53 = vsel %vm2300_vm4, %v2311_v21, %v2313_v34  ;;  %v2242_v44 = vshll.u32 %v2241_v55, 23  ;;  %v2477_v25 = vshrl.u32 %v2476_v35, 23  ;;  %v1626_v32 = vadd.f32 %v7842_v47, %v1526_v23 }
 0x1b3   : > { %v7892_v39 = vmul.u32.u64.low %v7852_v50, %v2314_v53  ;;  %v7893_v18 = vmul.u32.u64.high %v7852_v50, %v2314_v53, %v7892_v39  ;;  %v2438_v26 = vclz %v5993_v33  ;;  %v9512_v43 = vshll.u32 %v7742_v62, %v7793_v20 }
 0x1b4   : > { %v2322_v55 = vmul.u32 %v7852_v50, %v2306_v1  ;;  %v5996_v59 = vadd.s32 4294967169, %v2477_v25  ;;  %v9513_v35 = vshll.u32 %v7820_v48, 23  ;;  %v7910_v21 = vor.u32 %v2238_v30, %v2237_v40 }
 0x1b5   : > { %v7903_v45 = vor.u32 %v7846_v16, %v9512_v43  ;;  %v5994_v5 = vadd.s32 4294967294, %v2438_v26  ;;  %v2325_v23 = vadd.s32 1, %v7888_v2  ;;  %v7913_v47 = vor.u32 4788187, %v2242_v44  ;;  %v1486_v16 = vpop.permute.xlu0 %1485 }
 0x1b6   : > { %v7908_v52 = vor.u32 4788187, %v9513_v35  ;;  %vm2324_vm7 = vc.u32 %v7893_v18, %v7887_v61  ;;  %v2481_v20 = vor.u32 8388608, %v7867_v37  ;;  %v2483_v62 = vadd.s32 1, %v5996_v59 }
 0x1b7   : > { %v2326_v50 = vsel %vm2324_vm7, %v2325_v23, %v7888_v2  ;;  %v7919_v49 = vmul.f32 6.2831855, %v1626_v32  ;;  %v1611_v48 = vmul.f32 %v7364_v27, %v1575_v10  ;;  %v1527_v30 = vmul.f32 %v7367_v28, %v1486_v16 }
 0x1b8   : > { %vm5995_vm8 = vcmp.lt.s32.totalorder %v5994_v5, 0  ;;  %v2327_v8 = vadd.s32 %v2326_v50, %v2322_v55  ;;  %vm2484_vm9 = vcmp.gt.s32.totalorder %v2483_v62, 0  ;;  %v2426_v37 = vadd.s32 %v7810_v17, %v7824_v15 }
 0x1b9   : > { %9514 = vst [vmem:[#allocation27_spill] sm:$0xff] %v7919_v49  ;;  %v2485_v34 = vsel %vm2484_vm9, %v2483_v62, 0  ;;  %v7929_v10 = vshll.u32 %v2481_v20, 8  ;;  %v7931_v44 = vsel %vm5995_vm8, 0, %v5994_v5  ;;  %v2579_v25 = vand.u32 2139095040, %v7919_v49 }
 0x1ba   : > { %v2328_v53 = vadd.s32 536870912, %v2327_v8  ;;  %v2487_v2 = vand.u32 31, %v2485_v34  ;;  %v1627_v26 = vadd.f32 %v1611_v48, %v1527_v30  ;;  %v9516_v55 = vmov 683565275  }
 0x1bb   : > { %v2442_v15 = vsub.s32 32, %v7931_v44  ;;  %v2443_v35 = vshll.u32 %v7875_v12, %v7931_v44  ;;  %vm1754_vm11 = vcmp.lt.s32.totalorder %v7378_v51, 0  ;;  %vm1960_vm12 = vcmp.lt.s32.totalorder %v7421_v7, 0 }
 0x1bc   : > { %v7935_v32 = vshrl.u32 %v2328_v53, 30  ;;  %v2488_v43 = vsub.s32 32, %v2487_v2  ;;  %v2490_v59 = vshll.u32 %v9516_v55, %v2487_v2  ;;  %v2493_v17 = vshll.u32 %v9507_v36, %v2487_v2 }
 0x1bd   : > { %v2496_v5 = vshll.u32 %v9508_v4, %v2487_v2  ;;  %v2499_v23 = vshll.u32 %v9509_v42, %v2487_v2  ;;  %v2486_v62 = vshrl.u32 %v2485_v34, 5  ;;  %vm1857_vm13 = vcmp.lt.s32.totalorder %v7463_v63, 0 }
 0x1be   : > { %9515 = vst [vmem:[#allocation28_spill] sm:$0xff] %v7935_v32  ;;  %v2330_v20 = vshll.u32 %v7935_v32, 30  ;;  %v2491_v16 = vshrl.u32 %v9507_v36, %v2488_v43  ;;  %v2494_v50 = vshrl.u32 %v9508_v4, %v2488_v43  ;;  %v2446_v48 = vsub.s32 4294967266, %v7931_v44 }
 0x1bf   : > { %v2497_v12 = vshrl.u32 %v9509_v42, %v2488_v43  ;;  %v9517_v30 = vmov 920167782   ;;  %v2580_v24 = vshrl.u32 %v2579_v25, 23  ;;  %v2489_v34 = vshrl.u32 %v9516_v55, %v2488_v43 }
 0x1c0   : > { %v2500_v53 = vshrl.u32 %v9517_v30, %v2488_v43  ;;  %v7953_v33 = vsub.s32 %v2327_v8, %v2330_v20  ;;  %v2492_v40 = vor.u32 %v2491_v16, %v2490_v59  ;;  %v2495_v1 = vor.u32 %v2494_v50, %v2493_v17  ;;  %v1491_v17 = vpop.permute.xlu1 %1490 }
 0x1c1   : > { %v2502_v56 = vshll.u32 %v9517_v30, %v2487_v2  ;;  %v2498_v46 = vor.u32 %v2497_v12, %v2496_v5  ;;  %v2503_v39 = vshrl.u32 %v9511_v19, %v2488_v43  ;;  %v2444_v11 = vshrl.u32 %v2426_v37, %v2442_v15 }
 0x1c2   : > { %v2501_v13 = vor.u32 %v2500_v53, %v2499_v23  ;;  %v2333_v44 = vsub.s32 0, %v7953_v33  ;;  %vm2505_vm14 = vcmp.lt.s32.totalorder %v2486_v62, 1  ;;  %vm2507_vm15 = vcmp.lt.s32.totalorder %v2486_v62, 3 }
 0x1c3   : > { %v2447_v32 = vadd.s32 127, %v2446_v48  ;;  %v2504_v3 = vor.u32 %v2503_v39, %v2502_v56  ;;  %vm2506_vm0 = vcmp.lt.s32.totalorder %v2486_v62, 2  ;;  %vm2508_vm1 = vcmp.lt.s32.totalorder %v2486_v62, 4 }
 0x1c4   : > { %v5989_v8 = vmin.u32 %v2333_v44, %v7953_v33  ;;  %v2510_v25 = vsel %vm2508_vm1, %v2498_v46, 2102212464  ;;  %v2513_v59 = vsel %vm2505_vm14, %v2492_v40, %v2495_v1  ;;  %v2514_v2 = vsel %vm2508_vm1, %v2501_v13, 920167782 }
 0x1c5   : > { %v2509_v20 = vsel %vm2505_vm14, %v2489_v34, %v2492_v40  ;;  %v2511_v5 = vsel %vm2507_vm15, %v2495_v1, %v2510_v25  ;;  %v2515_v43 = vsel %vm2507_vm15, %v2498_v46, %v2514_v2  ;;  %v2517_v37 = vsel %vm2505_vm14, %v2495_v1, %v2498_v46 }
 0x1c6   : > { %v2335_v15 = vclz %v5989_v8  ;;  %v2516_v23 = vsel %vm2506_vm0, %v2513_v59, %v2515_v43  ;;  %v2518_v16 = vsel %vm2508_vm1, %v2504_v3, 1326507024  ;;  %v9518_v56 = vand.u32 2147483647, %v7919_v49 }
 0x1c7   : > { %v2448_v50 = vshll.u32 %v2447_v32, 23  ;;  %v2519_v48 = vsel %vm2507_vm15, %v2501_v13, %v2518_v16  ;;  %v7967_v12 = vmul.u32.u64.low %v7929_v10, %v2516_v23  ;;  %v7968_v53 = vmul.u32.u64.high %v7929_v10, %v2516_v23, %v7967_v12 }
 0x1c8   : > { %v2583_v39 = vand.u32 8388607, %v9518_v56  ;;  %v5990_v40 = vadd.s32 4294967294, %v2335_v15  ;;  %v2512_v34 = vsel %vm2506_vm0, %v2509_v20, %v2511_v5  ;;  %v2520_v46 = vsel %vm2506_vm0, %v2517_v37, %v2519_v48  ;;  %v1579_v20 = vpop.permute.xlu1 %1578 }
 0x1c9   : > { %v6000_v1 = vadd.s32 4294967169, %v2580_v24  ;;  %v9519_v3 = vxor.u32 2147483648, %v7645_v14  ;;  %v9520_v13 = vxor.u32 2147483648, %v7831_v22  ;;  %v9522_v24 = vxor.u32 2147483648, %v7833_v60 }
 0x1ca   : > { %v7988_v8 = vmul.u32.u64.low %v7929_v10, %v2520_v46  ;;  %v7989_v25 = vmul.u32.u64.high %v7929_v10, %v2520_v46, %v7988_v8  ;;  %v8000_v2 = vmul.f32 6.2831855, %v1627_v26  ;;  %v9525_v5 = vcvt.s32.f32 %v7903_v45 }
 0x1cb   : > { %v7978_v44 = vsel %vm1754_vm11, %v9519_v3, %v7645_v14  ;;  %v7985_v32 = vsel %vm1960_vm12, %v9520_v13, %v7831_v22  ;;  %v7996_v62 = vsel %vm1857_vm13, %v9522_v24, %v7833_v60  ;;  %v7998_v14 = vor.u32 %v2444_v11, %v2443_v35 }
 0x1cc   : > { %9521 = vst [vmem:[#allocation29_spill] sm:$0xff] %v7985_v32  ;;  %9523 = vst [vmem:[#allocation30_spill] sm:$0xff] %v7996_v62  ;;  %v2586_v59 = vadd.s32 1, %v6000_v1  ;;  %v9524_v22 = vand.u32 2147483647, %v7908_v52  ;;  %v9527_v15 = vcvt.s32.f32 %v7910_v21  ;;  %v2528_v60 = vmul.u32 %v7929_v10, %v2512_v34 }
 0x1cd   : > { %v9526_v37 = vand.u32 2147483647, %v7913_v47  ;;  %v2531_v11 = vadd.s32 1, %v7968_v53  ;;  %v8016_v35 = vor.u32 4788187, %v2448_v50  ;;  %vm5991_vm2 = vcmp.lt.s32.totalorder %v5990_v40, 0 }
 0x1ce   : > { %v8006_v43 = vmul.f32 %v9525_v5, %v9524_v22  ;;  %v2584_v26 = vor.u32 8388608, %v2583_v39  ;;  %vm2587_vm3 = vcmp.gt.s32.totalorder %v2586_v59, 0  ;;  %vm2530_vm4 = vc.u32 %v7989_v25, %v7967_v12 }
 0x1cf   : > { %v8012_v23 = vmul.f32 %v9527_v15, %v9526_v37  ;;  %v2588_v45 = vsel %vm2587_vm3, %v2586_v59, 0  ;;  %v8021_v52 = vmul.f32 %v7367_v28, %v1491_v17  ;;  %v8024_v21 = vmul.f32 %v7364_v27, %v1579_v20 }
 0x1d0   : > { %v2323_v10 = vadd.s32 %v7887_v61, %v7893_v18  ;;  %v2532_v16 = vsel %vm2530_vm4, %v2531_v11, %v7968_v53  ;;  %v2682_v56 = vand.u32 2139095040, %v8000_v2  ;;  %v8031_v39 = vsel %vm5991_vm2, 0, %v5990_v40 }
 0x1d1   : > { %v2533_v50 = vadd.s32 %v2532_v16, %v2528_v60  ;;  %v2589_v48 = vshrl.u32 %v2588_v45, 5  ;;  %v2590_v34 = vand.u32 31, %v2588_v45  ;;  %v2339_v46 = vsub.s32 32, %v8031_v39 }
 0x1d2   : > { %v8035_v1 = vshll.u32 %v2584_v26, 8  ;;  %v2343_v53 = vsub.s32 4294967266, %v8031_v39  ;;  %v2683_v59 = vshrl.u32 %v2682_v56, 23  ;;  %vm2063_vm4 = vcmp.lt.s32.totalorder %v7554_v58, 0 }
 0x1d3   : > { %v2534_v13 = vadd.s32 536870912, %v2533_v50  ;;  %v2591_v8 = vsub.s32 32, %v2590_v34  ;;  %v2593_v61 = vshll.u32 %v9516_v55, %v2590_v34  ;;  %v2596_v18 = vshll.u32 %v9507_v36, %v2590_v34 }
 0x1d4   : > { %v2599_v40 = vshll.u32 %v9508_v4, %v2590_v34  ;;  %v2602_v24 = vshll.u32 %v9509_v42, %v2590_v34  ;;  %vm2608_vm5 = vcmp.lt.s32.totalorder %v2589_v48, 1  ;;  %v2605_v11 = vshll.u32 %v9517_v30, %v2590_v34 }
 0x1d5   : > { %v8043_v20 = vshrl.u32 %v2534_v13, 30  ;;  %v2594_v22 = vshrl.u32 %v9507_v36, %v2591_v8  ;;  %v2597_v5 = vshrl.u32 %v9508_v4, %v2591_v8  ;;  %v2592_v37 = vshrl.u32 %v9516_v55, %v2591_v8 }
 0x1d6   : > { %v2600_v15 = vshrl.u32 %v9509_v42, %v2591_v8  ;;  %v2603_v60 = vshrl.u32 %v9517_v30, %v2591_v8  ;;  %v2606_v56 = vshrl.u32 %v9511_v19, %v2591_v8  ;;  %vm2610_vm6 = vcmp.lt.s32.totalorder %v2589_v48, 3 }
 0x1d7   : > { %9528 = vst [vmem:[#allocation31_spill] sm:$0xff] %v8043_v20  ;;  %v2536_v26 = vshll.u32 %v8043_v20, 30  ;;  %v2595_v45 = vor.u32 %v2594_v22, %v2593_v61  ;;  %v2598_v16 = vor.u32 %v2597_v5, %v2596_v18  ;;  %v6004_v17 = vadd.s32 4294967169, %v2683_v59 }
 0x1d8   : > { %v2601_v13 = vor.u32 %v2600_v15, %v2599_v40  ;;  %v2604_v47 = vor.u32 %v2603_v60, %v2602_v24  ;;  %v2607_v32 = vor.u32 %v2606_v56, %v2605_v11  ;;  %vm2609_vm7 = vcmp.lt.s32.totalorder %v2589_v48, 2 }
 0x1d9   : > { %v8053_v3 = vsub.s32 %v2533_v50, %v2536_v26  ;;  %vm2611_vm8 = vcmp.lt.s32.totalorder %v2589_v48, 4  ;;  %v2612_v7 = vsel %vm2608_vm5, %v2592_v37, %v2595_v45  ;;  %v2616_v34 = vsel %vm2608_vm5, %v2595_v45, %v2598_v16 }
 0x1da   : > { %v2613_v62 = vsel %vm2611_vm8, %v2601_v13, 2102212464  ;;  %v2617_v63 = vsel %vm2611_vm8, %v2604_v47, 920167782  ;;  %v2620_v40 = vsel %vm2608_vm5, %v2598_v16, %v2601_v13  ;;  %v2344_v24 = vadd.s32 127, %v2343_v53 }
 0x1db   : > { %v2539_v61 = vsub.s32 0, %v8053_v3  ;;  %v2614_v18 = vsel %vm2610_vm6, %v2598_v16, %v2613_v62  ;;  %v2618_v8 = vsel %vm2610_vm6, %v2601_v13, %v2617_v63  ;;  %v2621_v59 = vsel %vm2611_vm8, %v2607_v32, 1326507024 }
 0x1dc   : > { %v2619_v50 = vsel %vm2609_vm7, %v2616_v34, %v2618_v8  ;;  %v9529_v22 = vand.u32 2147483647, %v8000_v2  ;;  %v2622_v15 = vsel %vm2610_vm6, %v2604_v47, %v2621_v59  ;;  %v2340_v63 = vshll.u32 %v7953_v33, %v8031_v39  ;;  %v1496_v59 = vpop.permute.xlu1 %1495 }
 0x1dd   : > { %v5997_v37 = vmin.u32 %v2539_v61, %v8053_v3  ;;  %v8067_v60 = vmul.u32.u64.low %v8035_v1, %v2619_v50  ;;  %v8068_v11 = vmul.u32.u64.high %v8035_v1, %v2619_v50, %v8067_v60  ;;  %v2615_v62 = vsel %vm2609_vm7, %v2612_v7, %v2614_v18 }
 0x1de   : > { %v2686_v5 = vand.u32 8388607, %v9529_v22  ;;  %v2623_v53 = vsel %vm2609_vm7, %v2620_v40, %v2622_v15  ;;  %v2689_v32 = vadd.s32 1, %v6004_v17  ;;  %v2341_v26 = vshrl.u32 %v2323_v10, %v2339_v46 }
 0x1df   : > { %v2541_v45 = vclz %v5997_v37  ;;  %v8076_v16 = vmul.u32.u64.low %v8035_v1, %v2623_v53  ;;  %v8077_v56 = vmul.u32.u64.high %v8035_v1, %v2623_v53, %v8076_v16  ;;  %v2145_v47 = vxor.u32 2147483648, %v8006_v43 }
 0x1e0   : > { %v2345_v13 = vshll.u32 %v2344_v24, 23  ;;  %v2687_v34 = vor.u32 8388608, %v2686_v5  ;;  %vm2690_vm9 = vcmp.gt.s32.totalorder %v2689_v32, 0  ;;  %v2631_v8 = vmul.u32 %v8035_v1, %v2615_v62 }
 0x1e1   : > { %v5998_v61 = vadd.s32 4294967294, %v2541_v45  ;;  %v2634_v33 = vadd.s32 1, %v8068_v11  ;;  %v2691_v7 = vsel %vm2690_vm9, %v2689_v32, 0  ;;  %v9530_v10 = vand.u32 2147483647, %v8016_v35  ;;  %v8112_v32 = vpop.permute.xlu0 %1500 }
 0x1e2   : > { %v9531_v48 = vcvt.s32.f32 %v7998_v14  ;;  %v2529_v46 = vadd.s32 %v7967_v12, %v7989_v25  ;;  %v2693_v18 = vand.u32 31, %v2691_v7  ;;  %v8091_v40 = vor.u32 %v2341_v26, %v2340_v63 }
 0x1e3   : > { %vm5999_vm14 = vcmp.lt.s32.totalorder %v5998_v61, 0  ;;  %vm2633_vm15 = vc.u32 %v8077_v56, %v8067_v60  ;;  %v1628_v1 = vadd.f32 %v8024_v21, %v8021_v52  ;;  %v8097_v24 = vor.u32 4788187, %v2345_v13 }
 0x1e4   : > { %v8087_v17 = vmul.f32 %v9531_v48, %v9530_v10  ;;  %v2544_v35 = vsel %vm5999_vm14, 0, %v5998_v61  ;;  %v2635_v14 = vsel %vm2633_vm15, %v2634_v33, %v8068_v11  ;;  %v2694_v50 = vsub.s32 32, %v2693_v18 }
 0x1e5   : > { %v2549_v22 = vsub.s32 4294967266, %v2544_v35  ;;  %v2636_v5 = vadd.s32 %v2635_v14, %v2631_v8  ;;  %v8100_v12 = vshll.u32 %v2687_v34, 8  ;;  %v8103_v25 = vmul.f32 %v7367_v28, %v1496_v59 }
 0x1e6   : > { %v2696_v37 = vshll.u32 %v9516_v55, %v2693_v18  ;;  %v2697_v15 = vshrl.u32 %v9507_v36, %v2694_v50  ;;  %v2699_v52 = vshll.u32 %v9507_v36, %v2693_v18  ;;  %v2700_v21 = vshrl.u32 %v9508_v4, %v2694_v50 }
 0x1e7   : > { %v2637_v63 = vadd.s32 536870912, %v2636_v5  ;;  %v2692_v62 = vshrl.u32 %v2691_v7, 5  ;;  %v2702_v11 = vshll.u32 %v9508_v4, %v2693_v18  ;;  %v8110_v53 = vmul.f32 6.2831855, %v1628_v1 }
 0x1e8   : > { %v2545_v26 = vsub.s32 32, %v2544_v35  ;;  %v2546_v45 = vshll.u32 %v8053_v3, %v2544_v35  ;;  %v2703_v16 = vshrl.u32 %v9509_v42, %v2694_v50  ;;  %v2705_v13 = vshll.u32 %v9509_v42, %v2693_v18 }
 0x1e9   : > { %v2550_v34 = vadd.s32 127, %v2549_v22  ;;  %v8117_v61 = vshrl.u32 %v2637_v63, 30  ;;  %v2695_v8 = vshrl.u32 %v9516_v55, %v2694_v50  ;;  %v2706_v33 = vshrl.u32 %v9517_v30, %v2694_v50 }
 0x1ea   : > { %v2698_v7 = vor.u32 %v2697_v15, %v2696_v37  ;;  %v2701_v10 = vor.u32 %v2700_v21, %v2699_v52  ;;  %v2708_v48 = vshll.u32 %v9517_v30, %v2693_v18  ;;  %v2709_v1 = vshrl.u32 %v9511_v19, %v2694_v50  ;;  %v1506_v15 = vpop.permute.xlu0 %1505  ;;  %v1583_v52 = vpop.permute.xlu1 %1582 }
 0x1eb   : > { %9532 = vst [vmem:[#allocation32_spill] sm:$0xff] %v8117_v61  ;;  %v2639_v14 = vshll.u32 %v8117_v61, 30  ;;  %v2704_v3 = vor.u32 %v2703_v16, %v2702_v11  ;;  %v2707_v35 = vor.u32 %v2706_v33, %v2705_v13  ;;  %vm2711_vm0 = vcmp.lt.s32.totalorder %v2692_v62, 1 }
 0x1ec   : > { %v2547_v59 = vshrl.u32 %v2529_v46, %v2545_v26  ;;  %v2710_v39 = vor.u32 %v2709_v1, %v2708_v48  ;;  %vm2713_vm1 = vcmp.lt.s32.totalorder %v2692_v62, 3  ;;  %vm2714_vm2 = vcmp.lt.s32.totalorder %v2692_v62, 4 }
 0x1ed   : > { %v2551_v22 = vshll.u32 %v2550_v34, 23  ;;  %v8124_v63 = vsub.s32 %v2636_v5, %v2639_v14  ;;  %vm2712_vm3 = vcmp.lt.s32.totalorder %v2692_v62, 2  ;;  %v2716_v37 = vsel %vm2714_vm2, %v2704_v3, 2102212464 }
 0x1ee   : > { %vm9477_vm5 = vcmp.lt.s32.totalorder %v7624_v38, 0  ;;  %v2715_v18 = vsel %vm2711_vm0, %v2695_v8, %v2698_v7  ;;  %v2719_v50 = vsel %vm2711_vm0, %v2698_v7, %v2701_v10  ;;  %v2720_v46 = vsel %vm2714_vm2, %v2707_v35, 920167782 }
 0x1ef   : > { %v9453_v21 = vand.u32 2147483647, %v8110_v53  ;;  %vm9474_vm6 = vcmp.lt.s32.totalorder %v7691_v31, 0  ;;  %v2642_v5 = vsub.s32 0, %v8124_v63  ;;  %v2717_v11 = vsel %vm2713_vm1, %v2701_v10, %v2716_v37 }
 0x1f0   : > { %v2721_v26 = vsel %vm2713_vm1, %v2704_v3, %v2720_v46  ;;  %v2723_v16 = vsel %vm2711_vm0, %v2701_v10, %v2704_v3  ;;  %v2548_v13 = vor.u32 %v2547_v59, %v2546_v45  ;;  %v2724_v8 = vsel %vm2714_vm2, %v2710_v39, 1326507024 }
 0x1f1   : > { %v2722_v34 = vsel %vm2712_vm3, %v2719_v50, %v2721_v26  ;;  %v1613_v33 = vmul.f32 %v7364_v27, %v1583_v52  ;;  %v2552_v7 = vor.u32 4788187, %v2551_v22  ;;  %v6001_v48 = vmin.u32 %v2642_v5, %v8124_v63 }
 0x1f2   : > { %v2725_v1 = vsel %vm2713_vm1, %v2707_v35, %v2724_v8  ;;  %v2785_v14 = vand.u32 2139095040, %v8110_v53  ;;  %v2718_v37 = vsel %vm2712_vm3, %v2715_v18, %v2717_v11  ;;  %v2789_v22 = vand.u32 8388607, %v9453_v21  ;;  %v1591_v35 = vpop.permute.xlu0 %1590 }
 0x1f3   : > { %v2726_v46 = vsel %vm2712_vm3, %v2723_v16, %v2725_v1  ;;  %v8147_v10 = vmul.u32.u64.low %v8100_v12, %v2722_v34  ;;  %v8148_v45 = vmul.u32.u64.high %v8100_v12, %v2722_v34, %v8147_v10  ;;  %v2644_v3 = vclz %v6001_v48 }
 0x1f4   : > { %v8152_v39 = vmul.u32.u64.low %v8100_v12, %v2726_v46  ;;  %v8153_v59 = vmul.u32.u64.high %v8100_v12, %v2726_v46, %v8152_v39  ;;  %v2454_v52 = vxor.u32 2147483648, %v8087_v17  ;;  %v2349_v18 = vcvt.s32.f32 %v8091_v40 }
 0x1f5   : > { %v2786_v62 = vshrl.u32 %v2785_v14, 23  ;;  %v1629_v50 = vadd.f32 %v1613_v33, %v8103_v25  ;;  %v2347_v5 = vand.u32 2147483647, %v8097_v24  ;;  %v6002_v11 = vadd.s32 4294967294, %v2644_v3 }
 0x1f6   : > { %v2734_v26 = vmul.u32 %v8100_v12, %v2718_v37  ;;  %v1531_v16 = vmul.f32 %v7367_v28, %v1506_v15  ;;  %v2555_v34 = vcvt.s32.f32 %v2548_v13  ;;  %v2737_v8 = vadd.s32 1, %v8148_v45 }
 0x1f7   : > { %v6008_v48 = vadd.s32 4294967169, %v2786_v62  ;;  %v1615_v1 = vmul.f32 %v7364_v27, %v1591_v35  ;;  %v2553_v46 = vand.u32 2147483647, %v2552_v7  ;;  %vm6003_vm7 = vcmp.lt.s32.totalorder %v6002_v11, 0 }
 0x1f8   : > { %vm2736_vm8 = vc.u32 %v8153_v59, %v8147_v10  ;;  %v2790_v40 = vor.u32 8388608, %v2789_v22  ;;  %v2647_v25 = vsel %vm6003_vm7, 0, %v6002_v11  ;;  %v8168_v14 = vmul.f32 6.2831855, %v1629_v50 }
 0x1f9   : > { %v2738_v24 = vsel %vm2736_vm8, %v2737_v8, %v8148_v45  ;;  %v2792_v33 = vadd.s32 1, %v6008_v48  ;;  %v8175_v12 = vsel %vm2063_vm4, %v2145_v47, %v8006_v43  ;;  %v9533_v15 = vxor.u32 2147483648, %v8012_v23 }
 0x1fa   : > { %v2652_v7 = vsub.s32 4294967266, %v2647_v25  ;;  %v2739_v37 = vadd.s32 %v2738_v24, %v2734_v26  ;;  %v8187_v45 = vsel %vm9474_vm6, %v2454_v52, %v8087_v17  ;;  %v8189_v3 = vmul.f32 %v2349_v18, %v2347_v5 }
 0x1fb   : > { %v8182_v13 = vsel %vm9477_vm5, %v9533_v15, %v8012_v23  ;;  %9535 = vst [vmem:[#allocation34_spill] sm:$0xff] %v8187_v45  ;;  %vm2793_vm9 = vcmp.gt.s32.totalorder %v2792_v33, 0  ;;  %v9452_v43 = vand.u32 2147483647, %v8168_v14  ;;  %v8192_v47 = vmul.f32 %v2555_v34, %v2553_v46 }
 0x1fc   : > { %9534 = vst [vmem:[#allocation33_spill] sm:$0xff] %v8182_v13  ;;  %v2632_v39 = vadd.s32 %v8067_v60, %v8077_v56  ;;  %v2740_v22 = vadd.s32 536870912, %v2739_v37  ;;  %v2794_v23 = vsel %vm2793_vm9, %v2792_v33, 0  ;;  %v2648_v35 = vsub.s32 32, %v2647_v25 }
 0x1fd   : > { %v2796_v62 = vand.u32 31, %v2794_v23  ;;  %v8196_v50 = vshll.u32 %v2790_v40, 8  ;;  %v1631_v11 = vadd.f32 %v1615_v1, %v1531_v16  ;;  %v2649_v17 = vshll.u32 %v8124_v63, %v2647_v25 }
 0x1fe   : > { %v2653_v52 = vadd.s32 127, %v2652_v7  ;;  %v8199_v18 = vshrl.u32 %v2740_v22, 30  ;;  %v2888_v5 = vand.u32 2139095040, %v8168_v14  ;;  %v8206_v60 = vand.u32 8388607, %v9452_v43 }
 0x1ff   : > { %v2797_v26 = vsub.s32 32, %v2796_v62  ;;  %v2799_v34 = vshll.u32 %v9516_v55, %v2796_v62  ;;  %v2802_v8 = vshll.u32 %v9507_v36, %v2796_v62  ;;  %v2795_v48 = vshrl.u32 %v2794_v23, 5 }
 0x200   : > { %9536 = vst [vmem:[#allocation35_spill] sm:$0xff] %v8199_v18  ;;  %v2742_v56 = vshll.u32 %v8199_v18, 30  ;;  %v2805_v16 = vshll.u32 %v9508_v4, %v2796_v62  ;;  %v2808_v63 = vshll.u32 %v9509_v42, %v2796_v62  ;;  %v2650_v1 = vshrl.u32 %v2632_v39, %v2648_v35 }
 0x201   : > { %v2800_v46 = vshrl.u32 %v9507_v36, %v2797_v26  ;;  %v2803_v40 = vshrl.u32 %v9508_v4, %v2797_v26  ;;  %v2806_v25 = vshrl.u32 %v9509_v42, %v2797_v26  ;;  %v2654_v24 = vshll.u32 %v2653_v52, 23 }
 0x202   : > { %v8214_v33 = vsub.s32 %v2739_v37, %v2742_v56  ;;  %v2809_v15 = vshrl.u32 %v9517_v30, %v2797_v26  ;;  %v2811_v7 = vshll.u32 %v9517_v30, %v2796_v62  ;;  %v2798_v22 = vshrl.u32 %v9516_v55, %v2797_v26 }
 0x203   : > { %v2801_v23 = vor.u32 %v2800_v46, %v2799_v34  ;;  %v2804_v43 = vor.u32 %v2803_v40, %v2802_v8  ;;  %v2812_v21 = vshrl.u32 %v9511_v19, %v2797_v26  ;;  %v2807_v35 = vor.u32 %v2806_v25, %v2805_v16 }
 0x204   : > { %v2745_v39 = vsub.s32 0, %v8214_v33  ;;  %v2810_v18 = vor.u32 %v2809_v15, %v2808_v63  ;;  %vm2814_vm14 = vcmp.lt.s32.totalorder %v2795_v48, 1  ;;  %vm2816_vm15 = vcmp.lt.s32.totalorder %v2795_v48, 3 }
 0x205   : > { %v2813_v61 = vor.u32 %v2812_v21, %v2811_v7  ;;  %vm2817_vm0 = vcmp.lt.s32.totalorder %v2795_v48, 4  ;;  %v2889_v37 = vshrl.u32 %v2888_v5, 23  ;;  %v2651_v52 = vor.u32 %v2650_v1, %v2649_v17 }
 0x206   : > { %v6005_v56 = vmin.u32 %v2745_v39, %v8214_v33  ;;  %vm2815_vm1 = vcmp.lt.s32.totalorder %v2795_v48, 2  ;;  %v2819_v62 = vsel %vm2817_vm0, %v2807_v35, 2102212464  ;;  %v2655_v20 = vor.u32 4788187, %v2654_v24 }
 0x207   : > { %v2818_v34 = vsel %vm2814_vm14, %v2798_v22, %v2801_v23  ;;  %v2822_v8 = vsel %vm2814_vm14, %v2801_v23, %v2804_v43  ;;  %v2823_v26 = vsel %vm2817_vm0, %v2810_v18, 920167782  ;;  %v2820_v16 = vsel %vm2816_vm15, %v2804_v43, %v2819_v62  ;;  %v1587_v22 = vpop.permute.xlu1 %1586 }
 0x208   : > { %v2747_v46 = vclz %v6005_v56  ;;  %v2824_v63 = vsel %vm2816_vm15, %v2807_v35, %v2823_v26  ;;  %v2826_v21 = vsel %vm2814_vm14, %v2804_v43, %v2807_v35  ;;  %v2827_v17 = vsel %vm2817_vm0, %v2813_v61, 1326507024 }
 0x209   : > { %v2825_v5 = vsel %vm2815_vm1, %v2822_v8, %v2824_v63  ;;  %v6012_v1 = vadd.s32 4294967169, %v2889_v37  ;;  %v8228_v40 = vmul.f32 6.2831855, %v1631_v11  ;;  %v2828_v24 = vsel %vm2816_vm15, %v2810_v18, %v2827_v17 }
 0x20a   : > { %v6006_v25 = vadd.s32 4294967294, %v2747_v46  ;;  %v8232_v15 = vmul.u32.u64.low %v8196_v50, %v2825_v5  ;;  %v8233_v7 = vmul.u32.u64.high %v8196_v50, %v2825_v5, %v8232_v15  ;;  %v2821_v23 = vsel %vm2815_vm1, %v2818_v34, %v2820_v16 }
 0x20b   : > { %v2829_v39 = vsel %vm2815_vm1, %v2826_v21, %v2828_v24  ;;  %v2893_v43 = vor.u32 8388608, %v8206_v60  ;;  %v2895_v35 = vadd.s32 1, %v6012_v1  ;;  %v2656_v61 = vand.u32 2147483647, %v2655_v20 }
 0x20c   : > { %v2658_v37 = vcvt.s32.f32 %v2651_v52  ;;  %v8240_v11 = vmul.u32.u64.low %v8196_v50, %v2829_v39  ;;  %v8241_v56 = vmul.u32.u64.high %v8196_v50, %v2829_v39, %v8240_v11  ;;  %vm6007_vm2 = vcmp.lt.s32.totalorder %v6006_v25, 0  ;;  %v1511_v52 = vpop.permute.xlu1 %1510 }
 0x20d   : > { %vm2896_vm3 = vcmp.gt.s32.totalorder %v2895_v35, 0  ;;  %v9460_v62 = vand.u32 2147483647, %v8228_v40  ;;  %v2837_v8 = vmul.u32 %v8196_v50, %v2821_v23  ;;  %v2840_v48 = vadd.s32 1, %v8233_v7 }
 0x20e   : > { %v1530_v60 = vmul.f32 %v7367_v28, %v8112_v32  ;;  %v1614_v20 = vmul.f32 %v7364_v27, %v1587_v22  ;;  %v2735_v26 = vadd.s32 %v8147_v10, %v8153_v59  ;;  %v2897_v46 = vsel %vm2896_vm3, %v2895_v35, 0 }
 0x20f   : > { %v8254_v16 = vmul.f32 %v7367_v28, %v1511_v52  ;;  %v8256_v63 = vmul.f32 %v2658_v37, %v2656_v61  ;;  %v2750_v50 = vsel %vm6007_vm2, 0, %v6006_v25  ;;  %vm2839_vm7 = vc.u32 %v8241_v56, %v8232_v15 }
 0x210   : > { %v8260_v21 = vshll.u32 %v2893_v43, 8  ;;  %v2841_v32 = vsel %vm2839_vm7, %v2840_v48, %v8233_v7  ;;  %v2899_v5 = vand.u32 31, %v2897_v46  ;;  %v3094_v17 = vand.u32 2139095040, %v8228_v40 }
 0x211   : > { %v8266_v10 = vand.u32 8388607, %v9460_v62  ;;  %v2751_v59 = vsub.s32 32, %v2750_v50  ;;  %v2752_v28 = vshll.u32 %v8214_v33, %v2750_v50  ;;  %v2842_v1 = vadd.s32 %v2841_v32, %v2837_v8 }
 0x212   : > { %v1630_v24 = vadd.f32 %v1614_v20, %v1530_v60  ;;  %v2755_v25 = vsub.s32 4294967266, %v2750_v50  ;;  %v2900_v22 = vsub.s32 32, %v2899_v5  ;;  %v2902_v23 = vshll.u32 %v9516_v55, %v2899_v5 }
 0x213   : > { %v2905_v39 = vshll.u32 %v9507_v36, %v2899_v5  ;;  %v2843_v43 = vadd.s32 536870912, %v2842_v1  ;;  %v2898_v7 = vshrl.u32 %v2897_v46, 5  ;;  %v2908_v35 = vshll.u32 %v9508_v4, %v2899_v5 }
 0x214   : > { %v2911_v61 = vshll.u32 %v9509_v42, %v2899_v5  ;;  %v2903_v37 = vshrl.u32 %v9507_v36, %v2900_v22  ;;  %v2906_v11 = vshrl.u32 %v9508_v4, %v2900_v22  ;;  %v2909_v33 = vshrl.u32 %v9509_v42, %v2900_v22 }
 0x215   : > { %v3095_v8 = vshrl.u32 %v3094_v17, 23  ;;  %v2753_v48 = vshrl.u32 %v2735_v26, %v2751_v59  ;;  %v8276_v60 = vshrl.u32 %v2843_v43, 30  ;;  %v2912_v20 = vshrl.u32 %v9517_v30, %v2900_v22 }
 0x216   : > { %v2914_v52 = vshll.u32 %v9517_v30, %v2899_v5  ;;  %v2901_v46 = vshrl.u32 %v9516_v55, %v2900_v22  ;;  %v2904_v50 = vor.u32 %v2903_v37, %v2902_v23  ;;  %v2907_v32 = vor.u32 %v2906_v11, %v2905_v39 }
 0x217   : > { %9537 = vst [vmem:[#allocation36_spill] sm:$0xff] %v8276_v60  ;;  %v2915_v62 = vshrl.u32 %v9511_v19, %v2900_v22  ;;  %v2845_v34 = vshll.u32 %v8276_v60, 30  ;;  %v2910_v18 = vor.u32 %v2909_v33, %v2908_v35  ;;  %v2913_v45 = vor.u32 %v2912_v20, %v2911_v61 }
 0x218   : > { %vm2917_vm8 = vcmp.lt.s32.totalorder %v2898_v7, 1  ;;  %vm2919_vm9 = vcmp.lt.s32.totalorder %v2898_v7, 3  ;;  %vm2920_vm14 = vcmp.lt.s32.totalorder %v2898_v7, 4  ;;  %v6020_v26 = vadd.s32 4294967169, %v3095_v8 }
 0x219   : > { %v2916_v31 = vor.u32 %v2915_v62, %v2914_v52  ;;  %v8283_v17 = vsub.s32 %v2842_v1, %v2845_v34  ;;  %vm2918_vm15 = vcmp.lt.s32.totalorder %v2898_v7, 2  ;;  %v2922_v5 = vsel %vm2920_vm14, %v2910_v18, 2102212464  ;;  %v1595_v52 = vpop.permute.xlu1 %1594 }
 0x21a   : > { %v3099_v59 = vor.u32 8388608, %v8266_v10  ;;  %v2756_v23 = vadd.s32 127, %v2755_v25  ;;  %v2921_v39 = vsel %vm2917_vm8, %v2901_v46, %v2904_v50  ;;  %v2925_v22 = vsel %vm2917_vm8, %v2904_v50, %v2907_v32 }
 0x21b   : > { %v2926_v43 = vsel %vm2920_vm14, %v2913_v45, 920167782  ;;  %v2848_v35 = vsub.s32 0, %v8283_v17  ;;  %v2923_v62 = vsel %vm2919_vm9, %v2907_v32, %v2922_v5  ;;  %v2929_v34 = vsel %vm2917_vm8, %v2907_v32, %v2910_v18 }
 0x21c   : > { %v2927_v61 = vsel %vm2919_vm9, %v2910_v18, %v2926_v43  ;;  %v8294_v1 = vor.u32 %v2753_v48, %v2752_v28  ;;  %v2930_v10 = vsel %vm2920_vm14, %v2916_v31, 1326507024  ;;  %v3101_v25 = vadd.s32 1, %v6020_v26 }
 0x21d   : > { %v2928_v37 = vsel %vm2918_vm15, %v2925_v22, %v2927_v61  ;;  %v6009_v11 = vmin.u32 %v2848_v35, %v8283_v17  ;;  %v2931_v33 = vsel %vm2919_vm9, %v2913_v45, %v2930_v10  ;;  %v2757_v46 = vshll.u32 %v2756_v23, 23 }
 0x21e   : > { %v8301_v8 = vmul.u32.u64.low %v8260_v21, %v2928_v37  ;;  %v8302_v20 = vmul.u32.u64.high %v8260_v21, %v2928_v37, %v8301_v8  ;;  %v2924_v18 = vsel %vm2918_vm15, %v2921_v39, %v2923_v62  ;;  %v2932_v28 = vsel %vm2918_vm15, %v2929_v34, %v2931_v33 }
 0x21f   : > { %vm3102_vm0 = vcmp.gt.s32.totalorder %v3101_v25, 0  ;;  %v2850_v48 = vclz %v6009_v11  ;;  %v8308_v31 = vmul.u32.u64.low %v8260_v21, %v2932_v28  ;;  %v8309_v50 = vmul.u32.u64.high %v8260_v21, %v2932_v28, %v8308_v31 }
 0x220   : > { %v3103_v32 = vsel %vm3102_vm0, %v3101_v25, 0  ;;  %v8312_v5 = vmul.f32 6.2831855, %v1630_v24  ;;  %v8315_v22 = vmul.f32 %v7364_v27, %v1595_v52  ;;  %v2838_v23 = vadd.s32 %v8232_v15, %v8241_v56 }
 0x221   : > { %v3105_v26 = vand.u32 31, %v3103_v32  ;;  %v6010_v7 = vadd.s32 4294967294, %v2850_v48  ;;  %v2940_v39 = vmul.u32 %v8260_v21, %v2924_v18  ;;  %v2943_v43 = vadd.s32 1, %v8302_v20 }
 0x222   : > { %v8321_v35 = vor.u32 4788187, %v2757_v46  ;;  %v8324_v34 = vshll.u32 %v3099_v59, 8  ;;  %vm2942_vm2 = vc.u32 %v8309_v50, %v8301_v8  ;;  %v3104_v25 = vshrl.u32 %v3103_v32, 5 }
 0x223   : > { %v3106_v61 = vsub.s32 32, %v3105_v26  ;;  %vm6011_vm1 = vcmp.lt.s32.totalorder %v6010_v7, 0  ;;  %v3108_v27 = vshll.u32 %v9516_v55, %v3105_v26  ;;  %v3111_v15 = vshll.u32 %v9507_v36, %v3105_v26 }
 0x224   : > { %v8330_v56 = vsel %vm6011_vm1, 0, %v6010_v7  ;;  %v2944_v21 = vsel %vm2942_vm2, %v2943_v43, %v8302_v20  ;;  %v3117_v37 = vshll.u32 %v9509_v42, %v3105_v26  ;;  %v3114_v59 = vshll.u32 %v9508_v4, %v3105_v26 }
 0x225   : > { %v3109_v24 = vshrl.u32 %v9507_v36, %v3106_v61  ;;  %v2945_v10 = vadd.s32 %v2944_v21, %v2940_v39  ;;  %v9465_v11 = vand.u32 2147483647, %v8312_v5  ;;  %v3112_v33 = vshrl.u32 %v9508_v4, %v3106_v61 }
 0x226   : > { %v3115_v52 = vshrl.u32 %v9509_v42, %v3106_v61  ;;  %v3118_v46 = vshrl.u32 %v9517_v30, %v3106_v61  ;;  %v2991_v18 = vand.u32 2139095040, %v8312_v5  ;;  %vm9476_vm3 = vcmp.lt.s32.totalorder %v7759_v9, 0 }
 0x227   : > { %vm9473_vm7 = vcmp.lt.s32.totalorder %v7839_v29, 0  ;;  %v2858_v20 = vsub.s32 4294967266, %v8330_v56  ;;  %v2946_v28 = vadd.s32 536870912, %v2945_v10  ;;  %v3107_v48 = vshrl.u32 %v9516_v55, %v3106_v61 }
 0x228   : > { %v3120_v31 = vshll.u32 %v9517_v30, %v3105_v26  ;;  %v3110_v32 = vor.u32 %v3109_v24, %v3108_v27  ;;  %v3113_v7 = vor.u32 %v3112_v33, %v3111_v15  ;;  %v3119_v39 = vor.u32 %v3118_v46, %v3117_v37 }
 0x229   : > { %v3121_v43 = vshrl.u32 %v9511_v19, %v3106_v61  ;;  %vm9472_vm8 = vcmp.lt.s32.totalorder %v7919_v49, 0  ;;  %v8348_v21 = vshrl.u32 %v2946_v28, 30  ;;  %v3116_v62 = vor.u32 %v3115_v52, %v3114_v59 }
 0x22a   : > { %vm3123_vm9 = vcmp.lt.s32.totalorder %v3104_v25, 1  ;;  %v2995_v45 = vand.u32 8388607, %v9465_v11  ;;  %v2854_v60 = vsub.s32 32, %v8330_v56  ;;  %vm3125_vm14 = vcmp.lt.s32.totalorder %v3104_v25, 3 }
 0x22b   : > { %9538 = vst [vmem:[#allocation37_spill] sm:$0xff] %v8348_v21  ;;  %v3122_v13 = vor.u32 %v3121_v43, %v3120_v31  ;;  %vm3126_vm15 = vcmp.lt.s32.totalorder %v3104_v25, 4  ;;  %v2855_v26 = vshll.u32 %v8283_v17, %v8330_v56  ;;  %v2859_v27 = vadd.s32 127, %v2858_v20 }
 0x22c   : > { %v2948_v61 = vshll.u32 %v8348_v21, 30  ;;  %vm3124_vm0 = vcmp.lt.s32.totalorder %v3104_v25, 2  ;;  %v3127_v15 = vsel %vm3123_vm9, %v3107_v48, %v3110_v32  ;;  %v3128_v24 = vsel %vm3126_vm15, %v3116_v62, 2102212464 }
 0x22d   : > { %v3131_v37 = vsel %vm3123_vm9, %v3110_v32, %v3113_v7  ;;  %v3132_v59 = vsel %vm3126_vm15, %v3119_v39, 920167782  ;;  %v3129_v52 = vsel %vm3125_vm14, %v3113_v7, %v3128_v24  ;;  %v3135_v28 = vsel %vm3123_vm9, %v3113_v7, %v3116_v62 }
 0x22e   : > { %v8358_v33 = vsub.s32 %v2945_v10, %v2948_v61  ;;  %v3133_v46 = vsel %vm3125_vm14, %v3116_v62, %v3132_v59  ;;  %v2856_v31 = vshrl.u32 %v2838_v23, %v2854_v60  ;;  %v3136_v56 = vsel %vm3126_vm15, %v3122_v13, 1326507024 }
 0x22f   : > { %v3134_v17 = vsel %vm3124_vm0, %v3131_v37, %v3133_v46  ;;  %v2992_v20 = vshrl.u32 %v2991_v18, 23  ;;  %v2860_v43 = vshll.u32 %v2859_v27, 23  ;;  %v3130_v11 = vsel %vm3124_vm0, %v3127_v15, %v3129_v52 }
 0x230   : > { %v2951_v48 = vsub.s32 0, %v8358_v33  ;;  %v3137_v32 = vsel %vm3125_vm14, %v3119_v39, %v3136_v56  ;;  %v8369_v61 = vmul.u32.u64.low %v8324_v34, %v3134_v17  ;;  %v8370_v24 = vmul.u32.u64.high %v8324_v34, %v3134_v17, %v8369_v61 }
 0x231   : > { %v3138_v10 = vsel %vm3124_vm0, %v3135_v28, %v3137_v32  ;;  %v6016_v62 = vadd.s32 4294967169, %v2992_v20  ;;  %v2759_v60 = vand.u32 2147483647, %v8321_v35  ;;  %v9539_v7 = vxor.u32 2147483648, %v8189_v3 }
 0x232   : > { %v6013_v13 = vmin.u32 %v2951_v48, %v8358_v33  ;;  %v8376_v23 = vmul.u32.u64.low %v8324_v34, %v3138_v10  ;;  %v8377_v18 = vmul.u32.u64.high %v8324_v34, %v3138_v10, %v8376_v23  ;;  %v9540_v39 = vxor.u32 2147483648, %v8192_v47 }
 0x233   : > { %v8384_v25 = vsel %vm9476_vm3, %v9539_v7, %v8189_v3  ;;  %v2998_v35 = vadd.s32 1, %v6016_v62  ;;  %v1632_v15 = vadd.f32 %v8315_v22, %v8254_v16  ;;  %v8395_v37 = vor.u32 %v2856_v31, %v2855_v26 }
 0x234   : > { %v8391_v27 = vsel %vm9473_vm7, %v9540_v39, %v8192_v47  ;;  %v8397_v59 = vor.u32 4788187, %v2860_v43  ;;  %v2953_v52 = vclz %v6013_v13  ;;  %v3146_v46 = vmul.u32 %v8324_v34, %v3130_v11 }
 0x235   : > { %v9541_v3 = vxor.u32 2147483648, %v8256_v63  ;;  %v3149_v47 = vadd.s32 1, %v8370_v24  ;;  %v2996_v17 = vor.u32 8388608, %v2995_v45  ;;  %vm2999_vm1 = vcmp.gt.s32.totalorder %v2998_v35, 0 }
 0x236   : > { %v9543_v16 = vcvt.s32.f32 %v8294_v1  ;;  %v6014_v26 = vadd.s32 4294967294, %v2953_v52  ;;  %vm3148_vm2 = vc.u32 %v8377_v18, %v8369_v61  ;;  %v3000_v34 = vsel %vm2999_vm1, %v2998_v35, 0 }
 0x237   : > { %v8405_v28 = vsel %vm9472_vm8, %v9541_v3, %v8256_v63  ;;  %v2941_v11 = vadd.s32 %v8301_v8, %v8309_v50  ;;  %v3150_v31 = vsel %vm3148_vm2, %v3149_v47, %v8370_v24  ;;  %v3002_v63 = vand.u32 31, %v3000_v34 }
 0x238   : > { %9542 = vst [vmem:[#allocation38_spill] sm:$0xff] %v8405_v28  ;;  %v8410_v22 = vmul.f32 %v9543_v16, %v2759_v60  ;;  %v8417_v56 = vmul.f32 6.2831855, %v1632_v15  ;;  %vm6015_vm9 = vcmp.lt.s32.totalorder %v6014_v26, 0  ;;  %v3151_v1 = vadd.s32 %v3150_v31, %v3146_v46 }
 0x239   : > { %v2956_v43 = vsel %vm6015_vm9, 0, %v6014_v26  ;;  %v3003_v48 = vsub.s32 32, %v3002_v63  ;;  %v8421_v32 = vshll.u32 %v2996_v17, 8  ;;  %v3005_v8 = vshll.u32 %v9516_v55, %v3002_v63 }
 0x23a   : > { %v2961_v62 = vsub.s32 4294967266, %v2956_v43  ;;  %v3152_v60 = vadd.s32 536870912, %v3151_v1  ;;  %v3008_v50 = vshll.u32 %v9507_v36, %v3002_v63  ;;  %v3001_v24 = vshrl.u32 %v3000_v34, 5 }
 0x23b   : > { %v3006_v13 = vshrl.u32 %v9507_v36, %v3003_v48  ;;  %v3009_v23 = vshrl.u32 %v9508_v4, %v3003_v48  ;;  %v3011_v7 = vshll.u32 %v9508_v4, %v3002_v63  ;;  %v2957_v39 = vsub.s32 32, %v2956_v43 }
 0x23c   : > { %v2962_v35 = vadd.s32 127, %v2961_v62  ;;  %v8429_v15 = vshrl.u32 %v3152_v60, 30  ;;  %v3012_v52 = vshrl.u32 %v9509_v42, %v3003_v48  ;;  %v3004_v46 = vshrl.u32 %v9516_v55, %v3003_v48 }
 0x23d   : > { %v3014_v3 = vshll.u32 %v9509_v42, %v3002_v63  ;;  %v3015_v47 = vshrl.u32 %v9517_v30, %v3003_v48  ;;  %v3197_v17 = vand.u32 2139095040, %v8417_v56  ;;  %v3007_v26 = vor.u32 %v3006_v13, %v3005_v8 }
 0x23e   : > { %9544 = vst [vmem:[#allocation39_spill] sm:$0xff] %v8429_v15  ;;  %v3154_v16 = vshll.u32 %v8429_v15, 30  ;;  %v3010_v34 = vor.u32 %v3009_v23, %v3008_v50  ;;  %v3013_v31 = vor.u32 %v3012_v52, %v3011_v7  ;;  %v9545_v20 = vand.u32 2147483647, %v7372_v41 }
 0x23f   : > { %v3016_v60 = vor.u32 %v3015_v47, %v3014_v3  ;;  %v3017_v45 = vshll.u32 %v9517_v30, %v3002_v63  ;;  %v3018_v10 = vshrl.u32 %v9511_v19, %v3003_v48  ;;  %vm3020_vm15 = vcmp.lt.s32.totalorder %v3001_v24, 1 }
 0x240   : > { %vm8439_vm14 = vcmp.le.f32.partialorder %v9545_v20, 0.7853982  ;;  %v2958_v21 = vshll.u32 %v8358_v33, %v2956_v43  ;;  %v2959_v28 = vshrl.u32 %v2941_v11, %v2957_v39  ;;  %v2963_v49 = vshll.u32 %v2962_v35, 23 }
 0x241   : > { %v8446_v15 = vsub.s32 %v3151_v1, %v3154_v16  ;;  %v3019_v8 = vor.u32 %v3018_v10, %v3017_v45  ;;  %vm3021_vm0 = vcmp.lt.s32.totalorder %v3001_v24, 2  ;;  %vm3022_vm1 = vcmp.lt.s32.totalorder %v3001_v24, 3 }
 0x242   : > { %vm3023_vm2 = vcmp.lt.s32.totalorder %v3001_v24, 4  ;;  %v3024_v50 = vsel %vm3020_vm15, %v3004_v46, %v3007_v26  ;;  %v3028_v23 = vsel %vm3020_vm15, %v3007_v26, %v3010_v34  ;;  %v3032_v52 = vsel %vm3020_vm15, %v3010_v34, %v3013_v31 }
 0x243   : > { %v3157_v20 = vsub.s32 0, %v8446_v15  ;;  %v3025_v13 = vsel %vm3023_vm2, %v3013_v31, 2102212464  ;;  %v3029_v63 = vsel %vm3023_vm2, %v3016_v60, 920167782  ;;  %v2960_v3 = vor.u32 %v2959_v28, %v2958_v21 }
 0x244   : > { %v3026_v7 = vsel %vm3022_vm1, %v3010_v34, %v3025_v13  ;;  %v3033_v48 = vsel %vm3023_vm2, %v3019_v8, 1326507024  ;;  %v2964_v47 = vor.u32 4788187, %v2963_v49  ;;  %v3030_v11 = vsel %vm3022_vm1, %v3013_v31, %v3029_v63 }
 0x245   : > { %v6021_v33 = vmin.u32 %v3157_v20, %v8446_v15  ;;  %v3031_v1 = vsel %vm3021_vm0, %v3028_v23, %v3030_v11  ;;  %v3034_v45 = vsel %vm3022_vm1, %v3016_v60, %v3033_v48  ;;  %v3198_v43 = vshrl.u32 %v3197_v17, 23 }
 0x246   : > { %v9548_v10 = vand.u32 2147483647, %v8417_v56  ;;  %v3027_v46 = vsel %vm3021_vm0, %v3024_v50, %v3026_v7  ;;  %v3035_v16 = vsel %vm3021_vm0, %v3032_v52, %v3034_v45  ;;  %v1735_v26 = vsub.s32 4, %v7471_v6 }
 0x247   : > { %v3159_v35 = vclz %v6021_v33  ;;  %v8457_v21 = vmul.u32.u64.low %v8421_v32, %v3035_v16  ;;  %v8458_v49 = vmul.u32.u64.high %v8421_v32, %v3035_v16, %v8457_v21  ;;  %v2965_v31 = vand.u32 2147483647, %v2964_v47 }
 0x248   : > { %v3201_v39 = vand.u32 8388607, %v9548_v10  ;;  %v8461_v28 = vmul.u32.u64.low %v8421_v32, %v3031_v1  ;;  %v8462_v34 = vmul.u32.u64.high %v8421_v32, %v3031_v1, %v8461_v28  ;;  %v2967_v17 = vcvt.s32.f32 %v2960_v3 }
 0x249   : > { %v6022_v60 = vadd.s32 4294967294, %v3159_v35  ;;  %v6024_v8 = vadd.s32 4294967169, %v3198_v43  ;;  %v2763_v20 = vxor.u32 2147483648, %v8410_v22  ;;  %v9549_v50 = vand.u32 2147483647, %v8397_v59 }
 0x24a   : > { %v9550_v24 = vcvt.s32.f32 %v8395_v37  ;;  %v3202_v23 = vor.u32 8388608, %v3201_v39  ;;  %v1737_v7 = vsel %vm8439_vm14, %v7372_v41, %v7638_v0  ;;  %v3043_v63 = vmul.u32 %v8421_v32, %v3027_v46 }
 0x24b   : > { %vm6023_vm9 = vcmp.lt.s32.totalorder %v6022_v60, 0  ;;  %v3204_v52 = vadd.s32 1, %v6024_v8  ;;  %v1736_v48 = vsel %vm1651_vm10, %v1735_v26, %v7471_v6  ;;  %v3147_v59 = vadd.s32 %v8369_v61, %v8377_v18 }
 0x24c   : > { %v8469_v13 = vmul.f32 %v9550_v24, %v9549_v50  ;;  %v3162_v37 = vsel %vm6023_vm9, 0, %v6022_v60  ;;  %vm3045_vm15 = vc.u32 %v8458_v49, %v8461_v28  ;;  %v3046_v3 = vadd.s32 1, %v8462_v34 }
 0x24d   : > { %v8483_v47 = vmul.f32 %v2967_v17, %v2965_v31  ;;  %v3163_v33 = vsub.s32 32, %v3162_v37  ;;  %v3167_v0 = vsub.s32 4294967266, %v3162_v37  ;;  %vm3205_vm0 = vcmp.gt.s32.totalorder %v3204_v52, 0 }
 0x24e   : > { %v3047_v32 = vsel %vm3045_vm15, %v3046_v3, %v8462_v34  ;;  %v3206_v11 = vsel %vm3205_vm0, %v3204_v52, 0  ;;  %v8486_v1 = vshll.u32 %v3202_v23, 8  ;;  %v8490_v6 = vsel %vm8439_vm14, 0, %v1736_v48 }
 0x24f   : > { %v3168_v61 = vadd.s32 127, %v3167_v0  ;;  %v3048_v18 = vadd.s32 %v3047_v32, %v3043_v63  ;;  %6691 = vsinq.f32 %v1737_v7  ;;  %v8493_v45 = vand.u32 3, %v8490_v6 }
 0x250   : > { %v3207_v43 = vshrl.u32 %v3206_v11, 5  ;;  %v3208_v10 = vand.u32 31, %v3206_v11  ;;  %6693 = vcosq.f32 %v1737_v7  ;;  %v1838_v39 = vsub.s32 4, %v7506_v57 }
 0x251   : > { %v3164_v35 = vshll.u32 %v8446_v15, %v3162_v37  ;;  %v3165_v46 = vshrl.u32 %v3147_v59, %v3163_v33  ;;  %v8498_v16 = vadd.s32 %v8461_v28, %v8458_v49  ;;  %v3049_v62 = vadd.s32 536870912, %v3048_v18 }
 0x252   : > { %v3209_v26 = vsub.s32 32, %v3208_v10  ;;  %v3211_v21 = vshll.u32 %v9516_v55, %v3208_v10  ;;  %v3214_v34 = vshll.u32 %v9507_v36, %v3208_v10  ;;  %v3217_v31 = vshll.u32 %v9508_v4, %v3208_v10 }
 0x253   : > { %v3169_v17 = vshll.u32 %v3168_v61, 23  ;;  %v8503_v60 = vshrl.u32 %v3049_v62, 30  ;;  %v3220_v8 = vshll.u32 %v9509_v42, %v3208_v10  ;;  %vm1744_vm10 = vcmp.eq.s32.totalorder %v8493_v45, 0 }
 0x254   : > { %v3212_v15 = vshrl.u32 %v9507_v36, %v3209_v26  ;;  %v3215_v49 = vshrl.u32 %v9508_v4, %v3209_v26  ;;  %v3218_v28 = vshrl.u32 %v9509_v42, %v3209_v26  ;;  %vm3226_vm14 = vcmp.lt.s32.totalorder %v3207_v43, 1 }
 0x255   : > { %v9551_v50 = vand.u32 2147483647, %v7378_v51  ;;  %v3051_v23 = vshll.u32 %v8503_v60, 30  ;;  %v3210_v7 = vshrl.u32 %v9516_v55, %v3209_v26  ;;  %v3221_v63 = vshrl.u32 %v9517_v30, %v3209_v26 }
 0x256   : > { %v3223_v52 = vshll.u32 %v9517_v30, %v3208_v10  ;;  %vm1747_vm2 = vcmp.eq.s32.totalorder %v8493_v45, 2  ;;  %v3213_v36 = vor.u32 %v3212_v15, %v3211_v21  ;;  %v3216_v4 = vor.u32 %v3215_v49, %v3214_v34 }
 0x257   : > { %vm8512_vm1 = vcmp.le.f32.partialorder %v9551_v50, 0.7853982  ;;  %v3219_v42 = vor.u32 %v3218_v28, %v3217_v31  ;;  %v3224_v48 = vshrl.u32 %v9511_v19, %v3209_v26  ;;  %vm1743_vm9 = vcmp.lt.s32.totalorder %v8493_v45, 2 }
 0x258   : > { %v3166_v59 = vor.u32 %v3165_v46, %v3164_v35  ;;  %v3170_v37 = vor.u32 4788187, %v3169_v17  ;;  %v8523_v3 = vsub.s32 %v3048_v18, %v3051_v23  ;;  %v3222_v33 = vor.u32 %v3221_v63, %v3220_v8 }
 0x259   : > { %vm1741_vm15 = vweird.f32 %v7372_v41  ;;  %v3225_v55 = vor.u32 %v3224_v48, %v3223_v52  ;;  %vm3227_vm0 = vcmp.lt.s32.totalorder %v3207_v43, 2  ;;  %vm3228_vm8 = vcmp.lt.s32.totalorder %v3207_v43, 3  ;;  %v8526_v30 = vpop.eup %6691 }
 0x25a   : > { %vm3229_vm7 = vcmp.lt.s32.totalorder %v3207_v43, 4  ;;  %vm9475_vm6 = vcmp.lt.s32.totalorder %v8000_v2, 0  ;;  %v3054_v0 = vsub.s32 0, %v8523_v3  ;;  %v3230_v19 = vsel %vm3226_vm14, %v3210_v7, %v3213_v36  ;;  %v8532_v61 = vpop.eup %6693 }
 0x25b   : > { %v3231_v32 = vsel %vm3229_vm7, %v3219_v42, 2102212464  ;;  %v3234_v11 = vsel %vm3226_vm14, %v3213_v36, %v3216_v4  ;;  %v3235_v10 = vsel %vm3229_vm7, %v3222_v33, 920167782  ;;  %v3238_v35 = vsel %vm3226_vm14, %v3216_v4, %v3219_v42 }
 0x25c   : > { %v3232_v18 = vsel %vm3228_vm8, %v3216_v4, %v3231_v32  ;;  %v3239_v46 = vsel %vm3229_vm7, %v3225_v55, 1326507024  ;;  %v3171_v62 = vand.u32 2147483647, %v3170_v37  ;;  %v3173_v26 = vcvt.s32.f32 %v3166_v59 }
 0x25d   : > { %v6017_v21 = vmin.u32 %v3054_v0, %v8523_v3  ;;  %v3236_v34 = vsel %vm3228_vm8, %v3219_v42, %v3235_v10  ;;  %v3233_v31 = vsel %vm3227_vm0, %v3230_v19, %v3232_v18  ;;  %v3240_v8 = vsel %vm3228_vm8, %v3222_v33, %v3239_v46 }
 0x25e   : > { %v3237_v17 = vsel %vm3227_vm0, %v3234_v11, %v3236_v34  ;;  %v1745_v15 = vxor.u32 2147483648, %v8526_v30  ;;  %v3241_v28 = vsel %vm3227_vm0, %v3238_v35, %v3240_v8  ;;  %v1748_v36 = vxor.u32 2147483648, %v8532_v61  ;;  %v9554_v8 = vld [vmem:[#allocation21_spill] sm:$0xff] }
 0x25f   : > { %v3056_v49 = vclz %v6017_v21  ;;  %v8544_v50 = vmul.u32.u64.low %v8486_v1, %v3237_v17  ;;  %v8545_v23 = vmul.u32.u64.high %v8486_v1, %v3237_v17, %v8544_v50  ;;  %v8556_v4 = vmul.f32 %v3173_v26, %v3171_v62 }
 0x260   : > { %v8549_v7 = vmul.u32.u64.low %v8486_v1, %v3241_v28  ;;  %v8550_v63 = vmul.u32.u64.high %v8486_v1, %v3241_v28, %v8549_v7  ;;  %v1746_v52 = vsel %vm1744_vm10, %v8532_v61, %v1745_v15  ;;  %v1839_v43 = vsel %vm1754_vm11, %v1838_v39, %v7506_v57 }
 0x261   : > { %v6018_v42 = vadd.s32 4294967294, %v3056_v49  ;;  %v1840_v48 = vsel %vm8512_vm1, %v7378_v51, %v7978_v44  ;;  %v3249_v59 = vmul.u32 %v8486_v1, %v3233_v31  ;;  %v1749_v37 = vsel %vm1747_vm2, %v1748_v36, %v8526_v30 }
 0x262   : > { %6695 = vcosq.f32 %v1840_v48  ;;  %v3390_v33 = vadd.s32 3, %v8490_v6  ;;  %v3252_v55 = vadd.s32 1, %v8545_v23  ;;  %v1750_v57 = vsel %vm1743_vm9, %v1746_v52, %v1749_v37 }
 0x263   : > { %vm6019_vm7 = vcmp.lt.s32.totalorder %v6018_v42, 0  ;;  %6697 = vsinq.f32 %v1840_v48  ;;  %vm3251_vm11 = vc.u32 %v8550_v63, %v8544_v50  ;;  %v8579_v44 = vsel %vm1741_vm15, nan, %v1750_v57  ;;  %v9558_v48 = vld [vmem:[#allocation30_spill] sm:$0xff] }
 0x264   : > { %v3059_v39 = vsel %vm6019_vm7, 0, %v6018_v42  ;;  %v1841_v1 = vsel %vm8512_vm1, 0, %v1839_v43  ;;  %v3253_v19 = vsel %vm3251_vm11, %v3252_v55, %v8545_v23  ;;  %v8589_v45 = vsel %vm9475_vm6, %v2763_v20, %v8410_v22 }
 0x265   : > { %v3060_v0 = vsub.s32 32, %v3059_v39  ;;  %v3064_v6 = vsub.s32 4294967266, %v3059_v39  ;;  %v1845_v32 = vand.u32 3, %v1841_v1  ;;  %v2866_v11 = vxor.u32 2147483648, %v8469_v13 }
 0x266   : > { %v2969_v18 = vxor.u32 2147483648, %v8483_v47  ;;  %v3254_v10 = vadd.s32 %v3253_v19, %v3249_v59  ;;  %v3175_v24 = vxor.u32 2147483648, %v8556_v4  ;;  %v3391_v46 = vand.u32 3, %v3390_v33 }
 0x267   : > { %v3065_v35 = vadd.s32 127, %v3064_v6  ;;  %v3494_v62 = vadd.s32 3, %v1841_v1  ;;  %vm2784_vm8 = vcmp.lt.s32.totalorder %v8110_v53, 0  ;;  %v3061_v26 = vshll.u32 %v8523_v3, %v3059_v39 }
 0x268   : > { %v3062_v21 = vshrl.u32 %v8498_v16, %v3060_v0  ;;  %v3255_v34 = vadd.s32 536870912, %v3254_v10  ;;  %v1941_v22 = vsub.s32 4, %v7629_v54  ;;  %vm1844_vm10 = vweird.f32 %v7378_v51 }
 0x269   : > { %vm1846_vm14 = vcmp.lt.s32.totalorder %v1845_v32, 2  ;;  %vm3392_vm1 = vcmp.lt.s32.totalorder %v3391_v46, 2  ;;  %vm3393_vm2 = vcmp.eq.s32.totalorder %v3391_v46, 0  ;;  %vm9479_vm9 = vcmp.lt.s32.totalorder %v8168_v14, 0 }
 0x26a   : > { %vm9478_vm0 = vcmp.lt.s32.totalorder %v8228_v40, 0  ;;  %v8601_v20 = vshrl.u32 %v3255_v34, 30  ;;  %v3395_v31 = vsel %vm3393_vm2, %v8532_v61, %v1745_v15  ;;  %vm3396_vm7 = vcmp.eq.s32.totalorder %v3391_v46, 2 }
 0x26b   : > { %v3495_v3 = vand.u32 3, %v3494_v62  ;;  %v3066_v17 = vshll.u32 %v3065_v35, 23  ;;  %vm1847_vm11 = vcmp.eq.s32.totalorder %v1845_v32, 0  ;;  %v3398_v16 = vsel %vm3396_vm7, %v1748_v36, %v8526_v30  ;;  %v9559_v62 = vld [vmem:[#allocation20_spill] sm:$0xff] }
 0x26c   : > { %v9555_v49 = vand.u32 2147483647, %v9554_v8  ;;  %v6696_v23 = vpop.eup %6695  ;;  %v3063_v7 = vor.u32 %v3062_v21, %v3061_v26  ;;  %v3257_v52 = vshll.u32 %v8601_v20, 30  ;;  %vm1850_vm3 = vcmp.eq.s32.totalorder %v1845_v32, 2 }
 0x26d   : > { %v1942_v61 = vsel %vm1857_vm13, %v1941_v22, %v7629_v54  ;;  %v6698_v15 = vpop.eup %6697  ;;  %v1851_v42 = vxor.u32 2147483648, %v6696_v23  ;;  %v3399_v43 = vsel %vm3392_vm1, %v3395_v31, %v3398_v16  ;;  %vm3497_vm2 = vcmp.eq.s32.totalorder %v3495_v3, 0  ;;  %v9564_v16 = vld [vmem:[#allocation29_spill] sm:$0xff] }
 0x26e   : > { %vm8607_vm6 = vcmp.le.f32.partialorder %v9555_v49, 0.7853982  ;;  %vm3500_vm7 = vcmp.eq.s32.totalorder %v3495_v3, 2  ;;  %v8616_v30 = vsub.s32 %v3254_v10, %v3257_v52  ;;  %v1848_v36 = vxor.u32 2147483648, %v6698_v15 }
 0x26f   : > { %vm3496_vm5 = vcmp.lt.s32.totalorder %v3495_v3, 2  ;;  %v1943_v59 = vsel %vm8607_vm6, %v9554_v8, %v9558_v48  ;;  %v3067_v37 = vor.u32 4788187, %v3066_v17  ;;  %v3502_v33 = vsel %vm3500_vm7, %v1851_v42, %v6698_v15  ;;  %v9563_v17 = vld [vmem:[#allocation22_spill] sm:$0xff] }
 0x270   : > { %v1852_v55 = vsel %vm1850_vm3, %v1851_v42, %v6698_v15  ;;  %6699 = vcosq.f32 %v1943_v59  ;;  %v3260_v54 = vsub.s32 0, %v8616_v30  ;;  %v3499_v57 = vsel %vm3497_vm2, %v6696_v23, %v1848_v36 }
 0x271   : > { %v1849_v39 = vsel %vm1847_vm11, %v6696_v23, %v1848_v36  ;;  %6701 = vsinq.f32 %v1943_v59  ;;  %v3400_v1 = vsel %vm1741_vm15, nan, %v3399_v43  ;;  %v3503_v0 = vsel %vm3496_vm5, %v3499_v57, %v3502_v33  ;;  %v9568_v43 = vld [vmem:[#allocation24_spill] sm:$0xff] }
 0x272   : > { %v1853_v6 = vsel %vm1846_vm14, %v1849_v39, %v1852_v55  ;;  %v1944_v19 = vsel %vm8607_vm6, 0, %v1942_v61  ;;  %v6025_v10 = vmin.u32 %v3260_v54, %v8616_v30  ;;  %v3504_v35 = vsel %vm1844_vm10, nan, %v3503_v0 }
 0x273   : > { %v8634_v46 = vsel %vm1844_vm10, nan, %v1853_v6  ;;  %v9560_v26 = vand.u32 2147483647, %v9559_v62  ;;  %v8645_v32 = vsel %vm2784_vm8, %v2866_v11, %v8469_v13  ;;  %v3068_v21 = vand.u32 2147483647, %v3067_v37 }
 0x274   : > { %v3070_v34 = vcvt.s32.f32 %v3063_v7  ;;  %v6442_v22 = vpack.i.bf16 %v3504_v35, %v3400_v1  ;;  %v3262_v31 = vclz %v6025_v10  ;;  %v1948_v3 = vand.u32 3, %v1944_v19 }
 0x275   : > { %vm8638_vm13 = vcmp.le.f32.partialorder %v9560_v26, 0.7853982  ;;  %v2044_v51 = vsub.s32 4, %v9563_v17  ;;  %v8657_v28 = vsel %vm9479_vm9, %v2969_v18, %v8483_v47  ;;  %v8664_v13 = vsel %vm9478_vm0, %v3175_v24, %v8556_v4 }
 0x276   : > { %v2046_v49 = vsel %vm8638_vm13, %v9559_v62, %v9564_v16  ;;  %6443 = vrot.lane.b32.xlu1 %v6442_v22, %s6999_s15  ;;  %v3598_v11 = vadd.s32 3, %v1944_v19  ;;  %v3250_v23 = vadd.s32 %v8544_v50, %v8550_v63  ;;  %v6026_v7 = vadd.s32 4294967294, %v3262_v31 }
 0x277   : > { %6703 = vcosq.f32 %v2046_v49  ;;  %v2045_v47 = vsel %vm1960_vm12, %v2044_v51, %v9563_v17  ;;  %v8672_v18 = vmul.f32 %v3070_v34, %v3068_v21  ;;  %vm1947_vm5 = vweird.f32 %v9554_v8 }
 0x278   : > { %6705 = vsinq.f32 %v2046_v49  ;;  %v2047_v4 = vsel %vm8638_vm13, 0, %v2045_v47  ;;  %v3599_v24 = vand.u32 3, %v3598_v11  ;;  %vm6027_vm6 = vcmp.lt.s32.totalorder %v6026_v7, 0 }
 0x279   : > { %vm1950_vm3 = vcmp.eq.s32.totalorder %v1948_v3, 0  ;;  %vm1953_vm15 = vcmp.eq.s32.totalorder %v1948_v3, 2  ;;  %v3702_v52 = vadd.s32 3, %v2047_v4  ;;  %v3265_v50 = vsel %vm6027_vm6, 0, %v6026_v7 }
 0x27a   : > { %v6700_v61 = vpop.eup %6699  ;;  %v2051_v63 = vand.u32 3, %v2047_v4  ;;  %v9565_v15 = vand.u32 2147483647, %v7554_v58  ;;  %v2147_v36 = vsub.s32 4, %v9568_v43  ;;  %v3270_v59 = vsub.s32 4294967266, %v3265_v50 }
 0x27b   : > { %v6702_v48 = vpop.eup %6701  ;;  %v1954_v37 = vxor.u32 2147483648, %v6700_v61  ;;  %vm3601_vm12 = vcmp.eq.s32.totalorder %v3599_v24, 0  ;;  %vm3604_vm14 = vcmp.eq.s32.totalorder %v3599_v24, 2  ;;  %v3072_v33 = vxor.u32 2147483648, %v8672_v18 }
 0x27c   : > { %vm8679_vm10 = vcmp.le.f32.partialorder %v9565_v15, 0.7853982  ;;  %v3266_v55 = vsub.s32 32, %v3265_v50  ;;  %vm1949_vm1 = vcmp.lt.s32.totalorder %v1948_v3, 2  ;;  %v1951_v54 = vxor.u32 2147483648, %v6702_v48 }
 0x27d   : > { %v3271_v57 = vadd.s32 127, %v3270_v59  ;;  %vm3600_vm11 = vcmp.lt.s32.totalorder %v3599_v24, 2  ;;  %v3703_v39 = vand.u32 3, %v3702_v52  ;;  %v2149_v1 = vsel %vm8679_vm10, %v7554_v58, %v8175_v12 }
 0x27e   : > { %v3603_v0 = vsel %vm3601_vm12, %v6700_v61, %v1951_v54  ;;  %v3606_v6 = vsel %vm3604_vm14, %v1954_v37, %v6702_v48  ;;  %v1952_v19 = vsel %vm1950_vm3, %v6700_v61, %v1951_v54  ;;  %v1955_v10 = vsel %vm1953_vm15, %v1954_v37, %v6702_v48 }
 0x27f   : > { %v3267_v35 = vshll.u32 %v8616_v30, %v3265_v50  ;;  %vm2052_vm2 = vcmp.lt.s32.totalorder %v2051_v63, 2  ;;  %vm2053_vm7 = vcmp.eq.s32.totalorder %v2051_v63, 0  ;;  %v2148_v26 = vsel %vm2063_vm4, %v2147_v36, %v9568_v43  ;;  %v9572_v43 = vld [vmem:[#allocation25_spill] sm:$0xff] }
 0x280   : > { %v3268_v21 = vshrl.u32 %v3250_v23, %v3266_v55  ;;  %vm2056_vm13 = vcmp.eq.s32.totalorder %v2051_v63, 2  ;;  %vm3708_vm6 = vcmp.eq.s32.totalorder %v3703_v39, 2  ;;  %v1956_v12 = vsel %vm1949_vm1, %v1952_v19, %v1955_v10 }
 0x281   : > { %v6704_v41 = vpop.eup %6703  ;;  %v3607_v31 = vsel %vm3600_vm11, %v3603_v0, %v3606_v6  ;;  %vm3705_vm3 = vcmp.eq.s32.totalorder %v3703_v39, 0  ;;  %v8699_v30 = vsel %vm1947_vm5, nan, %v1956_v12  ;;  %v3272_v17 = vshll.u32 %v3271_v57, 23 }
 0x282   : > { %v6706_v34 = vpop.eup %6705  ;;  %v2057_v22 = vxor.u32 2147483648, %v6704_v41  ;;  %vm3704_vm15 = vcmp.lt.s32.totalorder %v3703_v39, 2  ;;  %6707 = vcosq.f32 %v2149_v1  ;;  %v9569_v11 = vand.u32 2147483647, %v7624_v38 }
 0x283   : > { %v2054_v51 = vxor.u32 2147483648, %v6706_v34  ;;  %6709 = vsinq.f32 %v2149_v1  ;;  %vm2050_vm12 = vweird.f32 %v9559_v62  ;;  %v3608_v7 = vsel %vm1947_vm5, nan, %v3607_v31  ;;  %v9573_v62 = vld [vmem:[#allocation33_spill] sm:$0xff]  ;;  %v9578_v1 = vld [vmem:[#allocation28_spill] sm:$0xff] }
 0x284   : > { %v2058_v16 = vsel %vm2056_vm13, %v2057_v22, %v6706_v34  ;;  %v3710_v49 = vsel %vm3708_vm6, %v2057_v22, %v6706_v34  ;;  %vm8703_vm4 = vcmp.le.f32.partialorder %v9569_v11, 0.7853982  ;;  %v8711_v4 = vor.u32 %v3268_v21, %v3267_v35  ;;  %v9585_v11 = vld [vmem:[#allocation34_spill] sm:$0xff] }
 0x285   : > { %v2055_v23 = vsel %vm2053_vm7, %v6704_v41, %v2054_v51  ;;  %v3707_v47 = vsel %vm3705_vm3, %v6704_v41, %v2054_v51  ;;  %v2150_v61 = vsel %vm8679_vm10, 0, %v2148_v26  ;;  %v2250_v36 = vsub.s32 4, %v9572_v43  ;;  %v9579_v41 = vld [vmem:[#allocation23_spill] sm:$0xff] }
 0x286   : > { %v2059_v24 = vsel %vm2052_vm2, %v2055_v23, %v2058_v16  ;;  %v3711_v52 = vsel %vm3704_vm15, %v3707_v47, %v3710_v49  ;;  %v2252_v8 = vsel %vm8703_vm4, %v7624_v38, %v9573_v62  ;;  %v8723_v48 = vor.u32 4788187, %v3272_v17  ;;  %v9584_v16 = vld [vmem:[#allocation26_spill] sm:$0xff] }
 0x287   : > { %v8716_v50 = vsel %vm2050_vm12, nan, %v2059_v24  ;;  %v3712_v15 = vsel %vm2050_vm12, nan, %v3711_v52  ;;  %v2154_v37 = vand.u32 3, %v2150_v61  ;;  %6711 = vcosq.f32 %v2252_v8 }
 0x288   : > { %v6447_v59 = vpack.i.bf16 %v3712_v15, %v3608_v7  ;;  %vm9574_vm5 = vcmp.lt.s32.totalorder %v7624_v38, 0  ;;  %6713 = vsinq.f32 %v2252_v8  ;;  %v3806_v42 = vadd.s32 3, %v2150_v61 }
 0x289   : > { %v2251_v63 = vsel %vm9574_vm5, %v2250_v36, %v9572_v43  ;;  %v9575_v55 = vand.u32 2147483647, %v7759_v9  ;;  %v3276_v57 = vcvt.s32.f32 %v8711_v4  ;;  %vm2153_vm14 = vweird.f32 %v7554_v58 }
 0x28a   : > { %6448 = vrot.lane.b32.xlu0 %v6447_v59, %s6999_s15  ;;  %v2253_v39 = vsel %vm8703_vm4, 0, %v2251_v63  ;;  %v2353_v0 = vsub.s32 4, %v9578_v1  ;;  %v3807_v10 = vand.u32 3, %v3806_v42  ;;  %v3274_v26 = vand.u32 2147483647, %v8723_v48 }
 0x28b   : > { %vm8730_vm10 = vcmp.le.f32.partialorder %v9575_v55, 0.7853982  ;;  %v2257_v19 = vand.u32 3, %v2253_v39  ;;  %v3910_v35 = vadd.s32 3, %v2253_v39  ;;  %vm2155_vm1 = vcmp.lt.s32.totalorder %v2154_v37, 2 }
 0x28c   : > { %v2355_v6 = vsel %vm8730_vm10, %v7759_v9, %v8384_v25  ;;  %v9580_v21 = vand.u32 2147483647, %v9579_v41  ;;  %v6708_v34 = vpop.eup %6707  ;;  %vm2156_vm2 = vcmp.eq.s32.totalorder %v2154_v37, 0  ;;  %vm2159_vm7 = vcmp.eq.s32.totalorder %v2154_v37, 2 }
 0x28d   : > { %6715 = vcosq.f32 %v2355_v6  ;;  %vm2258_vm13 = vcmp.lt.s32.totalorder %v2257_v19, 2  ;;  %vm9583_vm6 = vcmp.lt.s32.totalorder %v7759_v9, 0  ;;  %v6710_v22 = vpop.eup %6709  ;;  %v2160_v31 = vxor.u32 2147483648, %v6708_v34 }
 0x28e   : > { %6717 = vsinq.f32 %v2355_v6  ;;  %vm8747_vm11 = vcmp.le.f32.partialorder %v9580_v21, 0.7853982  ;;  %v2354_v25 = vsel %vm9583_vm6, %v2353_v0, %v9578_v1  ;;  %vm3809_vm3 = vcmp.eq.s32.totalorder %v3807_v10, 0 }
 0x28f   : > { %vm3812_vm15 = vcmp.eq.s32.totalorder %v3807_v10, 2  ;;  %v3911_v17 = vand.u32 3, %v3910_v35  ;;  %v2157_v51 = vxor.u32 2147483648, %v6710_v22  ;;  %vm2256_vm4 = vweird.f32 %v7624_v38  ;;  %v9590_v38 = vld [vmem:[#allocation31_spill] sm:$0xff] }
 0x290   : > { %vm2259_vm12 = vcmp.eq.s32.totalorder %v2257_v19, 0  ;;  %v2456_v49 = vsub.s32 4, %v9584_v16  ;;  %v2458_v3 = vsel %vm8747_vm11, %v9579_v41, %v9585_v11  ;;  %v2161_v23 = vsel %vm2159_vm7, %v2160_v31, %v6710_v22 }
 0x291   : > { %vm2262_vm5 = vcmp.eq.s32.totalorder %v2257_v19, 2  ;;  %vm3808_vm0 = vcmp.lt.s32.totalorder %v3807_v10, 2  ;;  %v2356_v7 = vsel %vm8730_vm10, 0, %v2354_v25  ;;  %v2158_v47 = vsel %vm2156_vm2, %v6708_v34, %v2157_v51  ;;  %v6712_v15 = vpop.eup %6711 }
 0x292   : > { %v3811_v24 = vsel %vm3809_vm3, %v6708_v34, %v2157_v51  ;;  %v3814_v52 = vsel %vm3812_vm15, %v2160_v31, %v6710_v22  ;;  %v2360_v61 = vand.u32 3, %v2356_v7  ;;  %v2162_v43 = vsel %vm2155_vm1, %v2158_v47, %v2161_v23  ;;  %v6714_v62 = vpop.eup %6713 }
 0x293   : > { %vm3916_vm6 = vcmp.eq.s32.totalorder %v3911_v17, 2  ;;  %vm9586_vm9 = vcmp.lt.s32.totalorder %v9579_v41, 0  ;;  %6719 = vcosq.f32 %v2458_v3  ;;  %v8769_v8 = vsel %vm2153_vm14, nan, %v2162_v43 }
 0x294   : > { %v2457_v36 = vsel %vm9586_vm9, %v2456_v49, %v9584_v16  ;;  %v2263_v59 = vxor.u32 2147483648, %v6712_v15  ;;  %vm3912_vm10 = vcmp.lt.s32.totalorder %v3911_v17, 2  ;;  %vm3913_vm2 = vcmp.eq.s32.totalorder %v3911_v17, 0 }
 0x295   : > { %vm2359_vm7 = vweird.f32 %v7759_v9  ;;  %v2260_v63 = vxor.u32 2147483648, %v6714_v62  ;;  %v3815_v37 = vsel %vm3808_vm0, %v3811_v24, %v3814_v52  ;;  %vm2362_vm1 = vcmp.eq.s32.totalorder %v2360_v61, 0 }
 0x296   : > { %vm2365_vm3 = vcmp.eq.s32.totalorder %v2360_v61, 2  ;;  %v3918_v55 = vsel %vm3916_vm6, %v2263_v59, %v6714_v62  ;;  %v2264_v54 = vsel %vm2262_vm5, %v2263_v59, %v6714_v62  ;;  %v2459_v39 = vsel %vm8747_vm11, 0, %v2457_v36 }
 0x297   : > { %v6716_v42 = vpop.eup %6715  ;;  %6721 = vsinq.f32 %v2458_v3  ;;  %v3915_v0 = vsel %vm3913_vm2, %v6712_v15, %v2260_v63  ;;  %v2261_v6 = vsel %vm2259_vm12, %v6712_v15, %v2260_v63  ;;  %v2463_v21 = vand.u32 3, %v2459_v39 }
 0x298   : > { %v6718_v1 = vpop.eup %6717  ;;  %v2366_v35 = vxor.u32 2147483648, %v6716_v42  ;;  %v3919_v34 = vsel %vm3912_vm10, %v3915_v0, %v3918_v55  ;;  %v2265_v10 = vsel %vm2258_vm13, %v2261_v6, %v2264_v54  ;;  %v4014_v22 = vadd.s32 3, %v2356_v7  ;;  %v6637_v54 = vld [vmem:[%s9396_s4 + $0x48] sm:$0xff]  }
 0x299   : > { %v2363_v25 = vxor.u32 2147483648, %v6718_v1  ;;  %v3816_v31 = vsel %vm2153_vm14, nan, %v3815_v37  ;;  %v3920_v12 = vsel %vm2256_vm4, nan, %v3919_v34  ;;  %v8785_v51 = vsel %vm2256_vm4, nan, %v2265_v10  ;;  %v9597_v10 = vld [vmem:[#allocation38_spill] sm:$0xff] }
 0x29a   : > { %vm2361_vm9 = vcmp.lt.s32.totalorder %v2360_v61, 2  ;;  %vm2990_vm0 = vcmp.lt.s32.totalorder %v8312_v5, 0  ;;  %v6452_v16 = vpack.i.bf16 %v3920_v12, %v3816_v31  ;;  %vm2464_vm11 = vcmp.lt.s32.totalorder %v2463_v21, 2 }
 0x29b   : > { %v4015_v17 = vand.u32 3, %v4014_v22  ;;  %v4118_v19 = vadd.s32 3, %v2459_v39  ;;  %v2364_v49 = vsel %vm2362_vm1, %v6716_v42, %v2363_v25  ;;  %v2367_v11 = vsel %vm2365_vm3, %v2366_v35, %v6718_v1 }
 0x29c   : > { %v9587_v58 = vand.u32 2147483647, %v7839_v29  ;;  %v2559_v23 = vsub.s32 4, %v9590_v38  ;;  %6453 = vrot.lane.b32.xlu1 %v6452_v16, %s6999_s15  ;;  %v2368_v15 = vsel %vm2361_vm9, %v2364_v49, %v2367_v11  ;;  %vm9591_vm12 = vcmp.lt.s32.totalorder %v7839_v29, 0 }
 0x29d   : > { %vm4016_vm13 = vcmp.lt.s32.totalorder %v4015_v17, 2  ;;  %vm4017_vm15 = vcmp.eq.s32.totalorder %v4015_v17, 0  ;;  %vm4020_vm4 = vcmp.eq.s32.totalorder %v4015_v17, 2  ;;  %v4119_v7 = vand.u32 3, %v4118_v19  ;;  %v6720_v47 = vpop.eup %6719 }
 0x29e   : > { %vm8792_vm14 = vcmp.le.f32.partialorder %v9587_v58, 0.7853982  ;;  %v4019_v24 = vsel %vm4017_vm15, %v6716_v42, %v2363_v25  ;;  %v4022_v52 = vsel %vm4020_vm4, %v2366_v35, %v6718_v1  ;;  %v2560_v43 = vsel %vm9591_vm12, %v2559_v23, %v9590_v38  ;;  %v9592_v42 = vld [vmem:[#allocation27_spill] sm:$0xff]  ;;  %v9596_v35 = vld [vmem:[#allocation32_spill] sm:$0xff] }
 0x29f   : > { %vm2465_vm5 = vcmp.eq.s32.totalorder %v2463_v21, 0  ;;  %vm2468_vm6 = vcmp.eq.s32.totalorder %v2463_v21, 2  ;;  %v2469_v36 = vxor.u32 2147483648, %v6720_v47  ;;  %v4023_v62 = vsel %vm4016_vm13, %v4019_v24, %v4022_v52 }
 0x2a0   : > { %vm4120_vm10 = vcmp.lt.s32.totalorder %v4119_v7, 2  ;;  %vm4124_vm2 = vcmp.eq.s32.totalorder %v4119_v7, 2  ;;  %v8804_v59 = vsel %vm2359_vm7, nan, %v2368_v15  ;;  %v2561_v61 = vsel %vm8792_vm14, %v7839_v29, %v8391_v27 }
 0x2a1   : > { %v6722_v63 = vpop.eup %6721  ;;  %vm4121_vm1 = vcmp.eq.s32.totalorder %v4119_v7, 0  ;;  %v2562_v37 = vsel %vm8792_vm14, 0, %v2560_v43  ;;  %6723 = vcosq.f32 %v2561_v61  ;;  %v9593_v55 = vand.u32 2147483647, %v9592_v42 }
 0x2a2   : > { %v2466_v39 = vxor.u32 2147483648, %v6722_v63  ;;  %v2470_v1 = vsel %vm2468_vm6, %v2469_v36, %v6722_v63  ;;  %v4126_v0 = vsel %vm4124_vm2, %v2469_v36, %v6722_v63  ;;  %6725 = vsinq.f32 %v2561_v61 }
 0x2a3   : > { %vm8814_vm3 = vcmp.le.f32.partialorder %v9593_v55, 0.7853982  ;;  %v8822_v27 = vmul.f32 %v3276_v57, %v3274_v26  ;;  %v4024_v6 = vsel %vm2359_vm7, nan, %v4023_v62  ;;  %v2662_v34 = vsub.s32 4, %v9596_v35  ;;  %v6636_v62 = vld [vmem:[%s9396_s4] sm:$0xff]  }
 0x2a4   : > { %v2664_v25 = vsel %vm8814_vm3, %v9592_v42, %v9597_v10  ;;  %v2467_v22 = vsel %vm2465_vm5, %v6720_v47, %v2466_v39  ;;  %v4123_v31 = vsel %vm4121_vm1, %v6720_v47, %v2466_v39  ;;  %v4222_v12 = vadd.s32 3, %v2562_v37 }
 0x2a5   : > { %6727 = vcosq.f32 %v2664_v25  ;;  %vm2462_vm9 = vweird.f32 %v9579_v41  ;;  %v2471_v4 = vsel %vm2464_vm11, %v2467_v22, %v2470_v1  ;;  %v4127_v48 = vsel %vm4120_vm10, %v4123_v31, %v4126_v0  ;;  %v6638_v31 = vld [vmem:[%s9396_s4 + $0x8] sm:$0xff]  }
 0x2a6   : > { %v2566_v9 = vand.u32 3, %v2562_v37  ;;  %v8840_v57 = vsel %vm2990_vm0, %v3072_v33, %v8672_v18  ;;  %v8842_v26 = vsel %vm2462_vm9, nan, %v2471_v4  ;;  %v4128_v16 = vsel %vm2462_vm9, nan, %v4127_v48  ;;  %v9602_v33 = vld [vmem:[#allocation35_spill] sm:$0xff]  ;;  %v9607_v37 = vld [vmem:[#allocation36_spill] sm:$0xff] }
 0x2a7   : > { %vm9598_vm7 = vcmp.lt.s32.totalorder %v9592_v42, 0  ;;  %v6457_v41 = vpack.i.bf16 %v4128_v16, %v4024_v6  ;;  %6729 = vsinq.f32 %v2664_v25  ;;  %v4223_v19 = vand.u32 3, %v4222_v12 }
 0x2a8   : > { %v2663_v17 = vsel %vm9598_vm7, %v2662_v34, %v9596_v35  ;;  %v9599_v58 = vand.u32 2147483647, %v8000_v2  ;;  %v2765_v3 = vsub.s32 4, %v9602_v33  ;;  %v3278_v38 = vxor.u32 2147483648, %v8822_v27 }
 0x2a9   : > { %v2665_v21 = vsel %vm8814_vm3, 0, %v2663_v17  ;;  %6458 = vrot.lane.b32.xlu0 %v6457_v41, %s6999_s15  ;;  %vm2565_vm14 = vweird.f32 %v7839_v29  ;;  %vm2567_vm13 = vcmp.lt.s32.totalorder %v2566_v9, 2  ;;  %vm2568_vm15 = vcmp.eq.s32.totalorder %v2566_v9, 0 }
 0x2aa   : > { %v8849_v49 = vand.u32 3, %v2665_v21  ;;  %v4326_v11 = vadd.s32 3, %v2665_v21  ;;  %vm8853_vm11 = vcmp.le.f32.partialorder %v9599_v58, 0.7853982  ;;  %vm2571_vm4 = vcmp.eq.s32.totalorder %v2566_v9, 2 }
 0x2ab   : > { %v2767_v23 = vsel %vm8853_vm11, %v8000_v2, %v8589_v45  ;;  %vm4224_vm12 = vcmp.lt.s32.totalorder %v4223_v19, 2  ;;  %v6724_v47 = vpop.eup %6723  ;;  %vm4228_vm5 = vcmp.eq.s32.totalorder %v4223_v19, 2  ;;  %vm9603_vm6 = vcmp.lt.s32.totalorder %v8000_v2, 0  ;;  %v6635_v45 = vld [vmem:[%s9396_s4 + $0x40] sm:$0xff]  }
 0x2ac   : > { %v4327_v7 = vand.u32 3, %v4326_v11  ;;  %v2766_v24 = vsel %vm9603_vm6, %v2765_v3, %v9602_v33  ;;  %6731 = vcosq.f32 %v2767_v23  ;;  %v9604_v52 = vand.u32 2147483647, %v8110_v53  ;;  %v6726_v43 = vpop.eup %6725  ;;  %6131 = vmatprep.subr.bf16.mxu1 %v6635_v45 }
 0x2ad   : > { %v2572_v36 = vxor.u32 2147483648, %v6724_v47  ;;  %vm2674_vm2 = vcmp.eq.s32.totalorder %v8849_v49, 2  ;;  %vm4225_vm1 = vcmp.eq.s32.totalorder %v4223_v19, 0  ;;  %v2569_v61 = vxor.u32 2147483648, %v6726_v43  ;;  %6132 = vmatpush3.bf16.msra.mxu1 %v6636_v62 }
 0x2ae   : > { %vm8870_vm10 = vcmp.le.f32.partialorder %v9604_v52, 0.7853982  ;;  %vm4332_vm3 = vcmp.eq.s32.totalorder %v4327_v7, 2  ;;  %v2768_v63 = vsel %vm8853_vm11, 0, %v2766_v24  ;;  %6733 = vsinq.f32 %v2767_v23  ;;  %6133 = vmatprep.subr.bf16.mxu1 %v6637_v54 }
 0x2af   : > { %v2868_v55 = vsub.s32 4, %v9607_v37  ;;  %v6728_v39 = vpop.eup %6727  ;;  %v2573_v1 = vsel %vm2571_vm4, %v2572_v36, %v6726_v43  ;;  %v4230_v0 = vsel %vm4228_vm5, %v2572_v36, %v6726_v43  ;;  %v8889_v6 = vand.u32 3, %v2768_v63 }
 0x2b0   : > { %v2870_v35 = vsel %vm8870_vm10, %v8110_v53, %v8645_v32  ;;  %v2570_v34 = vsel %vm2568_vm15, %v6724_v47, %v2569_v61  ;;  %v2675_v10 = vxor.u32 2147483648, %v6728_v39  ;;  %v4227_v25 = vsel %vm4225_vm1, %v6724_v47, %v2569_v61  ;;  %v6639_v32 = vld [vmem:[%s9396_s4 + $0x50] sm:$0xff]  }
 0x2b1   : > { %v2869_v22 = vsel %vm2784_vm8, %v2868_v55, %v9607_v37  ;;  %v2574_v12 = vsel %vm2567_vm13, %v2570_v34, %v2573_v1  ;;  %vm2670_vm9 = vcmp.lt.s32.totalorder %v8849_v49, 2  ;;  %vm2671_vm7 = vcmp.eq.s32.totalorder %v8849_v49, 0  ;;  %v6730_v4 = vpop.eup %6729  ;;  %6134 = vmatpush3.bf16.msra.mxu1 %v6638_v31  ;;  %v9611_v37 = vld [vmem:[#allocation37_spill] sm:$0xff]  ;;  %v8954_v1 = vpop.f32.mrb[0].mxu0 }
 0x2b2   : > { %vm4328_vm11 = vcmp.lt.s32.totalorder %v4327_v7, 2  ;;  %v8911_v48 = vsel %vm2565_vm14, nan, %v2574_v12  ;;  %v4231_v16 = vsel %vm4224_vm12, %v4227_v25, %v4230_v0  ;;  %vm4329_vm8 = vcmp.eq.s32.totalorder %v4327_v7, 0  ;;  %6135 = vmatprep.subr.bf16.mxu1 %v6639_v32 }
 0x2b3   : > { %v2871_v9 = vsel %vm8870_vm10, 0, %v2869_v22  ;;  %v2672_v17 = vxor.u32 2147483648, %v6730_v4  ;;  %v4334_v41 = vsel %vm4332_vm3, %v2675_v10, %v6730_v4  ;;  %v2676_v21 = vsel %vm2674_vm2, %v2675_v10, %v6730_v4  ;;  %v6643_v10 = vld [vmem:[%s9396_s4 + $0x60] sm:$0xff]  }
 0x2b4   : > { %6735 = vcosq.f32 %v2870_v35  ;;  %vm2668_vm13 = vweird.f32 %v9592_v42  ;;  %vm2773_vm15 = vcmp.lt.s32.totalorder %v8889_v6, 2  ;;  %v4430_v11 = vadd.s32 3, %v2768_v63  ;;  %v6640_v42 = vld [vmem:[%s9396_s4 + $0x10] sm:$0xff]  }
 0x2b5   : > { %6737 = vsinq.f32 %v2870_v35  ;;  %v4232_v19 = vsel %vm2565_vm14, nan, %v4231_v16  ;;  %v4331_v58 = vsel %vm4329_vm8, %v6728_v39, %v2672_v17  ;;  %v2673_v18 = vsel %vm2671_vm7, %v6728_v39, %v2672_v17  ;;  %v6641_v39 = vld [vmem:[%s9396_s4 + $0x58] sm:$0xff]   ;;  %6136 = vmatpush3.bf16.msra.mxu1 %v6640_v42 }
 0x2b6   : > { %vm2771_vm4 = vweird.f32 %v8000_v2  ;;  %v4534_v33 = vadd.s32 3, %v2871_v9  ;;  %v6732_v3 = vpop.eup %6731  ;;  %v4335_v23 = vsel %vm4328_vm11, %v4331_v58, %v4334_v41  ;;  %v2677_v47 = vsel %vm2670_vm9, %v2673_v18, %v2676_v21  ;;  %v6642_v35 = vld [vmem:[%s9396_s4 + $0x18] sm:$0xff]   ;;  %6137 = vmatprep.subr.bf16.mxu1 %v6641_v39 }
 0x2b7   : > { %vm2777_vm12 = vcmp.eq.s32.totalorder %v8889_v6, 2  ;;  %v9608_v24 = vand.u32 2147483647, %v8168_v14  ;;  %v4336_v52 = vsel %vm2668_vm13, nan, %v4335_v23  ;;  %v8940_v15 = vsel %vm2668_vm13, nan, %v2677_v47 }
 0x2b8   : > { %v2778_v7 = vxor.u32 2147483648, %v6732_v3  ;;  %v2875_v43 = vand.u32 3, %v2871_v9  ;;  %v6734_v36 = vpop.eup %6733  ;;  %v6462_v49 = vpack.i.bf16 %v4336_v52, %v4232_v19  ;;  %vm2774_vm14 = vcmp.eq.s32.totalorder %v8889_v6, 0 }
 0x2b9   : > { %vm8932_vm5 = vcmp.le.f32.partialorder %v9608_v24, 0.7853982  ;;  %v4431_v45 = vand.u32 3, %v4430_v11  ;;  %v4535_v62 = vand.u32 3, %v4534_v33  ;;  %v2775_v61 = vxor.u32 2147483648, %v6734_v36  ;;  %6138 = vmatpush3.bf16.msra.mxu1 %v6642_v35  ;;  %v6644_v11 = vld [vmem:[%s9396_s4 + $0x20] sm:$0xff]  }
 0x2ba   : > { %v2779_v63 = vsel %vm2777_vm12, %v2778_v7, %v6734_v36  ;;  %v2971_v55 = vsub.s32 4, %v9611_v37  ;;  %v2973_v54 = vsel %vm8932_vm5, %v8168_v14, %v8657_v28  ;;  %vm3196_vm6 = vcmp.lt.s32.totalorder %v8417_v56, 0  ;;  %6463 = vrot.lane.b32.xlu1 %v6462_v49, %s6999_s15  ;;  %6139 = vmatprep.subr.bf16.mxu1 %v6643_v10 }
 0x2bb   : > { %vm2874_vm10 = vweird.f32 %v8110_v53  ;;  %vm4432_vm2 = vcmp.lt.s32.totalorder %v4431_v45, 2  ;;  %vm4433_vm1 = vcmp.eq.s32.totalorder %v4431_v45, 0  ;;  %vm4436_vm3 = vcmp.eq.s32.totalorder %v4431_v45, 2 }
 0x2bc   : > { %vm2876_vm9 = vcmp.lt.s32.totalorder %v2875_v43, 2  ;;  %vm2877_vm7 = vcmp.eq.s32.totalorder %v2875_v43, 0  ;;  %v4435_v28 = vsel %vm4433_vm1, %v6732_v3, %v2775_v61  ;;  %v4438_v0 = vsel %vm4436_vm3, %v2778_v7, %v6734_v36 }
 0x2bd   : > { %vm2880_vm11 = vcmp.eq.s32.totalorder %v2875_v43, 2  ;;  %vm4540_vm8 = vcmp.eq.s32.totalorder %v4535_v62, 2  ;;  %v2776_v34 = vsel %vm2774_vm14, %v6732_v3, %v2775_v61  ;;  %6739 = vcosq.f32 %v2973_v54  ;;  %6140 = vmatpush3.bf16.msra.mxu1 %v6644_v11 }
 0x2be   : > { %v6736_v25 = vpop.eup %6735  ;;  %v4439_v22 = vsel %vm4432_vm2, %v4435_v28, %v4438_v0  ;;  %v2780_v31 = vsel %vm2773_vm15, %v2776_v34, %v2779_v63  ;;  %vm9612_vm13 = vcmp.lt.s32.totalorder %v8168_v14, 0  ;;  %6741 = vsinq.f32 %v2973_v54  ;;  %v6647_v34 = vld [vmem:[%s9396_s4 + $0x70] sm:$0xff]  }
 0x2bf   : > { %v2972_v12 = vsel %vm9612_vm13, %v2971_v55, %v9611_v37  ;;  %v6738_v32 = vpop.eup %6737  ;;  %v2881_v4 = vxor.u32 2147483648, %v6736_v25  ;;  %vm4537_vm12 = vcmp.eq.s32.totalorder %v4535_v62, 0  ;;  %v8975_v16 = vsel %vm2771_vm4, nan, %v2780_v31  ;;  %v9619_v37 = vld [vmem:[#allocation39_spill] sm:$0xff] }
 0x2c0   : > { %v9613_v9 = vand.u32 2147483647, %v8312_v5  ;;  %v2878_v6 = vxor.u32 2147483648, %v6738_v32  ;;  %vm4536_vm15 = vcmp.lt.s32.totalorder %v4535_v62, 2  ;;  %v3074_v41 = vsub.s32 4, %v8503_v60 }
 0x2c1   : > { %v2882_v19 = vsel %vm2880_vm11, %v2881_v4, %v6738_v32  ;;  %v4440_v58 = vsel %vm2771_vm4, nan, %v4439_v22  ;;  %v4542_v18 = vsel %vm4540_vm8, %v2881_v4, %v6738_v32  ;;  %v2974_v33 = vsel %vm8932_vm5, 0, %v2972_v12  ;;  %v6648_v12 = vld [vmem:[%s9396_s4 + $0x30] sm:$0xff]   ;;  %v6649_v32 = vld [vmem:[%s9396_s4 + $0x78] sm:$0xff]  }
 0x2c2   : > { %vm8979_vm14 = vcmp.le.f32.partialorder %v9613_v9, 0.7853982  ;;  %v2879_v3 = vsel %vm2877_vm7, %v6736_v25, %v2878_v6  ;;  %v4539_v23 = vsel %vm4537_vm12, %v6736_v25, %v2878_v6  ;;  %v2978_v47 = vand.u32 3, %v2974_v33 }
 0x2c3   : > { %v3076_v21 = vsel %vm8979_vm14, %v8312_v5, %v8840_v57  ;;  %v6645_v57 = vld [vmem:[%s9396_s4 + $0x68] sm:$0xff]   ;;  %v3075_v2 = vsel %vm2990_vm0, %v3074_v41, %v8503_v60  ;;  %v2883_v24 = vsel %vm2876_vm9, %v2879_v3, %v2882_v19  ;;  %v4543_v52 = vsel %vm4536_vm15, %v4539_v23, %v4542_v18 }
 0x2c4   : > { %v3077_v29 = vsel %vm8979_vm14, 0, %v3075_v2  ;;  %6743 = vcosq.f32 %v3076_v21  ;;  %v9011_v7 = vsel %vm2874_vm10, nan, %v2883_v24  ;;  %v4544_v36 = vsel %vm2874_vm10, nan, %v4543_v52  ;;  %v6646_v60 = vld [vmem:[%s9396_s4 + $0x28] sm:$0xff]   ;;  %6141 = vmatprep.subr.bf16.mxu1 %v6645_v57 }
 0x2c5   : > { %6745 = vsinq.f32 %v3076_v21  ;;  %v9015_v49 = vand.u32 3, %v3077_v29  ;;  %v6467_v43 = vpack.i.bf16 %v4544_v36, %v4440_v58  ;;  %v4638_v45 = vadd.s32 3, %v2974_v33  ;;  %6142 = vmatpush3.bf16.msra.mxu1 %v6646_v60  ;;  %v6650_v21 = vld [vmem:[%s9396_s4 + $0x38] sm:$0xff]   ;;  %v6653_v33 = vld [vmem:[#allocation8 + $0x4] ss:$8 sps:$4 sm:$0xff]  }
 0x2c6   : > { %v4742_v62 = vadd.s32 3, %v3077_v29  ;;  %v9616_v61 = vand.u32 2147483647, %v8228_v40  ;;  %v3279_v53 = vsel %vm3196_vm6, %v3278_v38, %v8822_v27  ;;  %vm2977_vm4 = vweird.f32 %v8168_v14  ;;  %v9039_v38 = vpop.f32.mrb[1].mxu0  ;;  %6143 = vmatprep.subr.bf16.mxu1 %v6647_v34  ;;  %v9625_v34 = vld [vmem:[#allocation18_spill] sm:$0xff] }
 0x2c7   : > { %v3177_v55 = vsub.s32 4, %v9619_v37  ;;  %v6740_v54 = vpop.eup %6739  ;;  %6468 = vrot.lane.b32.xlu0 %v6467_v43, %s6999_s15  ;;  %vm2979_vm5 = vcmp.lt.s32.totalorder %v2978_v47, 2  ;;  %vm2983_vm10 = vcmp.eq.s32.totalorder %v2978_v47, 2  ;;  %v4639_v42 = vand.u32 3, %v4638_v45  ;;  %v9055_v31 = vpop.f32.mrb[2].mxu0 }
 0x2c8   : > { %vm9022_vm0 = vcmp.le.f32.partialorder %v9616_v61, 0.7853982  ;;  %v6742_v28 = vpop.eup %6741  ;;  %vm2980_vm2 = vcmp.eq.s32.totalorder %v2978_v47, 0  ;;  %v2984_v0 = vxor.u32 2147483648, %v6740_v54  ;;  %v4743_v35 = vand.u32 3, %v4742_v62  ;;  %v9064_v6 = vpop.f32.mrb[3].mxu0 }
 0x2c9   : > { %v3179_v39 = vsel %vm9022_vm0, %v8228_v40, %v8664_v13  ;;  %v2981_v27 = vxor.u32 2147483648, %v6742_v28  ;;  %vm3082_vm1 = vcmp.lt.s32.totalorder %v9015_v49, 2  ;;  %vm4641_vm3 = vcmp.eq.s32.totalorder %v4639_v42, 0  ;;  %6144 = vmatpush3.bf16.msra.mxu1 %v6648_v12 }
 0x2ca   : > { %6747 = vcosq.f32 %v3179_v39  ;;  %vm4644_vm9 = vcmp.eq.s32.totalorder %v4639_v42, 2  ;;  %v2985_v10 = vsel %vm2983_vm10, %v2984_v0, %v6742_v28  ;;  %vm3080_vm7 = vweird.f32 %v8312_v5  ;;  %6145 = vmatprep.subr.bf16.mxu1 %v6649_v32 }
 0x2cb   : > { %vm3083_vm11 = vcmp.eq.s32.totalorder %v9015_v49, 0  ;;  %vm9620_vm8 = vcmp.lt.s32.totalorder %v8228_v40, 0  ;;  %v9621_v25 = vand.u32 2147483647, %v8417_v56  ;;  %v2982_v4 = vsel %vm2980_vm2, %v6740_v54, %v2981_v27 }
 0x2cc   : > { %v3178_v13 = vsel %vm9620_vm8, %v3177_v55, %v9619_v37  ;;  %vm4640_vm12 = vcmp.lt.s32.totalorder %v4639_v42, 2  ;;  %v4643_v9 = vsel %vm4641_vm3, %v6740_v54, %v2981_v27  ;;  %v4646_v17 = vsel %vm4644_vm9, %v2984_v0, %v6742_v28  ;;  %v583_v54 = vld [vmem:[%s9395_s3] sm:$0x3] }
 0x2cd   : > { %vm9051_vm13 = vcmp.le.f32.partialorder %v9621_v25, 0.7853982  ;;  %v2986_v41 = vsel %vm2979_vm5, %v2982_v4, %v2985_v10  ;;  %vm3086_vm14 = vcmp.eq.s32.totalorder %v9015_v49, 2  ;;  %vm4744_vm15 = vcmp.lt.s32.totalorder %v4743_v35, 2  ;;  %6146 = vmatpush3.bf16.msra.mxu1 %v6650_v21 }
 0x2ce   : > { %6749 = vsinq.f32 %v3179_v39  ;;  %v6744_v11 = vpop.eup %6743  ;;  %v9073_v19 = vsel %vm2977_vm4, nan, %v2986_v41  ;;  %vm4748_vm10 = vcmp.eq.s32.totalorder %v4743_v35, 2  ;;  %v3280_v58 = vsub.s32 4, %v8601_v20  ;;  %5158 = vmatprep.subr.bf16.mxu1 %v6653_v33 }
 0x2cf   : > { %v3282_v18 = vsel %vm9051_vm13, %v8417_v56, %v3279_v53  ;;  %v6746_v57 = vpop.eup %6745  ;;  %v3087_v3 = vxor.u32 2147483648, %v6744_v11  ;;  %v4647_v23 = vsel %vm4640_vm12, %v4643_v9, %v4646_v17  ;;  %vm4745_vm5 = vcmp.eq.s32.totalorder %v4743_v35, 0  ;;  %v9624_v35 = vld [vmem:[#allocation19_spill] sm:$0xff] }
 0x2d0   : > { %v3180_v47 = vsel %vm9022_vm0, 0, %v3178_v13  ;;  %v3084_v2 = vxor.u32 2147483648, %v6746_v57  ;;  %v3281_v52 = vsel %vm3196_vm6, %v3280_v58, %v8601_v20  ;;  %6751 = vcosq.f32 %v3282_v18 }
 0x2d1   : > { %v3184_v24 = vand.u32 3, %v3180_v47  ;;  %v4750_v29 = vsel %vm4748_vm10, %v3087_v3, %v6746_v57  ;;  %v3088_v36 = vsel %vm3086_vm14, %v3087_v3, %v6746_v57  ;;  %vm3183_vm2 = vweird.f32 %v8228_v40  ;;  %v6660_v40 = vld [vmem:[#allocation8 + $0x30] ss:$8 sps:$4 sm:$0xff]  }
 0x2d2   : > { %v3283_v60 = vsel %vm9051_vm13, 0, %v3281_v52  ;;  %6753 = vsinq.f32 %v3282_v18  ;;  %v4747_v43 = vsel %vm4745_vm5, %v6744_v11, %v3084_v2  ;;  %v3085_v45 = vsel %vm3083_vm11, %v6744_v11, %v3084_v2 }
 0x2d3   : > { %v3287_v62 = vand.u32 3, %v3283_v60  ;;  %v4846_v61 = vadd.s32 3, %v3180_v47  ;;  %v4648_v63 = vsel %vm2977_vm4, nan, %v4647_v23  ;;  %v4751_v53 = vsel %vm4744_vm15, %v4747_v43, %v4750_v29  ;;  %v6651_v43 = vld [vmem:[#allocation8] ss:$8 sps:$4 sm:$0xff]  }
 0x2d4   : > { %v6748_v20 = vpop.eup %6747  ;;  %v3089_v37 = vsel %vm3082_vm1, %v3085_v45, %v3088_v36  ;;  %v4950_v55 = vadd.s32 3, %v3283_v60  ;;  %v4752_v42 = vsel %vm3080_vm7, nan, %v4751_v53  ;;  %vm3185_vm6 = vcmp.lt.s32.totalorder %v3184_v24, 2 }
 0x2d5   : > { %v9104_v39 = vsel %vm3080_vm7, nan, %v3089_v37  ;;  %v3190_v14 = vxor.u32 2147483648, %v6748_v20  ;;  %v6472_v28 = vpack.i.bf16 %v4752_v42, %v4648_v63  ;;  %vm3186_vm0 = vcmp.eq.s32.totalorder %v3184_v24, 0  ;;  %v6656_v63 = vld [vmem:[#allocation8 + $0x14] ss:$8 sps:$4 sm:$0xff]  }
 0x2d6   : > { %vm3189_vm4 = vcmp.eq.s32.totalorder %v3184_v24, 2  ;;  %v4847_v0 = vand.u32 3, %v4846_v61  ;;  %vm3288_vm3 = vcmp.lt.s32.totalorder %v3287_v62, 2  ;;  %v4951_v49 = vand.u32 3, %v4950_v55  ;;  %v6657_v55 = vld [vmem:[#allocation8 + $0x20] ss:$8 sps:$4 sm:$0xff]  }
 0x2d7   : > { %v588_v27 = vrot.slane %v583_v54, %v9624_v35  ;;  %v592_v10 = vrot.slane %v583_v54, %v9625_v34  ;;  %6473 = vrot.lane.b32.xlu1 %v6472_v28, %s6999_s15  ;;  %vm3289_vm1 = vcmp.eq.s32.totalorder %v3287_v62, 0  ;;  %vm3292_vm9 = vcmp.eq.s32.totalorder %v3287_v62, 2  ;;  %v6659_v62 = vld [vmem:[#allocation8 + $0x24] ss:$8 sps:$4 sm:$0xff]   ;;  %v6662_v54 = vld [vmem:[#allocation8 + $0x34] ss:$8 sps:$4 sm:$0xff]  }
 0x2d8   : > { %v6750_v13 = vpop.eup %6749  ;;  %vm4849_vm11 = vcmp.eq.s32.totalorder %v4847_v0, 0  ;;  %vm4852_vm7 = vcmp.eq.s32.totalorder %v4847_v0, 2  ;;  %vm4848_vm8 = vcmp.lt.s32.totalorder %v4847_v0, 2  ;;  %vm4952_vm13 = vcmp.lt.s32.totalorder %v4951_v49, 2  ;;  %v6665_v42 = vld [vmem:[#allocation8 + $0x44] ss:$8 sps:$4 sm:$0xff]  }
 0x2d9   : > { %v3187_v5 = vxor.u32 2147483648, %v6750_v13  ;;  %v4854_v25 = vsel %vm4852_vm7, %v3190_v14, %v6750_v13  ;;  %vm4956_vm12 = vcmp.eq.s32.totalorder %v4951_v49, 2  ;;  %v3191_v22 = vsel %vm3189_vm4, %v3190_v14, %v6750_v13 }
 0x2da   : > { %v6246_v12 = vadd.f32 %v8954_v1, %v588_v27  ;;  %v6247_v32 = vadd.f32 %v9039_v38, %v592_v10  ;;  %v6752_v4 = vpop.eup %6751  ;;  %v6248_v41 = vadd.f32 %v9055_v31, %v588_v27  ;;  %v6249_v21 = vadd.f32 %v9064_v6, %v592_v10  ;;  %v6668_v27 = vld [vmem:[#allocation8 + $0x54] ss:$8 sps:$4 sm:$0xff]  }
 0x2db   : > { %v4851_v9 = vsel %vm4849_vm11, %v6748_v20, %v3187_v5  ;;  %v3188_v17 = vsel %vm3186_vm0, %v6748_v20, %v3187_v5  ;;  %v3293_v58 = vxor.u32 2147483648, %v6752_v4  ;;  %vm4953_vm14 = vcmp.eq.s32.totalorder %v4951_v49, 0  ;;  %v6663_v49 = vld [vmem:[#allocation8 + $0x40] ss:$8 sps:$4 sm:$0xff]  }
 0x2dc   : > { %v6754_v11 = vpop.eup %6753  ;;  %v4855_v18 = vsel %vm4848_vm8, %v4851_v9, %v4854_v25  ;;  %v3192_v33 = vsel %vm3185_vm6, %v3188_v17, %v3191_v22  ;;  %v1234_v38 = vmax.f32 %v6246_v12, 0.0  ;;  %v1235_v3 = vmax.f32 %v6247_v32, 0.0  ;;  %v6666_v25 = vld [vmem:[#allocation8 + $0x50] ss:$8 sps:$4 sm:$0xff]   ;;  %v6671_v22 = vld [vmem:[#allocation8 + $0x64] ss:$8 sps:$4 sm:$0xff]  }
 0x2dd   : > { %v3290_v57 = vxor.u32 2147483648, %v6754_v11  ;;  %v9118_v1 = vsel %vm3183_vm2, nan, %v3192_v33  ;;  %v3294_v23 = vsel %vm3292_vm9, %v3293_v58, %v6754_v11  ;;  %v4958_v47 = vsel %vm4956_vm12, %v3293_v58, %v6754_v11  ;;  %v6669_v12 = vld [vmem:[#allocation8 + $0x60] ss:$8 sps:$4 sm:$0xff]   ;;  %v6674_v32 = vld [vmem:[#allocation8 + $0x74] ss:$8 sps:$4 sm:$0xff]  }
 0x2de   : > { %v1236_v31 = vmax.f32 %v6248_v41, 0.0  ;;  %v1237_v2 = vmax.f32 %v6249_v21, 0.0  ;;  %vm3286_vm15 = vweird.f32 %v8417_v56  ;;  %v4856_v61 = vsel %vm3183_vm2, nan, %v4855_v18  ;;  %v6654_v56 = vld [vmem:[#allocation8 + $0x10] ss:$8 sps:$4 sm:$0xff]   ;;  %v6675_v9 = vld [vmem:[#allocation9 + $0x40] sm:$0xff]  }
 0x2df   : > { %v3291_v6 = vsel %vm3289_vm1, %v6752_v4, %v3290_v57  ;;  %v4955_v52 = vsel %vm4953_vm14, %v6752_v4, %v3290_v57  ;;  %v9626_v37 = vmov 0   ;;  %vm5025_vm10 = vcmask 523264   ;;  %v6672_v4 = vld [vmem:[#allocation8 + $0x70] ss:$8 sps:$4 sm:$0xff]   ;;  %v6676_v17 = vld [vmem:[#allocation9] sm:$0xff]   ;;  %v6678_v11 = vld [vmem:[#allocation9 + $0x8] sm:$0xff]  }
 0x2e0   : > { %v3295_v24 = vsel %vm3288_vm3, %v3291_v6, %v3294_v23  ;;  %v4959_v29 = vsel %vm4952_vm13, %v4955_v52, %v4958_v47  ;;  %v1238_v36 = vpack.c.bf16 %v1236_v31, %v1234_v38  ;;  %v1239_v60 = vpack.c.bf16 %v1237_v2, %v1235_v3  ;;  %v6679_v33 = vld [vmem:[#allocation9 + $0x50] sm:$0xff]  }
 0x2e1   : > { %v9126_v45 = vsel %vm3286_vm15, nan, %v3295_v24  ;;  %v4960_v20 = vsel %vm3286_vm15, nan, %v4959_v29  ;;  %v6680_v38 = vld [vmem:[#allocation9 + $0x10] sm:$0xff]   ;;  %vm7001_vm5 = vmmov 0  }
 0x2e2   : > { %v6477_v53 = vpack.i.bf16 %v4960_v20, %v4856_v61  ;;  %1407 = vmatprep.mubr.bf16.mxu1 %v1239_v60 }
 0x2e3   : > { %1408 = vmatmul.mubr.bf16.vlgmr.msra.gmra.mrb[0].mxu1 %v1238_v36 }
 0x2e4   : > { %6478 = vrot.lane.b32.xlu0 %v6477_v53, %s6999_s15  ;;  %5159 = vmatpush1.bf16.msra.mxu1 %v6651_v43  ;;  %v6681_v53 = vld [vmem:[#allocation9 + $0x58] sm:$0xff]  }
 0x2e5   : > { %5160 = vmatprep.subr.bf16.mxu1 %v6656_v63  ;;  %5190 = vmatprep.mubr.bf16.mxu1 %v9626_v37 }
 0x2e8   : > { %5161 = vmatpush1.bf16.msra.mxu1 %v6654_v56  ;;  %v6444_v14 = vpop.permute.xlu1 %6443  ;;  %v6682_v56 = vld [vmem:[#allocation9 + $0x18] sm:$0xff]  }
 0x2e9   : > { %5162 = vmatprep.subr.bf16.mxu1 %v6659_v62  ;;  %v6446_v28 = vunpack.i.h.bf16 %v6444_v14  ;;  %v6445_v0 = vunpack.i.l.bf16 %v6444_v14  ;;  %v6683_v62 = vld [vmem:[#allocation9 + $0x60] sm:$0xff]   ;;  %v6687_v14 = vld [vmem:[#allocation9 + $0x70] sm:$0xff]  }
 0x2eb   : > { %v5026_v10 = vsel %vm5025_vm10, %v8579_v44, %v6445_v0  ;;  %v5027_v13 = vsel %vm5025_vm10, %v8634_v46, %v6446_v28  ;;  %v6677_v44 = vld [vmem:[#allocation9 + $0x48] sm:$0xff]   ;;  %v6688_v28 = vld [vmem:[#allocation9 + $0x30] sm:$0xff]  }
 0x2ec   : > { %5163 = vmatpush1.bf16.msra.mxu1 %v6657_v55  ;;  %v5042_v5 = vpack.c.bf16 %v5027_v13, %v5026_v10 }
 0x2ed   : > { %5164 = vmatprep.subr.bf16.mxu1 %v6662_v54 }
 0x2f0   : > { %5165 = vmatpush1.bf16.msra.mxu1 %v6660_v40  ;;  %v6685_v40 = vld [vmem:[#allocation9 + $0x68] sm:$0xff]  }
 0x2f1   : > { %5166 = vmatprep.subr.bf16.mxu1 %v6665_v42  ;;  %v6686_v42 = vld [vmem:[#allocation9 + $0x28] sm:$0xff]  }
 0x2f4   : > { %5167 = vmatpush1.bf16.msra.mxu1 %v6663_v49 }
 0x2f5   : > { %5168 = vmatprep.subr.bf16.mxu1 %v6668_v27 }
 0x2f8   : > { %5169 = vmatpush1.bf16.msra.mxu1 %v6666_v25 }
 0x2f9   : > { %5170 = vmatprep.subr.bf16.mxu1 %v6671_v22 }
 0x2fc   : > { %5171 = vmatpush1.bf16.msra.mxu1 %v6669_v12  ;;  %v6449_v41 = vpop.permute.xlu0 %6448 }
 0x2fd   : > { %5172 = vmatprep.subr.bf16.mxu1 %v6674_v32  ;;  %v6451_v21 = vunpack.i.h.bf16 %v6449_v41  ;;  %v6450_v46 = vunpack.i.l.bf16 %v6449_v41 }
 0x2ff   : > { %v5028_v58 = vsel %vm5025_vm10, %v8699_v30, %v6450_v46  ;;  %v5029_v18 = vsel %vm5025_vm10, %v8716_v50, %v6451_v21 }
 0x300   : > { %5173 = vmatpush1.bf16.msra.mxu1 %v6672_v4  ;;  %v5043_v57 = vpack.c.bf16 %v5029_v18, %v5028_v58  ;;  %v6689_v4 = vld [vmem:[#allocation9 + $0x78] sm:$0xff]  }
 0x301   : > { %6153 = vmatprep.subr.bf16.mxu1 %v6675_v9 }
 0x303   : > { %5191 = vmatmul.mubr.bf16.vlgmr.msra.gmra.mrb[4].mxu1 %v5042_v5 }
 0x304   : > { %5200 = vmatprep.mubr.bf16.mxu1 %v9626_v37  ;;  %6154 = vmatpush3.bf16.msra.mxu1 %v6676_v17 }
 0x305   : > { %6155 = vmatprep.subr.bf16.mxu1 %v6677_v44 }
 0x308   : > { %6156 = vmatpush3.bf16.msra.mxu1 %v6678_v11 }
 0x309   : > { %6157 = vmatprep.subr.bf16.mxu1 %v6679_v33 }
 0x30b   : > { %5201 = vmatmul.mubr.bf16.gmra.mrb[8].mxu1 %v5043_v57 }
 0x30c   : > { %5210 = vmatprep.mubr.bf16.mxu1 %v9626_v37  ;;  %6158 = vmatpush3.bf16.msra.mxu1 %v6680_v38 }
 0x30d   : > { %6159 = vmatprep.subr.bf16.mxu1 %v6681_v53 }
 0x30e   : > { %v6454_v3 = vpop.permute.xlu1 %6453 }
 0x30f   : > { %v6456_v23 = vunpack.i.h.bf16 %v6454_v3  ;;  %v6455_v47 = vunpack.i.l.bf16 %v6454_v3 }
 0x310   : > { %6160 = vmatpush3.bf16.msra.mxu1 %v6682_v56 }
 0x311   : > { %v5030_v31 = vsel %vm5025_vm10, %v8769_v8, %v6455_v47  ;;  %v5031_v30 = vsel %vm5025_vm10, %v8785_v51, %v6456_v23  ;;  %6161 = vmatprep.subr.bf16.mxu1 %v6683_v62 }
 0x312   : > { %v5044_v50 = vpack.c.bf16 %v5031_v30, %v5030_v31 }
 0x314   : > { %5211 = vmatmul.mubr.bf16.gmra.mrb[12].mxu1 %v5044_v50 }
 0x315   : > { %5220 = vmatprep.mubr.bf16.mxu1 %v9626_v37 }
 0x31b   : > { %v6459_v2 = vpop.permute.xlu0 %6458 }
 0x31c   : > { %v6461_v6 = vunpack.i.h.bf16 %v6459_v2  ;;  %v6460_v52 = vunpack.i.l.bf16 %v6459_v2 }
 0x31e   : > { %v5032_v24 = vsel %vm5025_vm10, %v8804_v59, %v6460_v52  ;;  %v5033_v29 = vsel %vm5025_vm10, %v8842_v26, %v6461_v6 }
 0x31f   : > { %v5045_v36 = vpack.c.bf16 %v5033_v29, %v5032_v24 }
 0x321   : > { %5221 = vmatmul.mubr.bf16.gmra.mrb[16].mxu1 %v5045_v36 }
 0x322   : > { %5230 = vmatprep.mubr.bf16.mxu1 %v9626_v37 }
 0x32c   : > { %v6464_v8 = vpop.permute.xlu1 %6463 }
 0x32d   : > { %v6466_v60 = vunpack.i.h.bf16 %v6464_v8  ;;  %v6465_v51 = vunpack.i.l.bf16 %v6464_v8 }
 0x32f   : > { %v5034_v43 = vsel %vm5025_vm10, %v8911_v48, %v6465_v51  ;;  %v5035_v61 = vsel %vm5025_vm10, %v8940_v15, %v6466_v60  ;;  %v6684_v15 = vld [vmem:[#allocation9 + $0x20] sm:$0xff]  }
 0x330   : > { %v5046_v20 = vpack.c.bf16 %v5035_v61, %v5034_v43  ;;  %6162 = vmatpush3.bf16.msra.mxu1 %v6684_v15 }
 0x331   : > { %6163 = vmatprep.subr.bf16.mxu1 %v6685_v40 }
 0x332   : > { %5231 = vmatmul.mubr.bf16.gmra.mrb[20].mxu1 %v5046_v20 }
 0x333   : > { %5240 = vmatprep.mubr.bf16.mxu1 %v9626_v37 }
 0x334   : > { %6164 = vmatpush3.bf16.msra.mxu1 %v6686_v42 }
 0x335   : > { %6165 = vmatprep.subr.bf16.mxu1 %v6687_v14 }
 0x338   : > { %6166 = vmatpush3.bf16.msra.mxu1 %v6688_v28 }
 0x339   : > { %v6469_v59 = vpop.permute.xlu0 %6468  ;;  %6167 = vmatprep.subr.bf16.mxu1 %v6689_v4 }
 0x33a   : > { %v6471_v63 = vunpack.i.h.bf16 %v6469_v59  ;;  %v6470_v26 = vunpack.i.l.bf16 %v6469_v59 }
 0x33c   : > { %v5036_v55 = vsel %vm5025_vm10, %v8975_v16, %v6470_v26  ;;  %v5037_v54 = vsel %vm5025_vm10, %v9011_v7, %v6471_v63 }
 0x33d   : > { %v5047_v48 = vpack.c.bf16 %v5037_v54, %v5036_v55 }
 0x33f   : > { %5241 = vmatmul.mubr.bf16.gmra.mrb[24].mxu1 %v5047_v48 }
 0x340   : > { %5250 = vmatprep.mubr.bf16.mxu1 %v9626_v37 }
 0x349   : > { %v6474_v16 = vpop.permute.xlu1 %6473 }
 0x34a   : > { %v6476_v0 = vunpack.i.h.bf16 %v6474_v16  ;;  %v6475_v49 = vunpack.i.l.bf16 %v6474_v16 }
 0x34c   : > { %v5038_v7 = vsel %vm5025_vm10, %v9073_v19, %v6475_v49  ;;  %v5039_v27 = vsel %vm5025_vm10, %v9104_v39, %v6476_v0  ;;  %v6690_v19 = vld [vmem:[#allocation9 + $0x38] sm:$0xff]  }
 0x34d   : > { %v5048_v10 = vpack.c.bf16 %v5039_v27, %v5038_v7  ;;  %6168 = vmatpush3.bf16.msra.mxu1 %v6690_v19 }
 0x34f   : > { %5251 = vmatmul.mubr.bf16.gmra.mrb[28].mxu1 %v5048_v10 }
 0x350   : > { %5260 = vmatprep.mubr.bf16.mxu1 %v9626_v37 }
 0x356   : > { %v6479_v13 = vpop.permute.xlu0 %6478 }
 0x357   : > { %v6481_v5 = vunpack.i.h.bf16 %v6479_v13  ;;  %v6480_v25 = vunpack.i.l.bf16 %v6479_v13 }
 0x359   : > { %v5040_v22 = vsel %vm5025_vm10, %v9118_v1, %v6480_v25  ;;  %v5041_v12 = vsel %vm5025_vm10, %v9126_v45, %v6481_v5  ;;  %v5066_v1 = vld [vmem:[%s9401_s9] sm:$0x3] }
 0x35a   : > { %v5049_v32 = vpack.c.bf16 %v5041_v12, %v5040_v22  ;;  %v9179_v45 = vrot.slane %v5066_v1, %v9624_v35  ;;  %v9182_v21 = vrot.slane %v5066_v1, %v9625_v34 }
 0x35c   : > { %5261 = vmatmul.mubr.bf16.gmra.mrb[32].mxu1 %v5049_v32 }
 0x3b6   : > { %v6147_v39 = vpop.f32.mrb[0].mxu1 }
 0x3b7   : > { %v6148_v9 = vpop.f32.mrb[1].mxu1 }
 0x3b8   : > { %v9171_v17 = vadd.f32 %v6148_v9, %v6147_v39  ;;  %v6150_v37 = vpop.f32.mrb[2].mxu1 }
 0x3b9   : > { %v6151_v44 = vpop.f32.mrb[3].mxu1 }
 0x3ba   : > { %v9173_v41 = vadd.f32 %v6151_v44, %v6150_v37 }
 0x3d6   : > { %v5192_v46 = vpop.f32.mrb[4].mxu1 }
 0x3d7   : > { %v5193_v11 = vadd.f32 %v5192_v46, %v9179_v45  ;;  %v5194_v58 = vpop.f32.mrb[5].mxu1 }
 0x3d8   : > { %v5195_v18 = vadd.f32 %v5194_v58, %v9182_v21  ;;  %v5196_v33 = vpop.f32.mrb[6].mxu1 }
 0x3d9   : > { %v5197_v57 = vadd.f32 %v5196_v33, %v9179_v45  ;;  %v5198_v38 = vpop.f32.mrb[7].mxu1  ;;  %v5271_v23 = vmax.f32 %v5193_v11, 0.0 }
 0x3da   : > { %v5199_v3 = vadd.f32 %v5198_v38, %v9182_v21  ;;  %v5272_v31 = vmax.f32 %v5195_v18, 0.0 }
 0x3db   : > { %v5273_v47 = vmax.f32 %v5197_v57, 0.0 }
 0x3dc   : > { %v5274_v35 = vmax.f32 %v5199_v3, 0.0 }
 0x3dd   : > { %v5303_v30 = vpack.c.bf16 %v5273_v47, %v5271_v23 }
 0x3de   : > { %v5304_v50 = vpack.c.bf16 %v5274_v35, %v5272_v31  ;;  %v5202_v34 = vpop.f32.mrb[8].mxu1 }
 0x3df   : > { %v5203_v2 = vadd.f32 %v5202_v34, %v9179_v45  ;;  %v5204_v6 = vpop.f32.mrb[9].mxu1 }
 0x3e0   : > { %v5205_v52 = vadd.f32 %v5204_v6, %v9182_v21  ;;  %v5206_v24 = vpop.f32.mrb[10].mxu1  ;;  %5486 = vmatprep.mubr.bf16.mxu1 %v5304_v50 }
 0x3e1   : > { %v5207_v29 = vadd.f32 %v5206_v24, %v9179_v45  ;;  %v5208_v36 = vpop.f32.mrb[11].mxu1  ;;  %5487 = vmatmul.mubr.bf16.vlgmr.msra.gmra.mrb[36].mxu1 %v5303_v30  ;;  %v5275_v60 = vmax.f32 %v5203_v2, 0.0 }
 0x3e2   : > { %v5209_v8 = vadd.f32 %v5208_v36, %v9182_v21  ;;  %v5276_v43 = vmax.f32 %v5205_v52, 0.0 }
 0x3e3   : > { %v5277_v51 = vmax.f32 %v5207_v29, 0.0 }
 0x3e4   : > { %v5278_v61 = vmax.f32 %v5209_v8, 0.0 }
 0x3e5   : > { %v5305_v20 = vpack.c.bf16 %v5277_v51, %v5275_v60 }
 0x3e6   : > { %v5306_v59 = vpack.c.bf16 %v5278_v61, %v5276_v43 }
 0x3e7   : > { %v5212_v63 = vpop.f32.mrb[12].mxu1 }
 0x3e8   : > { %5494 = vmatprep.mubr.bf16.mxu1 %v5306_v59  ;;  %v5213_v26 = vadd.f32 %v5212_v63, %v9179_v45  ;;  %v5214_v53 = vpop.f32.mrb[13].mxu1 }
 0x3e9   : > { %5495 = vmatmul.mubr.bf16.gmra.mrb[40].mxu1 %v5305_v20  ;;  %v5215_v56 = vadd.f32 %v5214_v53, %v9182_v21  ;;  %v5216_v62 = vpop.f32.mrb[14].mxu1 }
 0x3ea   : > { %v5217_v55 = vadd.f32 %v5216_v62, %v9179_v45  ;;  %v5218_v54 = vpop.f32.mrb[15].mxu1  ;;  %v5279_v15 = vmax.f32 %v5213_v26, 0.0 }
 0x3eb   : > { %v5219_v48 = vadd.f32 %v5218_v54, %v9182_v21  ;;  %v5280_v42 = vmax.f32 %v5215_v56, 0.0 }
 0x3ec   : > { %v5281_v40 = vmax.f32 %v5217_v55, 0.0 }
 0x3ed   : > { %v5282_v14 = vmax.f32 %v5219_v48, 0.0 }
 0x3ee   : > { %v5307_v28 = vpack.c.bf16 %v5281_v40, %v5279_v15 }
 0x3ef   : > { %v5308_v16 = vpack.c.bf16 %v5282_v14, %v5280_v42 }
 0x3f1   : > { %5502 = vmatprep.mubr.bf16.mxu1 %v5308_v16 }
 0x3f2   : > { %5503 = vmatmul.mubr.bf16.gmra.mrb[44].mxu1 %v5307_v28 }
 0x3f4   : > { %v5222_v0 = vpop.f32.mrb[16].mxu1 }
 0x3f5   : > { %v5223_v49 = vadd.f32 %v5222_v0, %v9179_v45  ;;  %v5224_v7 = vpop.f32.mrb[17].mxu1 }
 0x3f6   : > { %v5225_v27 = vadd.f32 %v5224_v7, %v9182_v21  ;;  %v5226_v10 = vpop.f32.mrb[18].mxu1 }
 0x3f7   : > { %v5227_v13 = vadd.f32 %v5226_v10, %v9179_v45  ;;  %v5228_v5 = vpop.f32.mrb[19].mxu1  ;;  %v5283_v22 = vmax.f32 %v5223_v49, 0.0 }
 0x3f8   : > { %v5229_v25 = vadd.f32 %v5228_v5, %v9182_v21  ;;  %v5284_v32 = vmax.f32 %v5225_v27, 0.0 }
 0x3f9   : > { %v5285_v12 = vmax.f32 %v5227_v13, 0.0 }
 0x3fa   : > { %v5286_v4 = vmax.f32 %v5229_v25, 0.0 }
 0x3fb   : > { %v5309_v19 = vpack.c.bf16 %v5285_v12, %v5283_v22 }
 0x3fc   : > { %v5310_v39 = vpack.c.bf16 %v5286_v4, %v5284_v32  ;;  %v9219_v4 = vld [vmem:[%s9627_s19] ss:$0 sm:$0xff]  ;;  %s6905_s19 = scalar_lea.vmem %s9343_s28, 256 }
 0x3fd   : > { %p6906_p10 = scmp.ne.s32.totalorder %s9343_s28, %s6905_s19  ;;  %p6913_p2 = scmp.lt.s32.totalorder %s6911_s11, %s6905_s19 }
 0x3fe   : > { %5510 = vmatprep.mubr.bf16.mxu1 %v5310_v39 }
 0x3ff   : > { %5511 = vmatmul.mubr.bf16.gmra.mrb[48].mxu1 %v5309_v19  ;;  %p6907_p3 = pnand %p6906_p10, %p7218_p5  ;;  %p6914_p1 = por %p6913_p2, %p6912_p12 }
 0x401   : > { %p6908_p7 = pneg %p6907_p3 }
 0x403   : > { %p6915_p4 = pnand %p6914_p1, %p6908_p7 }
 0x405   : > { %v5232_v9 = vpop.f32.mrb[20].mxu1 }
 0x406   : > { %v5233_v37 = vadd.f32 %v5232_v9, %v9179_v45  ;;  %v5234_v44 = vpop.f32.mrb[21].mxu1 }
 0x407   : > { %v5235_v1 = vadd.f32 %v5234_v44, %v9182_v21  ;;  %v5236_v46 = vpop.f32.mrb[22].mxu1 }
 0x408   : > { %v5237_v11 = vadd.f32 %v5236_v46, %v9179_v45  ;;  %v5238_v58 = vpop.f32.mrb[23].mxu1  ;;  %v5287_v33 = vmax.f32 %v5233_v37, 0.0 }
 0x409   : > { %v5239_v18 = vadd.f32 %v5238_v58, %v9182_v21  ;;  %v5288_v38 = vmax.f32 %v5235_v1, 0.0 }
 0x40a   : > { %v5289_v57 = vmax.f32 %v5237_v11, 0.0 }
 0x40b   : > { %v5290_v3 = vmax.f32 %v5239_v18, 0.0 }
 0x40c   : > { %v5311_v23 = vpack.c.bf16 %v5289_v57, %v5287_v33 }
 0x40d   : > { %v5312_v47 = vpack.c.bf16 %v5290_v3, %v5288_v38 }
 0x40f   : > { %5518 = vmatprep.mubr.bf16.mxu1 %v5312_v47 }
 0x410   : > { %5519 = vmatmul.mubr.bf16.gmra.mrb[52].mxu1 %v5311_v23 }
 0x412   : > { %v5242_v31 = vpop.f32.mrb[24].mxu1 }
 0x413   : > { %v5243_v35 = vadd.f32 %v5242_v31, %v9179_v45  ;;  %v5244_v30 = vpop.f32.mrb[25].mxu1 }
 0x414   : > { %v5245_v50 = vadd.f32 %v5244_v30, %v9182_v21  ;;  %v5246_v34 = vpop.f32.mrb[26].mxu1 }
 0x415   : > { %v5247_v2 = vadd.f32 %v5246_v34, %v9179_v45  ;;  %v5248_v6 = vpop.f32.mrb[27].mxu1  ;;  %v5291_v24 = vmax.f32 %v5243_v35, 0.0 }
 0x416   : > { %v5249_v52 = vadd.f32 %v5248_v6, %v9182_v21  ;;  %v5292_v36 = vmax.f32 %v5245_v50, 0.0 }
 0x417   : > { %v5293_v29 = vmax.f32 %v5247_v2, 0.0 }
 0x418   : > { %v5294_v8 = vmax.f32 %v5249_v52, 0.0 }
 0x419   : > { %v5313_v60 = vpack.c.bf16 %v5293_v29, %v5291_v24 }
 0x41a   : > { %v5314_v51 = vpack.c.bf16 %v5294_v8, %v5292_v36 }
 0x41c   : > { %5526 = vmatprep.mubr.bf16.mxu1 %v5314_v51 }
 0x41d   : > { %5527 = vmatmul.mubr.bf16.gmra.mrb[56].mxu1 %v5313_v60 }
 0x422   : > { %v5252_v43 = vpop.f32.mrb[28].mxu1 }
 0x423   : > { %v5253_v61 = vadd.f32 %v5252_v43, %v9179_v45  ;;  %v5254_v20 = vpop.f32.mrb[29].mxu1 }
 0x424   : > { %v5255_v59 = vadd.f32 %v5254_v20, %v9182_v21  ;;  %v5256_v63 = vpop.f32.mrb[30].mxu1 }
 0x425   : > { %v5257_v26 = vadd.f32 %v5256_v63, %v9179_v45  ;;  %v5258_v53 = vpop.f32.mrb[31].mxu1  ;;  %v5295_v62 = vmax.f32 %v5253_v61, 0.0 }
 0x426   : > { %v5259_v56 = vadd.f32 %v5258_v53, %v9182_v21  ;;  %v5296_v54 = vmax.f32 %v5255_v59, 0.0 }
 0x427   : > { %v5297_v55 = vmax.f32 %v5257_v26, 0.0 }
 0x428   : > { %v5298_v48 = vmax.f32 %v5259_v56, 0.0  ;;  %v7000_v56 = vmov 0.0  }
 0x429   : > { %v5315_v15 = vpack.c.bf16 %v5297_v55, %v5295_v62  ;;  %6226 = vmatprep.subr.bf16.mxu1 %v7000_v56 }
 0x42a   : > { %v5316_v40 = vpack.c.bf16 %v5298_v48, %v5296_v54 }
 0x42c   : > { %5534 = vmatprep.mubr.bf16.mxu1 %v5316_v40 }
 0x42d   : > { %5535 = vmatmul.mubr.bf16.gmra.mrb[60].mxu1 %v5315_v15 }
 0x42f   : > { %v5262_v42 = vpop.f32.mrb[32].mxu1 }
 0x430   : > { %v5263_v14 = vadd.f32 %v5262_v42, %v9179_v45  ;;  %v5264_v28 = vpop.f32.mrb[33].mxu1 }
 0x431   : > { %v5265_v16 = vadd.f32 %v5264_v28, %v9182_v21  ;;  %v5266_v0 = vpop.f32.mrb[34].mxu1 }
 0x432   : > { %v5267_v49 = vadd.f32 %v5266_v0, %v9179_v45  ;;  %v5268_v7 = vpop.f32.mrb[35].mxu1  ;;  %v5299_v10 = vmax.f32 %v5263_v14, 0.0 }
 0x433   : > { %v5269_v27 = vadd.f32 %v5268_v7, %v9182_v21  ;;  %v5300_v5 = vmax.f32 %v5265_v16, 0.0 }
 0x434   : > { %v5301_v13 = vmax.f32 %v5267_v49, 0.0 }
 0x435   : > { %v5302_v25 = vmax.f32 %v5269_v27, 0.0 }
 0x436   : > { %v5317_v22 = vpack.c.bf16 %v5301_v13, %v5299_v10 }
 0x437   : > { %v5318_v12 = vpack.c.bf16 %v5302_v25, %v5300_v5 }
 0x439   : > { %5542 = vmatprep.mubr.bf16.mxu1 %v5318_v12 }
 0x43a   : > { %5543 = vmatmul.mubr.bf16.gmra.mrb[64].mxu1 %v5317_v22 }
 0x43b   : > { %6242 = vmatprep.mubr.msk.bf16.mxu1 %vm7001_vm5, %v7000_v56 }
 0x4b4   : > { %v6169_v32 = vpop.f32.mrb[36].mxu1 }
 0x4b5   : > { %v6170_v19 = vpop.f32.mrb[37].mxu1 }
 0x4b6   : > { %v6171_v39 = vadd.f32 %v6170_v19, %v6169_v32  ;;  %v6172_v45 = vpop.f32.mrb[38].mxu1 }
 0x4b7   : > { %v6173_v9 = vpop.f32.mrb[39].mxu1 }
 0x4b8   : > { %v9222_v21 = vadd.f32 %v6171_v39, %v9219_v4  ;;  %v6174_v37 = vadd.f32 %v6173_v9, %v6172_v45 }
 0x4ba   : > { %v9225_v44 = vadd.f32 %v6174_v37, %v9219_v4  ;;  %v5565_v1 = vmul.f32 %v9222_v21, %v9222_v21 }
 0x4bc   : > { %v6175_v46 = vpop.f32.mrb[40].mxu1  ;;  %5581 = vadd.xlane.f32.xlu1 %v5565_v1  ;;  %v5566_v11 = vmul.f32 %v9225_v44, %v9225_v44 }
 0x4bd   : > { %v6176_v58 = vpop.f32.mrb[41].mxu1 }
 0x4be   : > { %v6177_v18 = vadd.f32 %v6176_v58, %v6175_v46  ;;  %v6178_v33 = vpop.f32.mrb[42].mxu1  ;;  %5583 = vadd.xlane.f32.xlu0 %v5566_v11 }
 0x4bf   : > { %v6179_v57 = vpop.f32.mrb[43].mxu1 }
 0x4c0   : > { %v9232_v38 = vadd.f32 %v6177_v18, %v9219_v4  ;;  %v6180_v3 = vadd.f32 %v6179_v57, %v6178_v33 }
 0x4c2   : > { %v9235_v23 = vadd.f32 %v6180_v3, %v9219_v4  ;;  %v5567_v47 = vmul.f32 %v9232_v38, %v9232_v38 }
 0x4c4   : > { %5585 = vadd.xlane.f32.xlu0 %v5567_v47  ;;  %v5568_v31 = vmul.f32 %v9235_v23, %v9235_v23  ;;  %v5947_v47 = vld [vmem:[%s9628_s22] ss:$0 sm:$0xff] }
 0x4c5   : > { %v6181_v35 = vpop.f32.mrb[44].mxu1 }
 0x4c6   : > { %5587 = vadd.xlane.f32.xlu1 %v5568_v31  ;;  %v6182_v30 = vpop.f32.mrb[45].mxu1 }
 0x4c7   : > { %v6183_v50 = vadd.f32 %v6182_v30, %v6181_v35  ;;  %v6184_v34 = vpop.f32.mrb[46].mxu1 }
 0x4c8   : > { %v6185_v2 = vpop.f32.mrb[47].mxu1 }
 0x4c9   : > { %v9242_v6 = vadd.f32 %v6183_v50, %v9219_v4  ;;  %v6186_v52 = vadd.f32 %v6185_v2, %v6184_v34  ;;  %v9299_v50 = vadd.f32 %v9171_v17, %v5947_v47 }
 0x4cb   : > { %v9245_v24 = vadd.f32 %v6186_v52, %v9219_v4  ;;  %v5569_v29 = vmul.f32 %v9242_v6, %v9242_v6  ;;  %v9307_v52 = vadd.f32 %v9173_v41, %v5947_v47 }
 0x4cd   : > { %5589 = vadd.xlane.f32.xlu0 %v5569_v29  ;;  %v5570_v36 = vmul.f32 %v9245_v24, %v9245_v24  ;;  %v5553_v17 = vmul.f32 %v9307_v52, %v9307_v52 }
 0x4cf   : > { %5591 = vadd.xlane.f32.xlu1 %v5570_v36  ;;  %v5552_v36 = vmul.f32 %v9299_v50, %v9299_v50 }
 0x4d2   : > { %v6187_v8 = vpop.f32.mrb[48].mxu1 }
 0x4d3   : > { %v6188_v60 = vpop.f32.mrb[49].mxu1 }
 0x4d4   : > { %v6189_v51 = vadd.f32 %v6188_v60, %v6187_v8  ;;  %v6190_v43 = vpop.f32.mrb[50].mxu1 }
 0x4d5   : > { %v6191_v61 = vpop.f32.mrb[51].mxu1 }
 0x4d6   : > { %v9252_v20 = vadd.f32 %v6189_v51, %v9219_v4  ;;  %v6192_v59 = vadd.f32 %v6191_v61, %v6190_v43 }
 0x4d8   : > { %v9255_v63 = vadd.f32 %v6192_v59, %v9219_v4  ;;  %v5571_v26 = vmul.f32 %v9252_v20, %v9252_v20 }
 0x4da   : > { %5593 = vadd.xlane.f32.xlu0 %v5571_v26  ;;  %v5572_v53 = vmul.f32 %v9255_v63, %v9255_v63 }
 0x4dc   : > { %5595 = vadd.xlane.f32.xlu1 %v5572_v53 }
 0x4e3   : > { %v6193_v62 = vpop.f32.mrb[52].mxu1 }
 0x4e4   : > { %v6194_v55 = vpop.f32.mrb[53].mxu1 }
 0x4e5   : > { %v6195_v54 = vadd.f32 %v6194_v55, %v6193_v62  ;;  %v6196_v48 = vpop.f32.mrb[54].mxu1 }
 0x4e6   : > { %v6197_v15 = vpop.f32.mrb[55].mxu1 }
 0x4e7   : > { %v9263_v40 = vadd.f32 %v6195_v54, %v9219_v4  ;;  %v6198_v42 = vadd.f32 %v6197_v15, %v6196_v48 }
 0x4e9   : > { %v9266_v14 = vadd.f32 %v6198_v42, %v9219_v4  ;;  %v5573_v28 = vmul.f32 %v9263_v40, %v9263_v40 }
 0x4eb   : > { %5597 = vadd.xlane.f32.xlu0 %v5573_v28  ;;  %v5574_v16 = vmul.f32 %v9266_v14, %v9266_v14 }
 0x4ed   : > { %5599 = vadd.xlane.f32.xlu1 %v5574_v16 }
 0x4f0   : > { %v6199_v0 = vpop.f32.mrb[56].mxu1 }
 0x4f1   : > { %v6200_v49 = vpop.f32.mrb[57].mxu1 }
 0x4f2   : > { %v6201_v7 = vadd.f32 %v6200_v49, %v6199_v0  ;;  %v6202_v27 = vpop.f32.mrb[58].mxu1 }
 0x4f3   : > { %v6203_v10 = vpop.f32.mrb[59].mxu1 }
 0x4f4   : > { %v9273_v13 = vadd.f32 %v6201_v7, %v9219_v4  ;;  %v6204_v5 = vadd.f32 %v6203_v10, %v6202_v27 }
 0x4f6   : > { %v9276_v25 = vadd.f32 %v6204_v5, %v9219_v4  ;;  %v5575_v22 = vmul.f32 %v9273_v13, %v9273_v13 }
 0x4f8   : > { %5601 = vadd.xlane.f32.xlu0 %v5575_v22  ;;  %v5576_v12 = vmul.f32 %v9276_v25, %v9276_v25 }
 0x4fa   : > { %5603 = vadd.xlane.f32.xlu1 %v5576_v12 }
 0x500   : > { %v6205_v32 = vpop.f32.mrb[60].mxu1 }
 0x501   : > { %v6206_v19 = vpop.f32.mrb[61].mxu1 }
 0x502   : > { %v6207_v39 = vadd.f32 %v6206_v19, %v6205_v32  ;;  %v6208_v45 = vpop.f32.mrb[62].mxu1 }
 0x503   : > { %v6209_v9 = vpop.f32.mrb[63].mxu1 }
 0x504   : > { %v9283_v37 = vadd.f32 %v6207_v39, %v9219_v4  ;;  %v6210_v1 = vadd.f32 %v6209_v9, %v6208_v45 }
 0x506   : > { %v9286_v46 = vadd.f32 %v6210_v1, %v9219_v4  ;;  %v5577_v11 = vmul.f32 %v9283_v37, %v9283_v37 }
 0x508   : > { %5605 = vadd.xlane.f32.xlu0 %v5577_v11  ;;  %v5578_v58 = vmul.f32 %v9286_v46, %v9286_v46 }
 0x50a   : > { %5607 = vadd.xlane.f32.xlu1 %v5578_v58 }
 0x50d   : > { %v6211_v18 = vpop.f32.mrb[64].mxu1 }
 0x50e   : > { %v6212_v33 = vpop.f32.mrb[65].mxu1 }
 0x50f   : > { %v6213_v57 = vadd.f32 %v6212_v33, %v6211_v18  ;;  %v6214_v3 = vpop.f32.mrb[66].mxu1 }
 0x510   : > { %v6215_v31 = vpop.f32.mrb[67].mxu1 }
 0x511   : > { %v9296_v35 = vadd.f32 %v6213_v57, %v9219_v4  ;;  %v6216_v30 = vadd.f32 %v6215_v31, %v6214_v3 }
 0x513   : > { %v9302_v34 = vadd.f32 %v6216_v30, %v9219_v4  ;;  %v5579_v2 = vmul.f32 %v9296_v35, %v9296_v35 }
 0x515   : > { %5609 = vadd.xlane.f32.xlu0 %v5579_v2  ;;  %v5580_v29 = vmul.f32 %v9302_v34, %v9302_v34 }
 0x517   : > { %5611 = vadd.xlane.f32.xlu1 %v5580_v29 }
 0x519   : > { %5554 = vadd.xlane.f32.xlu0 %v5552_v36 }
 0x51b   : > { %5556 = vadd.xlane.f32.xlu1 %v5553_v17 }
 0x549   : > { %v5582_v4 = vpop.xlane.xlu1 %5581 }
 0x54a   : > { %v5613_v8 = vmax.f32 %v5582_v4, 1e-24 }
 0x54b   : > { %v5584_v41 = vpop.xlane.xlu0 %5583 }
 0x54c   : > { %6755 = vrsqrt.f32 %v5613_v8  ;;  %v5614_v60 = vmax.f32 %v5584_v41, 1e-24 }
 0x54e   : > { %6757 = vrsqrt.f32 %v5614_v60 }
 0x551   : > { %v5586_v51 = vpop.xlane.xlu0 %5585 }
 0x552   : > { %v5615_v43 = vmax.f32 %v5586_v51, 1e-24 }
 0x553   : > { %v5588_v61 = vpop.xlane.xlu1 %5587 }
 0x554   : > { %6759 = vrsqrt.f32 %v5615_v43  ;;  %v5616_v59 = vmax.f32 %v5588_v61, 1e-24 }
 0x556   : > { %v6756_v26 = vpop.eup %6755  ;;  %6761 = vrsqrt.f32 %v5616_v59 }
 0x557   : > { %v5647_v62 = vmul.f32 %v6756_v26, %v9222_v21 }
 0x558   : > { %v6758_v53 = vpop.eup %6757 }
 0x559   : > { %v5648_v55 = vmul.f32 %v6758_v53, %v9225_v44 }
 0x55a   : > { %v5590_v15 = vpop.xlane.xlu0 %5589 }
 0x55b   : > { %v5664_v54 = vpack.c.bf16 %v5648_v55, %v5647_v62  ;;  %v5617_v28 = vmax.f32 %v5590_v15, 1e-24 }
 0x55c   : > { %v5592_v16 = vpop.xlane.xlu1 %5591 }
 0x55d   : > { %6227 = vmatpush3.bf16.msra.mxu1 %v5664_v54  ;;  %6763 = vrsqrt.f32 %v5617_v28  ;;  %v5618_v7 = vmax.f32 %v5592_v16, 1e-24  ;;  %v5562_v28 = vstv %s5551_s12 }
 0x55e   : > { %v6760_v48 = vpop.eup %6759  ;;  %6228 = vmatprep.subr.bf16.mxu1 %v7000_v56 }
 0x55f   : > { %v5649_v0 = vmul.f32 %v6760_v48, %v9232_v38  ;;  %6765 = vrsqrt.f32 %v5618_v7 }
 0x560   : > { %v6762_v42 = vpop.eup %6761 }
 0x561   : > { %v5650_v49 = vmul.f32 %v6762_v42, %v9235_v23 }
 0x563   : > { %v5665_v27 = vpack.c.bf16 %v5650_v49, %v5649_v0 }
 0x565   : > { %6229 = vmatpush3.bf16.msra.mxu1 %v5665_v27 }
 0x566   : > { %6230 = vmatprep.subr.bf16.mxu1 %v7000_v56 }
 0x567   : > { %v5594_v21 = vpop.xlane.xlu0 %5593  ;;  %v6764_v44 = vpop.eup %6763 }
 0x568   : > { %v5619_v10 = vmax.f32 %v5594_v21, 1e-24  ;;  %v5651_v32 = vmul.f32 %v6764_v44, %v9242_v6 }
 0x569   : > { %v5596_v5 = vpop.xlane.xlu1 %5595  ;;  %v6766_v22 = vpop.eup %6765 }
 0x56a   : > { %6767 = vrsqrt.f32 %v5619_v10  ;;  %v5620_v12 = vmax.f32 %v5596_v5, 1e-24  ;;  %v5652_v38 = vmul.f32 %v6766_v22, %v9245_v24 }
 0x56c   : > { %6769 = vrsqrt.f32 %v5620_v12  ;;  %v5666_v23 = vpack.c.bf16 %v5652_v38, %v5651_v32 }
 0x56e   : > { %6231 = vmatpush3.bf16.msra.mxu1 %v5666_v23 }
 0x56f   : > { %6232 = vmatprep.subr.bf16.mxu1 %v7000_v56 }
 0x574   : > { %v6768_v19 = vpop.eup %6767 }
 0x575   : > { %v5653_v9 = vmul.f32 %v6768_v19, %v9252_v20 }
 0x576   : > { %v6770_v39 = vpop.eup %6769 }
 0x577   : > { %v5654_v1 = vmul.f32 %v6770_v39, %v9255_v63 }
 0x578   : > { %v5598_v45 = vpop.xlane.xlu0 %5597 }
 0x579   : > { %v5621_v11 = vmax.f32 %v5598_v45, 1e-24  ;;  %v5667_v18 = vpack.c.bf16 %v5654_v1, %v5653_v9 }
 0x57a   : > { %v5600_v58 = vpop.xlane.xlu1 %5599 }
 0x57b   : > { %6771 = vrsqrt.f32 %v5621_v11  ;;  %v5622_v33 = vmax.f32 %v5600_v58, 1e-24  ;;  %6233 = vmatpush3.bf16.msra.mxu1 %v5667_v18 }
 0x57c   : > { %6234 = vmatprep.subr.bf16.mxu1 %v7000_v56 }
 0x57d   : > { %6773 = vrsqrt.f32 %v5622_v33 }
 0x585   : > { %v5602_v6 = vpop.xlane.xlu0 %5601  ;;  %v6772_v24 = vpop.eup %6771 }
 0x586   : > { %v5623_v57 = vmax.f32 %v5602_v6, 1e-24  ;;  %v5655_v20 = vmul.f32 %v6772_v24, %v9263_v40 }
 0x587   : > { %v5604_v3 = vpop.xlane.xlu1 %5603  ;;  %v6774_v47 = vpop.eup %6773 }
 0x588   : > { %6775 = vrsqrt.f32 %v5623_v57  ;;  %v5624_v31 = vmax.f32 %v5604_v3, 1e-24  ;;  %v5656_v63 = vmul.f32 %v6774_v47, %v9266_v14 }
 0x58a   : > { %6777 = vrsqrt.f32 %v5624_v31  ;;  %v5668_v30 = vpack.c.bf16 %v5656_v63, %v5655_v20 }
 0x58c   : > { %6235 = vmatpush3.bf16.msra.mxu1 %v5668_v30 }
 0x58d   : > { %6236 = vmatprep.subr.bf16.mxu1 %v7000_v56 }
 0x592   : > { %v6776_v2 = vpop.eup %6775 }
 0x593   : > { %v5657_v4 = vmul.f32 %v6776_v2, %v9273_v13 }
 0x594   : > { %v6778_v29 = vpop.eup %6777 }
 0x595   : > { %v5606_v36 = vpop.xlane.xlu0 %5605  ;;  %v5658_v8 = vmul.f32 %v6778_v29, %v9276_v25 }
 0x596   : > { %v5625_v17 = vmax.f32 %v5606_v36, 1e-24 }
 0x597   : > { %v5608_v41 = vpop.xlane.xlu1 %5607  ;;  %v5669_v51 = vpack.c.bf16 %v5658_v8, %v5657_v4 }
 0x598   : > { %6779 = vrsqrt.f32 %v5625_v17  ;;  %v5626_v60 = vmax.f32 %v5608_v41, 1e-24 }
 0x599   : > { %6237 = vmatpush3.bf16.msra.mxu1 %v5669_v51 }
 0x59a   : > { %6781 = vrsqrt.f32 %v5626_v60  ;;  %6238 = vmatprep.subr.bf16.mxu1 %v7000_v56 }
 0x5a2   : > { %v5610_v40 = vpop.xlane.xlu0 %5609  ;;  %v6780_v14 = vpop.eup %6779 }
 0x5a3   : > { %v5627_v43 = vmax.f32 %v5610_v40, 1e-24  ;;  %v5659_v13 = vmul.f32 %v6780_v14, %v9283_v37 }
 0x5a4   : > { %v5612_v61 = vpop.xlane.xlu1 %5611  ;;  %v6782_v59 = vpop.eup %6781 }
 0x5a5   : > { %6783 = vrsqrt.f32 %v5627_v43  ;;  %v5628_v26 = vmax.f32 %v5612_v61, 1e-24  ;;  %v5660_v25 = vmul.f32 %v6782_v59, %v9286_v46 }
 0x5a6   : > { %v5555_v53 = vpop.xlane.xlu0 %5554 }
 0x5a7   : > { %6785 = vrsqrt.f32 %v5628_v26  ;;  %v5558_v62 = vmax.f32 %v5555_v53, 1e-24  ;;  %v5670_v54 = vpack.c.bf16 %v5660_v25, %v5659_v13 }
 0x5a8   : > { %v5557_v55 = vpop.xlane.xlu1 %5556 }
 0x5a9   : > { %6787 = vrsqrt.f32 %v5558_v62  ;;  %v5559_v48 = vmax.f32 %v5557_v55, 1e-24  ;;  %6239 = vmatpush3.bf16.msra.mxu1 %v5670_v54 }
 0x5aa   : > { %6240 = vmatprep.subr.bf16.mxu1 %v7000_v56 }
 0x5ab   : > { %6789 = vrsqrt.f32 %v5559_v48 }
 0x5af   : > { %v6784_v15 = vpop.eup %6783 }
 0x5b0   : > { %v5661_v37 = vmul.f32 %v6784_v15, %v9296_v35 }
 0x5b1   : > { %v6786_v42 = vpop.eup %6785 }
 0x5b2   : > { %v5662_v46 = vmul.f32 %v6786_v42, %v9302_v34 }
 0x5b3   : > { %v6788_v16 = vpop.eup %6787 }
 0x5b4   : > { %v5563_v0 = vmul.f32 %v6788_v16, %v5562_v28  ;;  %v5671_v49 = vpack.c.bf16 %v5662_v46, %v5661_v37 }
 0x5b5   : > { %v6790_v7 = vpop.eup %6789 }
 0x5b6   : > { %v5564_v27 = vmul.f32 %v6790_v7, %v5562_v28  ;;  %6241 = vmatpush3.bf16.msra.mxu1 %v5671_v49  ;;  %v5645_v21 = vmul.f32 %v5563_v0, %v9299_v50 }
 0x5b8   : > { %v5646_v56 = vmul.f32 %v5564_v27, %v9307_v52 }
 0x5ba   : > { %v5663_v44 = vpack.c.bf16 %v5646_v56, %v5645_v21 }
 0x5bc   : > { %6243 = vmatmul.mubr.bf16.vlgmr.msra.gmra.mrb[68].mxu1 %v5663_v44 }
 0x68f   : > { %v5706_v35 = vpop.f32.mrb[68].mxu1 }
 0x690   : > { %5713 = vst [vmem:[%s477_s18] sm:$0xff] %v5706_v35  ;;  %v6244_v50 = vpop.f32.mrb[69].mxu1 }
 0x691   : > { %v5709_v34 = vpop.f32.mrb[70].mxu1 }
 0x692   : > { %5714 = vst [vmem:[%s477_s18 + $0x8] sm:$0xff] %v5709_v34  ;;  %v6245_v52 = vpop.f32.mrb[71].mxu1 }
 0x693   : > { %6918 = shalt.err (!%p6915_p4)
}
 0x694   : > { %s6919_s22 = scalar_lea.hbm %s9348_s29, 256  ;;  %s6923_s18 = scalar_lea.hbm %s9629_s14, 512 }
 0x695   : > { %p6920_p9 = scmp.ne.s32.totalorder %s9348_s29, %s6919_s22  ;;  %p6924_p8 = scmp.lt.u32.totalorder %s9348_s29, %s9629_s14 }
 0x696   : > { %p6925_p13 = scmp.lt.u32.totalorder %s6923_s18, %s6919_s22  ;;  %p6927_p10 = scmp.lt.u32.totalorder %s6919_s22, %s9348_s29 }
 0x697   : > { %p6921_p0 = pnand %p6920_p9, %p7218_p5 }
 0x698   : > { %p6926_p6 = por %p6925_p13, %p6924_p8 }
 0x699   : > { %p6922_p11 = pneg %p6921_p0 }
 0x69a   : > { %p6928_p3 = por %p6927_p10, %p6926_p6 }
 0x69c   : > { %p6929_p7 = pnand %p6928_p3, %p6922_p11 }
 0x69e   : > { %6932 = shalt.err (!%p6929_p7)
}
 0x69f   : > { %s7003_s15 = smov 128   ;;  %s7004_s19 = smov 8  }
 0x6a0   : > { %6339 = dma.vmem_to_hbm [thread:$0]  (%p7218_p5), %s9343_s28, 256, %s9348_s29, %s5716_s21, %s7003_s15, %s7003_s15, %s7004_s19  }
 0x6a1 PF: > { %s9630_s0 = sld [smem:[#allocation16_spill]]  ;;  %s9631_s17 = sld [smem:[#allocation17_spill]] }
 0x6a2   : > { %p9633_p2 = scmp.ge.s32.totalorder %s6979_s26, 2 }
 0x6a7   : > { %s5744_s11 = sand.u32 1, %s9630_s0   ;;  %p9632_p12 = scmp.ne.s32.totalorder %s9631_s17, 0 }
 0x6a8   : > { %s5745_s22 = scalar_lea.sflag [#allocation5], %s5744_s11 }
 0x6a9   : > { %p6356_p1 = pnand %p9633_p2, %p9632_p12 }
 0x6ab   : > { %6962 = dma.done.wait (!%p6356_p1), %s5745_s22, 256  }
 0x6ac   : > { %6964 = vsyncadd (!%p6356_p1), %s5745_s22, 4294967040  ;;  %s9634_s12 = smov %s7214_s23  ;;  %p28_p4 = scmp.ge.s32.totalorder %s7204_s5, 4  }
 0x6ad   : > { %s9635_s23 = smov %s6971_s24  ;;  %s9636_s24 = smov %s6975_s25 }
 0x6ae   : > { %s9637_s25 = smov %s9634_s12  ;;  %s9638_s26 = smov %s7204_s5 }
 0x6af   :  { %30 = sbr.rel (!%p28_p4) target bundleno = 12 (0xc), region = 125 }
 0x6b6   :  { %5750 = vsyncpa [#allocation4], 1 }
 0x6b7   :  { %5752 = vsyncpa [#allocation4 + $0x1], 1 }
 0x6b8   :  { %5753 = vsyncpa [#allocation7], 1 }
 0x6b9   :  { %5754 = vsyncpa [#allocation10], 1 }
 0x6ba   :  { %5755 = vsyncpa [#allocation5], 1 }
 0x6bb   :  { %5757 = vsyncpa [#allocation5 + $0x1], 1 }

</bundles_post_ra>
